<compile_context>
chip_gen: v7x
topology: tpu7x:2x2x1
jax: 0.10.0
libtpu: 0.0.40
codegen_flags: <defaults>
</compile_context>

<pallas_src>
import jax
import jax.numpy as jnp
import numpy as np
from jax.experimental import pallas as pl
from jax.experimental.pallas import tpu as pltpu


LANE_TILE = 512   # max pooled-position (lane) tile per conv grid step
ROW_TILE = 512    # max batch-row tile per fc grid step


def _round_up(x, m):
    return (x + m - 1) // m * m


# ----------------------------- Pallas kernels ------------------------------

def _conv_relu_pool_kernel(w_ref, b_ref, p_ref, o_ref):
    """w: (OC, K) bf16, b: (OC, 1) f32, p: (4, K, T) bf16, o: (OC, T) bf16.

    o = relu(max_q(W @ P_q) + b).  The 2x2 max-pool is the max over the four
    quadrant patch blocks; bias + ReLU commute with that max (shared bias,
    monotone ReLU) so they are applied once after it.
    """
    acc = jnp.dot(w_ref[...], p_ref[0], preferred_element_type=jnp.float32)
    for q in range(1, 4):
        acc = jnp.maximum(
            acc, jnp.dot(w_ref[...], p_ref[q],
                         preferred_element_type=jnp.float32))
    o_ref[...] = jnp.maximum(acc + b_ref[...], 0.0).astype(o_ref.dtype)


def _fc_fused_kernel(x_ref, w1_ref, b1_ref, w2_ref, b2_ref, o_ref):
    """Fused relu(x @ w1 + b1) @ w2 + b2; hidden activation stays in VMEM."""
    h = jnp.dot(x_ref[...], w1_ref[...], preferred_element_type=jnp.float32)
    h = jnp.maximum(h + b1_ref[...], 0.0)
    o = jnp.dot(h, w2_ref[...], preferred_element_type=jnp.float32)
    o_ref[...] = (o + b2_ref[...]).astype(o_ref.dtype)


# ------------------------------- wrappers -----------------------------------

def _pool_quadrant_patches(x_cnhw, kh, kw):
    """x: (C, N, H, W) -> (4, C*kh*kw, N*PH*PW) quadrant-major patches for a
    VALID conv(kh,kw) followed by a floor-mode 2x2/stride-2 max-pool.
    Quadrant q = 2*dy + dx; column (n, ph, pw) of quadrant q corresponds to
    conv output (oh=2*ph+dy, ow=2*pw+dx).  Positions dropped by the floor-mode
    pool are never generated/computed."""
    C, N, H, W = x_cnhw.shape
    ph, pw = (H - kh + 1) // 2, (W - kw + 1) // 2
    taps = []
    for i in range(kh):
        for j in range(kw):
            t = x_cnhw[:, :, i:i + 2 * ph, j:j + 2 * pw]
            taps.append(t.reshape(C, N, ph, 2, pw, 2))
    p = jnp.stack(taps, axis=1)                 # (C, T, N, ph, dy, pw, dx)
    p = p.transpose(4, 6, 0, 1, 2, 3, 5)        # (dy, dx, C, T, N, ph, pw)
    return p.reshape(4, C * kh * kw, N * ph * pw), ph, pw


def conv_relu_pool(x_cnhw, w, b):
    """Fused max_pool2d(relu(conv2d(x, w, b)), 2).

    x: (C, N, H, W) channel-major; w: (OC, C, KH, KW); b: (OC,)
    returns (OC, N, PH, PW) bf16 (channel-major, ready for the next layer).
    """
    C, N, H, W = x_cnhw.shape
    OC, C2, KH, KW = w.shape
    assert C == C2
    x_cnhw = x_cnhw.astype(jnp.bfloat16)        # bf16 MXU operand, f32 acc
    patches, ph, pw = _pool_quadrant_patches(x_cnhw, KH, KW)
    K = C * KH * KW
    blk = N * ph * pw
    lane_tile = min(LANE_TILE, _round_up(blk, 128))
    bp = _round_up(blk, lane_tile)              # grid divides bp evenly
    if bp != blk:
        patches = jnp.pad(patches, ((0, 0), (0, 0), (0, bp - blk)))
    w_mat = w.reshape(OC, K).astype(jnp.bfloat16)
    b_col = b.reshape(OC, 1).astype(jnp.float32)

    grid = (bp // lane_tile,)
    cost = pl.CostEstimate(
        flops=2 * OC * K * 4 * bp + 4 * OC * 4 * bp,
        transcendentals=0,
        bytes_accessed=2 * (OC * K + 4 * K * bp + OC * bp) + 4 * OC)
    out = pl.pallas_call(
        _conv_relu_pool_kernel,
        out_shape=jax.ShapeDtypeStruct((OC, bp), jnp.bfloat16),
        grid=grid,
        in_specs=[
            pl.BlockSpec((OC, K), lambda i: (0, 0)),          # resident
            pl.BlockSpec((OC, 1), lambda i: (0, 0)),          # resident
            pl.BlockSpec((4, K, lane_tile), lambda i: (0, 0, i)),
        ],
        out_specs=pl.BlockSpec((OC, lane_tile), lambda i: (0, i)),
        compiler_params=pltpu.CompilerParams(
            dimension_semantics=("parallel",),
            allow_input_fusion=[True, True, True]),
        cost_estimate=cost,
    )(w_mat, b_col, patches)
    return out[:, :blk].reshape(OC, N, ph, pw)


def fc_relu_fc(x, w1, b1, w2, b2):
    """x: (N, F) -> relu(x @ w1 + b1) @ w2 + b2 as one pallas_call."""
    N, F = x.shape
    F2, Hd = w1.shape
    Hd2, O = w2.shape
    assert F == F2 and Hd == Hd2
    x = x.astype(jnp.bfloat16)
    w1 = w1.astype(jnp.bfloat16)
    row_tile = N if N <= ROW_TILE else ROW_TILE
    grid = (pl.cdiv(N, row_tile),)
    cost = pl.CostEstimate(
        flops=2 * N * (F * Hd + Hd * O),
        transcendentals=0,
        bytes_accessed=2 * (N * F + F * Hd) + 4 * (Hd + Hd * O + O + N * O))
    return pl.pallas_call(
        _fc_fused_kernel,
        out_shape=jax.ShapeDtypeStruct((N, O), jnp.float32),
        grid=grid,
        in_specs=[
            pl.BlockSpec((row_tile, F), lambda i: (i, 0)),
            pl.BlockSpec((F, Hd), lambda i: (0, 0)),          # resident
            pl.BlockSpec((1, Hd), lambda i: (0, 0)),
            pl.BlockSpec((Hd, O), lambda i: (0, 0)),
            pl.BlockSpec((1, O), lambda i: (0, 0)),
        ],
        out_specs=pl.BlockSpec((row_tile, O), lambda i: (i, 0)),
        compiler_params=pltpu.CompilerParams(
            dimension_semantics=("parallel",),
            allow_input_fusion=[True, True, True, True, True]),
        cost_estimate=cost,
    )(x, w1, b1.reshape(1, Hd).astype(jnp.float32),
      w2.astype(jnp.float32), b2.reshape(1, O).astype(jnp.float32))


def cnn_forward(x, params):
    w1, b1, w2, b2, fw1, fb1, fw2, fb2 = params
    x = jnp.transpose(x, (1, 0, 2, 3))          # NCHW -> CNHW (channel-major)
    x = conv_relu_pool(x, w1, b1)               # (32, N, 13, 13) bf16
    x = conv_relu_pool(x, w2, b2)               # (64, N, 5, 5)  bf16
    n = x.shape[1]
    # PyTorch x.view(-1, 64*5*5) feature order (c, ph, pw); this tiny
    # transpose/reshape fuses into the fc kernel input (allow_input_fusion).
    x = jnp.transpose(x, (1, 0, 2, 3)).reshape(n, -1)
    # TODO(synk): fold conv2 + fc1/fc2 into one pallas_call once an in-kernel
    # (64, N*25) -> (N, 1600) flatten has a guaranteed Mosaic lowering.
    return fc_relu_fc(x, fw1, fb1, fw2, fb2)    # (N, 10) f32


# ------------------------------ pure-JAX ref --------------------------------

def reference_forward(x, params):
    w1, b1, w2, b2, fw1, fb1, fw2, fb2 = params
    hi = jax.lax.Precision.HIGHEST

    def conv(x, w, b):
        y = jax.lax.conv_general_dilated(
            x, w, window_strides=(1, 1), padding="VALID",
            dimension_numbers=("NCHW", "OIHW", "NCHW"), precision=hi)
        return jax.nn.relu(y + b.reshape(1, -1, 1, 1))

    def pool(x):
        N, C, H, W = x.shape
        x = x[:, :, : 2 * (H // 2), : 2 * (W // 2)]
        x = x.reshape(N, C, H // 2, 2, W // 2, 2)
        return x.max(axis=(3, 5))

    x = pool(conv(x, w1, b1))
    x = pool(conv(x, w2, b2))
    x = x.reshape(x.shape[0], -1)
    x = jax.nn.relu(jnp.dot(x, fw1, precision=hi) + fb1)
    return jnp.dot(x, fw2, precision=hi) + fb2


# ---------------------------------- main ------------------------------------

if __name__ == "__main__":
    key = jax.random.PRNGKey(0)
    ks = jax.random.split(key, 9)

    # MNIST-shaped input (required so that 64*5*5 == weidu holds): batch=2.
    x = jax.random.normal(ks[0], (2, 1, 28, 28), jnp.float32)

    # Deterministic synthetic parameters (shapes from CNN.__init__).
    w1 = jax.random.normal(ks[1], (32, 1, 3, 3), jnp.float32) * 0.10
    b1 = jax.random.normal(ks[2], (32,), jnp.float32) * 0.10
    w2 = jax.random.normal(ks[3], (64, 32, 3, 3), jnp.float32) * 0.05
    b2 = jax.random.normal(ks[4], (64,), jnp.float32) * 0.10
    fw1 = jax.random.normal(ks[5], (64 * 5 * 5, 128), jnp.float32) * 0.02
    fb1 = jax.random.normal(ks[6], (128,), jnp.float32) * 0.10
    fw2 = jax.random.normal(ks[7], (128, 10), jnp.float32) * 0.05
    fb2 = jax.random.normal(ks[8], (10,), jnp.float32) * 0.10
    params = (w1, b1, w2, b2, fw1, fb1, fw2, fb2)

    fwd = jax.jit(cnn_forward)
    out = jax.block_until_ready(fwd(x, params))
    assert out.shape == (2, 10) and out.dtype == jnp.float32

    ref = jax.block_until_ready(reference_forward(x, params))
    np.testing.assert_allclose(np.asarray(out), np.asarray(ref),
                               atol=2e-3, rtol=2e-3)

    print("KERNEL_OK")
</pallas_src>

<mosaic_0001>
module attributes {stable_mosaic.version = 11 : i64} {
  func.func @_conv_relu_pool_kernel(%arg0: i32, %arg1: memref<32x9xbf16, #tpu.memory_space<vmem>>, %arg2: memref<32x1xf32, #tpu.memory_space<vmem>>, %arg3: memref<4x9x384xbf16, #tpu.memory_space<vmem>>, %arg4: memref<32x384xbf16, #tpu.memory_space<vmem>>) attributes {dimension_semantics = [#tpu.dimension_semantics<parallel>], iteration_bounds = array<i64: 1>, scalar_prefetch = 0 : i64, scratch_operands = 0 : i64, tpu.core_type = #tpu.core_type<tc>, window_params = [{pipeline_mode = #tpu.pipeline_mode<synchronous>, transform_indices = @transform_0, window_bounds = array<i64: 32, 9>}, {pipeline_mode = #tpu.pipeline_mode<synchronous>, transform_indices = @transform_1, window_bounds = array<i64: 32, 1>}, {transform_indices = @transform_2, window_bounds = array<i64: 4, 9, 384>}, {transform_indices = @transform_3, window_bounds = array<i64: 32, 384>}]} {
    %c0 = arith.constant 0 : index
    %c0_0 = arith.constant 0 : index
    %0 = vector.load %arg1[%c0, %c0_0] : memref<32x9xbf16, #tpu.memory_space<vmem>>, vector<32x9xbf16>
    %c0_1 = arith.constant 0 : index
    %c0_2 = arith.constant 0 : index
    %c0_3 = arith.constant 0 : index
    %1 = vector.load %arg3[%c0_1, %c0_2, %c0_3] : memref<4x9x384xbf16, #tpu.memory_space<vmem>>, vector<1x9x384xbf16>
    %2 = vector.shape_cast %1 : vector<1x9x384xbf16> to vector<9x384xbf16>
    %cst = arith.constant dense<0.000000e+00> : vector<32x384xf32>
    %3 = tpu.matmul %0, %2, %cst {dimension_numbers = #tpu.dot_dimension_numbers<[1], [0], [0], [1], [0, 0, 1, 1], [], []>} : vector<32x9xbf16>, vector<9x384xbf16>, vector<32x384xf32> -> vector<32x384xf32>
    %c0_4 = arith.constant 0 : index
    %c0_5 = arith.constant 0 : index
    %4 = vector.load %arg1[%c0_4, %c0_5] : memref<32x9xbf16, #tpu.memory_space<vmem>>, vector<32x9xbf16>
    %c1 = arith.constant 1 : index
    %c0_6 = arith.constant 0 : index
    %c0_7 = arith.constant 0 : index
    %5 = vector.load %arg3[%c1, %c0_6, %c0_7] : memref<4x9x384xbf16, #tpu.memory_space<vmem>>, vector<1x9x384xbf16>
    %6 = vector.shape_cast %5 : vector<1x9x384xbf16> to vector<9x384xbf16>
    %cst_8 = arith.constant dense<0.000000e+00> : vector<32x384xf32>
    %7 = tpu.matmul %4, %6, %cst_8 {dimension_numbers = #tpu.dot_dimension_numbers<[1], [0], [0], [1], [0, 0, 1, 1], [], []>} : vector<32x9xbf16>, vector<9x384xbf16>, vector<32x384xf32> -> vector<32x384xf32>
    %8 = arith.maximumf %3, %7 : vector<32x384xf32>
    %c0_9 = arith.constant 0 : index
    %c0_10 = arith.constant 0 : index
    %9 = vector.load %arg1[%c0_9, %c0_10] : memref<32x9xbf16, #tpu.memory_space<vmem>>, vector<32x9xbf16>
    %c2 = arith.constant 2 : index
    %c0_11 = arith.constant 0 : index
    %c0_12 = arith.constant 0 : index
    %10 = vector.load %arg3[%c2, %c0_11, %c0_12] : memref<4x9x384xbf16, #tpu.memory_space<vmem>>, vector<1x9x384xbf16>
    %11 = vector.shape_cast %10 : vector<1x9x384xbf16> to vector<9x384xbf16>
    %cst_13 = arith.constant dense<0.000000e+00> : vector<32x384xf32>
    %12 = tpu.matmul %9, %11, %cst_13 {dimension_numbers = #tpu.dot_dimension_numbers<[1], [0], [0], [1], [0, 0, 1, 1], [], []>} : vector<32x9xbf16>, vector<9x384xbf16>, vector<32x384xf32> -> vector<32x384xf32>
    %13 = arith.maximumf %8, %12 : vector<32x384xf32>
    %c0_14 = arith.constant 0 : index
    %c0_15 = arith.constant 0 : index
    %14 = vector.load %arg1[%c0_14, %c0_15] : memref<32x9xbf16, #tpu.memory_space<vmem>>, vector<32x9xbf16>
    %c3 = arith.constant 3 : index
    %c0_16 = arith.constant 0 : index
    %c0_17 = arith.constant 0 : index
    %15 = vector.load %arg3[%c3, %c0_16, %c0_17] : memref<4x9x384xbf16, #tpu.memory_space<vmem>>, vector<1x9x384xbf16>
    %16 = vector.shape_cast %15 : vector<1x9x384xbf16> to vector<9x384xbf16>
    %cst_18 = arith.constant dense<0.000000e+00> : vector<32x384xf32>
    %17 = tpu.matmul %14, %16, %cst_18 {dimension_numbers = #tpu.dot_dimension_numbers<[1], [0], [0], [1], [0, 0, 1, 1], [], []>} : vector<32x9xbf16>, vector<9x384xbf16>, vector<32x384xf32> -> vector<32x384xf32>
    %18 = arith.maximumf %13, %17 : vector<32x384xf32>
    %c0_19 = arith.constant 0 : index
    %c0_20 = arith.constant 0 : index
    %19 = vector.load %arg2[%c0_19, %c0_20] : memref<32x1xf32, #tpu.memory_space<vmem>>, vector<32x1xf32>
    %20 = vector.broadcast %19 : vector<32x1xf32> to vector<32x384xf32>
    %21 = arith.addf %18, %20 : vector<32x384xf32>
    %cst_21 = arith.constant 0.000000e+00 : f32
    %22 = vector.broadcast %cst_21 : f32 to vector<32x384xf32>
    %23 = arith.maximumf %21, %22 : vector<32x384xf32>
    %24 = arith.truncf %23 : vector<32x384xf32> to vector<32x384xbf16>
    %c0_22 = arith.constant 0 : index
    %c0_23 = arith.constant 0 : index
    %25 = vector.load %arg4[%c0_22, %c0_23] : memref<32x384xbf16, #tpu.memory_space<vmem>>, vector<32x384xbf16>
    tpu.vector_store %arg4[%c0_22, %c0_23], %24 {strides = array<i32>} : memref<32x384xbf16, #tpu.memory_space<vmem>>, vector<32x384xbf16>,
    return
  }
  func.func @transform_0(%arg0: i32) -> (i32, i32) {
    %c0_i32 = arith.constant 0 : i32
    %c0_i32_0 = arith.constant 0 : i32
    %c0_i32_1 = arith.constant 0 : i32
    return %c0_i32, %c0_i32_0 : i32, i32
  }
  func.func @transform_1(%arg0: i32) -> (i32, i32) {
    %c0_i32 = arith.constant 0 : i32
    %c0_i32_0 = arith.constant 0 : i32
    %c0_i32_1 = arith.constant 0 : i32
    return %c0_i32, %c0_i32_0 : i32, i32
  }
  func.func @transform_2(%arg0: i32) -> (i32, i32, i32) {
    %c0_i32 = arith.constant 0 : i32
    %c0_i32_0 = arith.constant 0 : i32
    %c0_i32_1 = arith.constant 0 : i32
    return %c0_i32, %c0_i32_0, %arg0 : i32, i32, i32
  }
  func.func @transform_3(%arg0: i32) -> (i32, i32) {
    %c0_i32 = arith.constant 0 : i32
    %c0_i32_0 = arith.constant 0 : i32
    return %c0_i32, %arg0 : i32, i32
  }
}

module attributes {stable_mosaic.version = 11 : i64} {
  func.func @_conv_relu_pool_kernel(%arg0: i32, %arg1: memref<64x288xbf16, #tpu.memory_space<vmem>>, %arg2: memref<64x1xf32, #tpu.memory_space<vmem>>, %arg3: memref<4x288x128xbf16, #tpu.memory_space<vmem>>, %arg4: memref<64x128xbf16, #tpu.memory_space<vmem>>) attributes {dimension_semantics = [#tpu.dimension_semantics<parallel>], iteration_bounds = array<i64: 1>, scalar_prefetch = 0 : i64, scratch_operands = 0 : i64, tpu.core_type = #tpu.core_type<tc>, window_params = [{pipeline_mode = #tpu.pipeline_mode<synchronous>, transform_indices = @transform_0, window_bounds = array<i64: 64, 288>}, {pipeline_mode = #tpu.pipeline_mode<synchronous>, transform_indices = @transform_1, window_bounds = array<i64: 64, 1>}, {transform_indices = @transform_2, window_bounds = array<i64: 4, 288, 128>}, {transform_indices = @transform_3, window_bounds = array<i64: 64, 128>}]} {
    %c0 = arith.constant 0 : index
    %c0_0 = arith.constant 0 : index
    %0 = vector.load %arg1[%c0, %c0_0] : memref<64x288xbf16, #tpu.memory_space<vmem>>, vector<64x288xbf16>
    %c0_1 = arith.constant 0 : index
    %c0_2 = arith.constant 0 : index
    %c0_3 = arith.constant 0 : index
    %1 = vector.load %arg3[%c0_1, %c0_2, %c0_3] : memref<4x288x128xbf16, #tpu.memory_space<vmem>>, vector<1x288x128xbf16>
    %2 = vector.shape_cast %1 : vector<1x288x128xbf16> to vector<288x128xbf16>
    %cst = arith.constant dense<0.000000e+00> : vector<64x128xf32>
    %3 = tpu.matmul %0, %2, %cst {dimension_numbers = #tpu.dot_dimension_numbers<[1], [0], [0], [1], [0, 0, 1, 1], [], []>} : vector<64x288xbf16>, vector<288x128xbf16>, vector<64x128xf32> -> vector<64x128xf32>
    %c0_4 = arith.constant 0 : index
    %c0_5 = arith.constant 0 : index
    %4 = vector.load %arg1[%c0_4, %c0_5] : memref<64x288xbf16, #tpu.memory_space<vmem>>, vector<64x288xbf16>
    %c1 = arith.constant 1 : index
    %c0_6 = arith.constant 0 : index
    %c0_7 = arith.constant 0 : index
    %5 = vector.load %arg3[%c1, %c0_6, %c0_7] : memref<4x288x128xbf16, #tpu.memory_space<vmem>>, vector<1x288x128xbf16>
    %6 = vector.shape_cast %5 : vector<1x288x128xbf16> to vector<288x128xbf16>
    %cst_8 = arith.constant dense<0.000000e+00> : vector<64x128xf32>
    %7 = tpu.matmul %4, %6, %cst_8 {dimension_numbers = #tpu.dot_dimension_numbers<[1], [0], [0], [1], [0, 0, 1, 1], [], []>} : vector<64x288xbf16>, vector<288x128xbf16>, vector<64x128xf32> -> vector<64x128xf32>
    %8 = arith.maximumf %3, %7 : vector<64x128xf32>
    %c0_9 = arith.constant 0 : index
    %c0_10 = arith.constant 0 : index
    %9 = vector.load %arg1[%c0_9, %c0_10] : memref<64x288xbf16, #tpu.memory_space<vmem>>, vector<64x288xbf16>
    %c2 = arith.constant 2 : index
    %c0_11 = arith.constant 0 : index
    %c0_12 = arith.constant 0 : index
    %10 = vector.load %arg3[%c2, %c0_11, %c0_12] : memref<4x288x128xbf16, #tpu.memory_space<vmem>>, vector<1x288x128xbf16>
    %11 = vector.shape_cast %10 : vector<1x288x128xbf16> to vector<288x128xbf16>
    %cst_13 = arith.constant dense<0.000000e+00> : vector<64x128xf32>
    %12 = tpu.matmul %9, %11, %cst_13 {dimension_numbers = #tpu.dot_dimension_numbers<[1], [0], [0], [1], [0, 0, 1, 1], [], []>} : vector<64x288xbf16>, vector<288x128xbf16>, vector<64x128xf32> -> vector<64x128xf32>
    %13 = arith.maximumf %8, %12 : vector<64x128xf32>
    %c0_14 = arith.constant 0 : index
    %c0_15 = arith.constant 0 : index
    %14 = vector.load %arg1[%c0_14, %c0_15] : memref<64x288xbf16, #tpu.memory_space<vmem>>, vector<64x288xbf16>
    %c3 = arith.constant 3 : index
    %c0_16 = arith.constant 0 : index
    %c0_17 = arith.constant 0 : index
    %15 = vector.load %arg3[%c3, %c0_16, %c0_17] : memref<4x288x128xbf16, #tpu.memory_space<vmem>>, vector<1x288x128xbf16>
    %16 = vector.shape_cast %15 : vector<1x288x128xbf16> to vector<288x128xbf16>
    %cst_18 = arith.constant dense<0.000000e+00> : vector<64x128xf32>
    %17 = tpu.matmul %14, %16, %cst_18 {dimension_numbers = #tpu.dot_dimension_numbers<[1], [0], [0], [1], [0, 0, 1, 1], [], []>} : vector<64x288xbf16>, vector<288x128xbf16>, vector<64x128xf32> -> vector<64x128xf32>
    %18 = arith.maximumf %13, %17 : vector<64x128xf32>
    %c0_19 = arith.constant 0 : index
    %c0_20 = arith.constant 0 : index
    %19 = vector.load %arg2[%c0_19, %c0_20] : memref<64x1xf32, #tpu.memory_space<vmem>>, vector<64x1xf32>
    %20 = vector.broadcast %19 : vector<64x1xf32> to vector<64x128xf32>
    %21 = arith.addf %18, %20 : vector<64x128xf32>
    %cst_21 = arith.constant 0.000000e+00 : f32
    %22 = vector.broadcast %cst_21 : f32 to vector<64x128xf32>
    %23 = arith.maximumf %21, %22 : vector<64x128xf32>
    %24 = arith.truncf %23 : vector<64x128xf32> to vector<64x128xbf16>
    %c0_22 = arith.constant 0 : index
    %c0_23 = arith.constant 0 : index
    %25 = vector.load %arg4[%c0_22, %c0_23] : memref<64x128xbf16, #tpu.memory_space<vmem>>, vector<64x128xbf16>
    tpu.vector_store %arg4[%c0_22, %c0_23], %24 {strides = array<i32>} : memref<64x128xbf16, #tpu.memory_space<vmem>>, vector<64x128xbf16>,
    return
  }
  func.func @transform_0(%arg0: i32) -> (i32, i32) {
    %c0_i32 = arith.constant 0 : i32
    %c0_i32_0 = arith.constant 0 : i32
    %c0_i32_1 = arith.constant 0 : i32
    return %c0_i32, %c0_i32_0 : i32, i32
  }
  func.func @transform_1(%arg0: i32) -> (i32, i32) {
    %c0_i32 = arith.constant 0 : i32
    %c0_i32_0 = arith.constant 0 : i32
    %c0_i32_1 = arith.constant 0 : i32
    return %c0_i32, %c0_i32_0 : i32, i32
  }
  func.func @transform_2(%arg0: i32) -> (i32, i32, i32) {
    %c0_i32 = arith.constant 0 : i32
    %c0_i32_0 = arith.constant 0 : i32
    %c0_i32_1 = arith.constant 0 : i32
    return %c0_i32, %c0_i32_0, %arg0 : i32, i32, i32
  }
  func.func @transform_3(%arg0: i32) -> (i32, i32) {
    %c0_i32 = arith.constant 0 : i32
    %c0_i32_0 = arith.constant 0 : i32
    return %c0_i32, %arg0 : i32, i32
  }
}

module attributes {stable_mosaic.version = 11 : i64} {
  func.func @_fc_fused_kernel(%arg0: i32, %arg1: memref<2x1600xbf16, #tpu.memory_space<vmem>>, %arg2: memref<1600x128xbf16, #tpu.memory_space<vmem>>, %arg3: memref<1x128xf32, #tpu.memory_space<vmem>>, %arg4: memref<128x10xf32, #tpu.memory_space<vmem>>, %arg5: memref<1x10xf32, #tpu.memory_space<vmem>>, %arg6: memref<2x10xf32, #tpu.memory_space<vmem>>) attributes {dimension_semantics = [#tpu.dimension_semantics<parallel>], iteration_bounds = array<i64: 1>, scalar_prefetch = 0 : i64, scratch_operands = 0 : i64, tpu.core_type = #tpu.core_type<tc>, window_params = [{transform_indices = @transform_0, window_bounds = array<i64: 2, 1600>}, {pipeline_mode = #tpu.pipeline_mode<synchronous>, transform_indices = @transform_1, window_bounds = array<i64: 1600, 128>}, {pipeline_mode = #tpu.pipeline_mode<synchronous>, transform_indices = @transform_2, window_bounds = array<i64: 1, 128>}, {pipeline_mode = #tpu.pipeline_mode<synchronous>, transform_indices = @transform_3, window_bounds = array<i64: 128, 10>}, {pipeline_mode = #tpu.pipeline_mode<synchronous>, transform_indices = @transform_4, window_bounds = array<i64: 1, 10>}, {transform_indices = @transform_5, window_bounds = array<i64: 2, 10>}]} {
    %c0 = arith.constant 0 : index
    %c0_0 = arith.constant 0 : index
    %0 = vector.load %arg1[%c0, %c0_0] : memref<2x1600xbf16, #tpu.memory_space<vmem>>, vector<2x1600xbf16>
    %c0_1 = arith.constant 0 : index
    %c0_2 = arith.constant 0 : index
    %1 = vector.load %arg2[%c0_1, %c0_2] : memref<1600x128xbf16, #tpu.memory_space<vmem>>, vector<1600x128xbf16>
    %cst = arith.constant dense<0.000000e+00> : vector<2x128xf32>
    %2 = tpu.matmul %0, %1, %cst {dimension_numbers = #tpu.dot_dimension_numbers<[1], [0], [0], [1], [0, 0, 1, 1], [], []>} : vector<2x1600xbf16>, vector<1600x128xbf16>, vector<2x128xf32> -> vector<2x128xf32>
    %c0_3 = arith.constant 0 : index
    %c0_4 = arith.constant 0 : index
    %3 = vector.load %arg3[%c0_3, %c0_4] : memref<1x128xf32, #tpu.memory_space<vmem>>, vector<1x128xf32>
    %4 = vector.broadcast %3 : vector<1x128xf32> to vector<2x128xf32>
    %5 = arith.addf %2, %4 : vector<2x128xf32>
    %cst_5 = arith.constant 0.000000e+00 : f32
    %6 = vector.broadcast %cst_5 : f32 to vector<2x128xf32>
    %7 = arith.maximumf %5, %6 : vector<2x128xf32>
    %c0_6 = arith.constant 0 : index
    %c0_7 = arith.constant 0 : index
    %8 = vector.load %arg4[%c0_6, %c0_7] : memref<128x10xf32, #tpu.memory_space<vmem>>, vector<128x10xf32>
    %cst_8 = arith.constant dense<0.000000e+00> : vector<2x10xf32>
    %9 = tpu.matmul %7, %8, %cst_8 {dimension_numbers = #tpu.dot_dimension_numbers<[1], [0], [0], [1], [0, 0, 1, 1], [], []>} : vector<2x128xf32>, vector<128x10xf32>, vector<2x10xf32> -> vector<2x10xf32>
    %c0_9 = arith.constant 0 : index
    %c0_10 = arith.constant 0 : index
    %10 = vector.load %arg5[%c0_9, %c0_10] : memref<1x10xf32, #tpu.memory_space<vmem>>, vector<1x10xf32>
    %11 = vector.broadcast %10 : vector<1x10xf32> to vector<2x10xf32>
    %12 = arith.addf %9, %11 : vector<2x10xf32>
    %c0_11 = arith.constant 0 : index
    %c0_12 = arith.constant 0 : index
    %13 = vector.load %arg6[%c0_11, %c0_12] : memref<2x10xf32, #tpu.memory_space<vmem>>, vector<2x10xf32>
    tpu.vector_store %arg6[%c0_11, %c0_12], %12 {strides = array<i32>} : memref<2x10xf32, #tpu.memory_space<vmem>>, vector<2x10xf32>,
    return
  }
  func.func @transform_0(%arg0: i32) -> (i32, i32) {
    %c0_i32 = arith.constant 0 : i32
    %c0_i32_0 = arith.constant 0 : i32
    return %arg0, %c0_i32 : i32, i32
  }
  func.func @transform_1(%arg0: i32) -> (i32, i32) {
    %c0_i32 = arith.constant 0 : i32
    %c0_i32_0 = arith.constant 0 : i32
    %c0_i32_1 = arith.constant 0 : i32
    return %c0_i32, %c0_i32_0 : i32, i32
  }
  func.func @transform_2(%arg0: i32) -> (i32, i32) {
    %c0_i32 = arith.constant 0 : i32
    %c0_i32_0 = arith.constant 0 : i32
    %c0_i32_1 = arith.constant 0 : i32
    return %c0_i32, %c0_i32_0 : i32, i32
  }
  func.func @transform_3(%arg0: i32) -> (i32, i32) {
    %c0_i32 = arith.constant 0 : i32
    %c0_i32_0 = arith.constant 0 : i32
    %c0_i32_1 = arith.constant 0 : i32
    return %c0_i32, %c0_i32_0 : i32, i32
  }
  func.func @transform_4(%arg0: i32) -> (i32, i32) {
    %c0_i32 = arith.constant 0 : i32
    %c0_i32_0 = arith.constant 0 : i32
    %c0_i32_1 = arith.constant 0 : i32
    return %c0_i32, %c0_i32_0 : i32, i32
  }
  func.func @transform_5(%arg0: i32) -> (i32, i32) {
    %c0_i32 = arith.constant 0 : i32
    %c0_i32_0 = arith.constant 0 : i32
    return %arg0, %c0_i32 : i32, i32
  }
}

</mosaic_0001>

<bundles_post_ra>
// kernel: cnn_forward.8
= control target key start
LH: loop header
LB: loop body
LE: loop exit
PB: predicated region body
PF: predicated region fallthrough
CT: control target
= control target key end

     0   :  { %s1599_s0 = inlined_call_operand.vmem [shape: bf16[32,9], index: 0, kind: input, shape index: {}]   ;;  %s1600_s1 = inlined_call_operand.vmem [shape: f32[32,1], index: 1, kind: input, shape index: {}]   ;;  %s1601_s2 = inlined_call_operand.vmem [shape: bf16[4,9,338], index: 2, kind: input, shape index: {}]   ;;  %s1602_s3 = inlined_call_operand.<no memory space> [shape: bf16[], index: 3, kind: input, shape index: {}]   ;;  %s1603_s4 = inlined_call_operand.vmem [shape: bf16[32,384], index: 4, kind: output, shape index: {}]  }
   0x1   :  { %v9_v0 = vstv %s1602_s3 }
   0x2   :  { %v1370_v1 = vunpack.i.l.bf16 %v9_v0 }
   0x3   :  { %v20_v2 = vld [vmem:[%s1601_s2] sm:$0xff]   ;;  %v72_v3 = vlaneseq  ;;  %v1201_v4 = vld [vmem:[%s1601_s2 + $0xc] sm:$0xff]   ;;  %vm561_vm0 = vcmask 1043456   ;;  %v1200_v6 = vld [vmem:[%s1601_s2 + $0x8] ss:$12 sps:$4 sm:$0xff]   ;;  %v1339_v10 = vmov 0  }
   0x4   :  { %v1381_v5 = vld [vmem:[%s1599_s0] sm:$0xff]   ;;  %35 = vst [vmem:[#allocation7] sm:$0xff] %v20_v2   ;;  %v83_v7 = vunpack.c.l.bf16 %v1201_v4  ;;  %606 = vmatprep.mubr.bf16.mxu0 %v1339_v10  ;;  %1325 = vset.pattern.permute.xlu0 %v1339_v10  ;;  %v101_v11 = vunpack.c.h.bf16 %v1201_v4  ;;  %v65_v12 = vunpack.c.l.bf16 %v1200_v6  ;;  %v128_v13 = vunpack.c.h.bf16 %v1200_v6  ;;  %v1401_v18 = vld [vmem:[%s1601_s2 + $0x18] sm:$0xff]   ;;  %v1432_v29 = vld [vmem:[%s1601_s2 + $0x30] sm:$0xff]  }
   0x5   :  { %v86_v8 = vshrl.u32 %v72_v3, 7  ;;  %v73_v9 = vand.u32 127, %v72_v3  ;;  %vm554_vm1 = vcmask 72704   ;;  %1326 = vset.pattern.permute.xlu1 %v1339_v10  ;;  %vm562_vm2 = vcmask 1044480   ;;  %v1207_v19 = vld [vmem:[%s1601_s2 + $0x24] sm:$0xff]   ;;  %v1212_v23 = vld [vmem:[%s1601_s2 + $0x38] sm:$0xff]  }
   0x6   :  { %1300 = vmatprep.mubr.msk.bf16.mxu1 %vm554_vm1, %v1381_v5  ;;  %v1340_v16 = vmov 65535   ;;  %v1206_v20 = vld [vmem:[%s1601_s2 + $0x20] ss:$12 sps:$4 sm:$0xff]   ;;  %v209_v21 = vunpack.c.l.bf16 %v1207_v19  ;;  %v227_v22 = vunpack.c.h.bf16 %v1207_v19  ;;  %v1341_v30 = vmov 0.0   ;;  %v1219_v40 = vld [vmem:[%s1601_s2 + $0x54] sm:$0xff]  }
   0x7   :  { %v1389_v14 = vadd.s32 8, %v86_v8  ;;  %v1391_v15 = vadd.s32 256, %v73_v9  ;;  %v1396_v17 = vsel %vm561_vm0, 4294967295, %v1340_v16  ;;  %v1215_v24 = vld [vmem:[%s1601_s2 + $0x40] sm:$0xff]   ;;  %v1443_v35 = vld [vmem:[%s1601_s2 + $0x48] sm:$0xff]   ;;  %v191_v39 = vunpack.c.l.bf16 %v1206_v20  ;;  %v1101_v46 = vld [vmem:[%s1600_s1 + $0x10] sm:$0xff] }
   0x8   :  { %v1099_v41 = vld [vmem:[%s1600_s1] sm:$0xff]  ;;  %v254_v44 = vunpack.c.h.bf16 %v1206_v20  ;;  %v317_v45 = vunpack.c.l.bf16 %v1212_v23  ;;  %v380_v48 = vunpack.c.h.bf16 %v1215_v24  ;;  %v335_v49 = vunpack.c.h.bf16 %v1212_v23  ;;  %v1100_v51 = vld [vmem:[%s1600_s1 + $0x8] sm:$0xff]  ;;  %1115 = vperm.xlu1 %1326, %v1101_v46   ;;  %v1102_v56 = vld [vmem:[%s1600_s1 + $0x18] sm:$0xff] }
   0x9   :  { %vm88_vm3 = vcmp.lt.s32.totalorder %v1389_v14, 9  ;;  %vm75_vm4 = vcmp.lt.s32.totalorder %v1391_v15, 338  ;;  %1105 = vperm.xlu0 %1325, %v1099_v41   ;;  %v353_v50 = vunpack.c.l.bf16 %v1215_v24  ;;  %v461_v55 = vunpack.c.l.bf16 %v1219_v40  ;;  %v1218_v61 = vld [vmem:[%s1601_s2 + $0x50] ss:$12 sps:$4 sm:$0xff]  }
   0xa   :  { %v89_v25 = vsel %vm88_vm3, %v83_v7, %v1370_v1  ;;  %v107_v26 = vsel %vm88_vm3, %v101_v11, %v1370_v1  ;;  %v76_v27 = vsel %vm75_vm4, %v65_v12, %v1370_v1  ;;  %v134_v28 = vsel %vm88_vm3, %v128_v13, %v1370_v1 }
   0xb   :  { %v96_v31 = vpack.c.bf16 %v1341_v30, %v89_v25  ;;  %v114_v32 = vpack.c.bf16 %v1341_v30, %v107_v26  ;;  %v78_v33 = vpack.c.bf16 %v1341_v30, %v76_v27  ;;  %v139_v34 = vsel %vm75_vm4, %v134_v28, %v1370_v1 }
   0xc   :  { %v141_v36 = vpack.c.bf16 %v1341_v30, %v139_v34  ;;  %v215_v37 = vsel %vm88_vm3, %v209_v21, %v1370_v1  ;;  %v233_v38 = vsel %vm88_vm3, %v227_v22, %v1370_v1  ;;  %v202_v47 = vsel %vm75_vm4, %v191_v39, %v1370_v1  ;;  %1120 = vperm.xlu1 %1326, %v1102_v56  }
   0xd   :  { %98 = vst [vmem:[#allocation7 + $0xc] sm:$0xf] %v96_v31  ;;  %116 = vst [vmem:[#allocation7 + $0x10] sm:$0xf] %v114_v32  ;;  %v222_v42 = vpack.c.bf16 %v1341_v30, %v215_v37  ;;  %v240_v43 = vpack.c.bf16 %v1341_v30, %v233_v38  ;;  %v204_v52 = vpack.c.bf16 %v1341_v30, %v202_v47  ;;  %1110 = vperm.xlu0 %1325, %v1100_v51  }
   0xe   :  { %80 = vst [vmem:[#allocation7 + $0x8] sm:$0xf] %v78_v33  ;;  %143 = vst [vmem:[#allocation7 + $0x14] sm:$0xf] %v141_v36  ;;  %v260_v53 = vsel %vm88_vm3, %v254_v44, %v1370_v1  ;;  %v328_v54 = vsel %vm75_vm4, %v317_v45, %v1370_v1  ;;  %v386_v59 = vsel %vm88_vm3, %v380_v48, %v1370_v1  ;;  %v479_v7 = vunpack.c.h.bf16 %v1219_v40 }
   0xf   :  { %224 = vst [vmem:[#allocation7 + $0x24] sm:$0xf] %v222_v42  ;;  %242 = vst [vmem:[#allocation7 + $0x28] sm:$0xf] %v240_v43  ;;  %v265_v57 = vsel %vm75_vm4, %v260_v53, %v1370_v1  ;;  %v330_v58 = vpack.c.bf16 %v1341_v30, %v328_v54  ;;  %v341_v60 = vsel %vm88_vm3, %v335_v49, %v1370_v1  ;;  %v1507_v8 = vsel %vm562_vm2, %v1396_v17, 0 }
  0x10   :  { %206 = vst [vmem:[#allocation7 + $0x20] sm:$0xf] %v204_v52  ;;  %v267_v62 = vpack.c.bf16 %v1341_v30, %v265_v57  ;;  %v391_v63 = vsel %vm75_vm4, %v386_v59, %v1370_v1  ;;  %v348_v0 = vpack.c.bf16 %v1341_v30, %v341_v60  ;;  %v359_v2 = vsel %vm88_vm3, %v353_v50, %v1370_v1 }
  0x11   :  { %332 = vst [vmem:[#allocation7 + $0x38] sm:$0xf] %v330_v58  ;;  %v393_v3 = vpack.c.bf16 %v1341_v30, %v391_v63  ;;  %v366_v4 = vpack.c.bf16 %v1341_v30, %v359_v2  ;;  %v467_v6 = vsel %vm88_vm3, %v461_v55, %v1370_v1  ;;  %v443_v11 = vunpack.c.l.bf16 %v1218_v61 }
  0x12   :  { %269 = vst [vmem:[#allocation7 + $0x2c] sm:$0xf] %v267_v62  ;;  %350 = vst [vmem:[#allocation7 + $0x3c] sm:$0xf] %v348_v0  ;;  %v474_v9 = vpack.c.bf16 %v1341_v30, %v467_v6  ;;  %v506_v12 = vunpack.c.h.bf16 %v1218_v61  ;;  %v485_v16 = vsel %vm88_vm3, %v479_v7, %v1370_v1 }
  0x13   :  { %395 = vst [vmem:[#allocation7 + $0x44] sm:$0xf] %v393_v3  ;;  %368 = vst [vmem:[#allocation7 + $0x40] sm:$0xf] %v366_v4  ;;  %v492_v20 = vpack.c.bf16 %v1341_v30, %v485_v16  ;;  %v454_v17 = vsel %vm75_vm4, %v443_v11, %v1370_v1 }
  0x14   :  { %v1327_v13 = vld [vmem:[#allocation7 + $0x4] ss:$12 sps:$4 sm:$0x1f]   ;;  %v1329_v19 = vld [vmem:[#allocation7] ss:$12 sps:$4 sm:$0x1f]   ;;  %v512_v21 = vsel %vm88_vm3, %v506_v12, %v1370_v1  ;;  %v456_v24 = vpack.c.bf16 %v1341_v30, %v454_v17 }
  0x15   :  { %476 = vst [vmem:[#allocation7 + $0x54] sm:$0xf] %v474_v9  ;;  %v569_v22 = vand.u32 %v1327_v13, %v1507_v8  ;;  %v1330_v23 = vld [vmem:[#allocation7 + $0x8] ss:$12 sps:$4 sm:$0x1f]   ;;  %v517_v25 = vsel %vm75_vm4, %v512_v21, %v1370_v1  ;;  %v566_v26 = vand.u32 %v1329_v19, %v1507_v8 }
  0x16   :  { %v679_v27 = vld [vmem:[#allocation7 + $0x24] sm:$0x11]  ;;  %494 = vst [vmem:[#allocation7 + $0x58] sm:$0xf] %v492_v20  ;;  %v519_v28 = vpack.c.bf16 %v1341_v30, %v517_v25  ;;  %v572_v31 = vand.u32 %v1330_v23, %v1507_v8  ;;  %458 = vst [vmem:[#allocation7 + $0x50] sm:$0xf] %v456_v24 }
  0x17   :  { %574 = vmatprep.subr.bf16.mxu0 %v569_v22  ;;  %v1231_v14 = vcombine.low %v1401_v18, %v679_v27  ;;  %v1232_v32 = vcombine.high %v1401_v18, %v679_v27  ;;  %v1332_v1 = vld [vmem:[%s1599_s0 + $0x8] sm:$0xff]  }
  0x18   :  { %575 = vmatpush1.bf16.msra.mxu0 %v566_v26  ;;  %521 = vst [vmem:[#allocation7 + $0x5c] sm:$0xf] %v519_v28  ;;  %1298 = vmatprep.subr.bf16.mxu1 %v572_v31 }
  0x19   :  { %v698_v15 = vand.u32 %v1232_v32, %v1507_v8  ;;  %v1334_v33 = vld [vmem:[#allocation7 + $0x20] ss:$12 sps:$4 sm:$0x1f]   ;;  %1299 = vmatpush3.bf16.msra.mxu1 %v572_v31  ;;  %v695_v30 = vand.u32 %v1231_v14, %v1507_v8 }
  0x1a   :  { %v1335_v34 = vld [vmem:[#allocation7 + $0x38] ss:$12 sps:$4 sm:$0x1f]   ;;  %v701_v18 = vand.u32 %v1334_v33, %v1507_v8  ;;  %v820_v36 = vld [vmem:[#allocation7 + $0x3c] sm:$0x11] }
  0x1b   :  { %1227 = vmatmul.mubr.msk.bf16.vlgmr.msra.gmra.mrb[0].mxu0 %vm554_vm1, %v1381_v5  ;;  %703 = vmatprep.subr.bf16.mxu1 %v698_v15  ;;  %v842_v37 = vand.u32 %v1335_v34, %v1507_v8  ;;  %v1239_v38 = vcombine.high %v1432_v29, %v820_v36  ;;  %v1238_v43 = vcombine.low %v1432_v29, %v820_v36 }
  0x1c   :  { %616 = vmatprep.mubr.bf16.mxu0 %v1339_v10  ;;  %1301 = vmatmul.mubr.msk.bf16.vlgmr.msra.gmra.mrb[0].mxu1 %vm554_vm1, %v1332_v1 }
  0x1d   :  { %1304 = vmatprep.subr.bf16.mxu0 %v701_v18  ;;  %v961_v39 = vld [vmem:[#allocation7 + $0x54] sm:$0x11]  ;;  %704 = vmatpush1.bf16.msra.mxu1 %v695_v30  ;;  %v839_v40 = vand.u32 %v1239_v38, %v1507_v8  ;;  %v836_v45 = vand.u32 %v1238_v43, %v1507_v8 }
  0x1e   :  { %1305 = vmatpush3.bf16.msra.mxu0 %v701_v18  ;;  %735 = vmatprep.mubr.bf16.mxu1 %v1339_v10  ;;  %v1246_v41 = vcombine.high %v1443_v35, %v961_v39  ;;  %v1245_v29 = vcombine.low %v1443_v35, %v961_v39 }
  0x1f   :  { %1310 = vmatprep.subr.bf16.mxu1 %v842_v37  ;;  %844 = vmatprep.subr.bf16.mxu0 %v839_v40  ;;  %v1338_v44 = vld [vmem:[#allocation7 + $0x50] ss:$12 sps:$4 sm:$0x1f]  }
  0x20   :  { %v980_v42 = vand.u32 %v1246_v41, %v1507_v8  ;;  %v983_v46 = vand.u32 %v1338_v44, %v1507_v8  ;;  %v977_v47 = vand.u32 %v1245_v29, %v1507_v8 }
  0x23   :  { %1228 = vmatmul.mubr.msk.bf16.gmra.mrb[4].mxu0 %vm554_vm1, %v1332_v1 }
  0x24   :  { %1306 = vmatprep.mubr.msk.bf16.mxu0 %vm554_vm1, %v1381_v5  ;;  %1234 = vmatmul.mubr.msk.bf16.vlgmr.msra.gmra.mrb[4].mxu1 %vm554_vm1, %v1381_v5 }
  0x25   :  { %1311 = vmatpush3.bf16.msra.mxu1 %v842_v37  ;;  %745 = vmatprep.mubr.bf16.mxu1 %v1339_v10 }
  0x26   :  { %985 = vmatprep.subr.bf16.mxu1 %v980_v42 }
  0x2b   :  { %1307 = vmatmul.mubr.msk.bf16.vlgmr.msra.gmra.mrb[8].mxu0 %vm554_vm1, %v1332_v1 }
  0x2c   :  { %845 = vmatpush1.bf16.msra.mxu0 %v836_v45  ;;  %876 = vmatprep.mubr.bf16.mxu0 %v1339_v10 }
  0x2d   :  { %1235 = vmatmul.mubr.msk.bf16.gmra.mrb[8].mxu1 %vm554_vm1, %v1332_v1  ;;  %1316 = vmatprep.subr.bf16.mxu0 %v983_v46 }
  0x2e   :  { %1312 = vmatprep.mubr.msk.bf16.mxu1 %vm554_vm1, %v1381_v5 }
  0x33   :  { %1241 = vmatmul.mubr.msk.bf16.vlgmr.msra.gmra.mrb[12].mxu0 %vm554_vm1, %v1381_v5 }
  0x34   :  { %1317 = vmatpush3.bf16.msra.mxu0 %v983_v46  ;;  %886 = vmatprep.mubr.bf16.mxu0 %v1339_v10 }
  0x35   :  { %1313 = vmatmul.mubr.msk.bf16.vlgmr.msra.gmra.mrb[12].mxu1 %vm554_vm1, %v1332_v1 }
  0x36   :  { %986 = vmatpush1.bf16.msra.mxu1 %v977_v47  ;;  %1017 = vmatprep.mubr.bf16.mxu1 %v1339_v10 }
  0x3b   :  { %1242 = vmatmul.mubr.msk.bf16.gmra.mrb[16].mxu0 %vm554_vm1, %v1332_v1 }
  0x3c   :  { %1318 = vmatprep.mubr.msk.bf16.mxu0 %vm554_vm1, %v1381_v5 }
  0x3d   :  { %1248 = vmatmul.mubr.msk.bf16.vlgmr.msra.gmra.mrb[16].mxu1 %vm554_vm1, %v1381_v5 }
  0x3e   :  { %1027 = vmatprep.mubr.bf16.mxu1 %v1339_v10 }
  0x43   :  { %1319 = vmatmul.mubr.msk.bf16.vlgmr.msra.gmra.mrb[20].mxu0 %vm554_vm1, %v1332_v1 }
  0x45   :  { %1249 = vmatmul.mubr.msk.bf16.gmra.mrb[20].mxu1 %vm554_vm1, %v1332_v1 }
  0x88   :  { %v1106_v37 = vpop.permute.xlu0 %1105 }
  0xee   :  { %v608_v35 = vpop.f32.mrb[0].mxu0 }
  0xef   :  { %v610_v48 = vpop.f32.mrb[1].mxu0  ;;  %v1302_v49 = vpop.f32.mrb[0].mxu1 }
  0xf0   :  { %v612_v50 = vpop.f32.mrb[2].mxu0  ;;  %v661_v51 = vpop.f32.mrb[1].mxu1 }
  0xf1   :  { %v614_v52 = vpop.f32.mrb[3].mxu0  ;;  %v1303_v53 = vpop.f32.mrb[2].mxu1 }
  0xf2   :  { %v664_v54 = vpop.f32.mrb[3].mxu1 }
  0xf6   :  { %v618_v55 = vpop.f32.mrb[4].mxu0 }
  0xf7   :  { %v620_v56 = vpop.f32.mrb[5].mxu0  ;;  %v737_v57 = vpop.f32.mrb[4].mxu1 }
  0xf8   :  { %v622_v58 = vpop.f32.mrb[6].mxu0  ;;  %v805_v59 = vmax.f32 %v608_v35, %v737_v57  ;;  %v739_v5 = vpop.f32.mrb[5].mxu1 }
  0xf9   :  { %v624_v60 = vpop.f32.mrb[7].mxu0  ;;  %v806_v10 = vmax.f32 %v610_v48, %v739_v5  ;;  %v741_v61 = vpop.f32.mrb[6].mxu1 }
  0xfa   :  { %v808_v62 = vmax.f32 %v612_v50, %v741_v61  ;;  %v743_v63 = vpop.f32.mrb[7].mxu1 }
  0xfb   :  { %v809_v0 = vmax.f32 %v614_v52, %v743_v63 }
  0xfe   :  { %v1308_v2 = vpop.f32.mrb[8].mxu0 }
  0xff   :  { %v813_v3 = vmax.f32 %v1302_v49, %v1308_v2  ;;  %v790_v4 = vpop.f32.mrb[9].mxu0  ;;  %v1111_v49 = vpop.permute.xlu0 %1110 }
 0x100   :  { %v747_v6 = vpop.f32.mrb[8].mxu1  ;;  %v807_v7 = vmax.f32 %v661_v51, %v790_v4  ;;  %v1309_v8 = vpop.f32.mrb[10].mxu0 }
 0x101   :  { %v811_v9 = vmax.f32 %v618_v55, %v747_v6  ;;  %v749_v11 = vpop.f32.mrb[9].mxu1  ;;  %v816_v12 = vmax.f32 %v1303_v53, %v1309_v8  ;;  %v793_v13 = vpop.f32.mrb[11].mxu0 }
 0x102   :  { %v812_v16 = vmax.f32 %v620_v56, %v749_v11  ;;  %v751_v19 = vpop.f32.mrb[10].mxu1  ;;  %v810_v20 = vmax.f32 %v664_v54, %v793_v13  ;;  %v1116_v55 = vpop.permute.xlu1 %1115 }
 0x103   :  { %v814_v17 = vmax.f32 %v622_v58, %v751_v19  ;;  %v753_v21 = vpop.f32.mrb[11].mxu1 }
 0x104   :  { %v815_v22 = vmax.f32 %v624_v60, %v753_v21 }
 0x106   :  { %v878_v23 = vpop.f32.mrb[12].mxu0 }
 0x107   :  { %v946_v24 = vmax.f32 %v805_v59, %v878_v23  ;;  %v880_v25 = vpop.f32.mrb[13].mxu0 }
 0x108   :  { %v947_v26 = vmax.f32 %v806_v10, %v880_v25  ;;  %v1314_v27 = vpop.f32.mrb[12].mxu1  ;;  %v882_v28 = vpop.f32.mrb[14].mxu0 }
 0x109   :  { %v954_v31 = vmax.f32 %v813_v3, %v1314_v27  ;;  %v949_v14 = vmax.f32 %v808_v62, %v882_v28  ;;  %v931_v32 = vpop.f32.mrb[13].mxu1  ;;  %v884_v1 = vpop.f32.mrb[15].mxu0 }
 0x10a   :  { %v948_v15 = vmax.f32 %v807_v7, %v931_v32  ;;  %v950_v33 = vmax.f32 %v809_v0, %v884_v1  ;;  %v1315_v30 = vpop.f32.mrb[14].mxu1 }
 0x10b   :  { %v957_v34 = vmax.f32 %v816_v12, %v1315_v30  ;;  %v934_v18 = vpop.f32.mrb[15].mxu1 }
 0x10c   :  { %v951_v36 = vmax.f32 %v810_v20, %v934_v18 }
 0x10e   :  { %v888_v38 = vpop.f32.mrb[16].mxu0 }
 0x10f   :  { %v952_v39 = vmax.f32 %v811_v9, %v888_v38  ;;  %v890_v40 = vpop.f32.mrb[17].mxu0 }
 0x110   :  { %v953_v41 = vmax.f32 %v812_v16, %v890_v40  ;;  %v1019_v42 = vpop.f32.mrb[16].mxu1  ;;  %v892_v43 = vpop.f32.mrb[18].mxu0 }
 0x111   :  { %v1087_v44 = vmax.f32 %v946_v24, %v1019_v42  ;;  %v955_v45 = vmax.f32 %v814_v17, %v892_v43  ;;  %v1021_v46 = vpop.f32.mrb[17].mxu1  ;;  %v894_v29 = vpop.f32.mrb[19].mxu0 }
 0x112   :  { %v1088_v47 = vmax.f32 %v947_v26, %v1021_v46  ;;  %v956_v35 = vmax.f32 %v815_v22, %v894_v29  ;;  %v1023_v48 = vpop.f32.mrb[18].mxu1  ;;  %v1121_v16 = vpop.permute.xlu1 %1120 }
 0x113   :  { %v1123_v50 = vadd.f32 %v1106_v37, %v1087_v44  ;;  %v1090_v51 = vmax.f32 %v949_v14, %v1023_v48  ;;  %v1025_v52 = vpop.f32.mrb[19].mxu1 }
 0x114   :  { %v1124_v53 = vadd.f32 %v1106_v37, %v1088_v47  ;;  %v1091_v54 = vmax.f32 %v950_v33, %v1025_v52 }
 0x115   :  { %v1135_v56 = vmax.f32 %v1123_v50, 0.0  ;;  %v1126_v57 = vadd.f32 %v1111_v49, %v1090_v51 }
 0x116   :  { %v1136_v58 = vmax.f32 %v1124_v53, 0.0  ;;  %v1127_v59 = vadd.f32 %v1111_v49, %v1091_v54  ;;  %v1320_v5 = vpop.f32.mrb[20].mxu0 }
 0x117   :  { %v1138_v60 = vmax.f32 %v1126_v57, 0.0  ;;  %v1095_v10 = vmax.f32 %v954_v31, %v1320_v5  ;;  %v1072_v61 = vpop.f32.mrb[21].mxu0 }
 0x118   :  { %v1260_v62 = vpack.c.bf16 %v1136_v58, %v1135_v56  ;;  %v1139_v63 = vmax.f32 %v1127_v59, 0.0  ;;  %v1029_v0 = vpop.f32.mrb[20].mxu1  ;;  %v1089_v2 = vmax.f32 %v948_v15, %v1072_v61  ;;  %v1321_v3 = vpop.f32.mrb[22].mxu0 }
 0x119   :  { %v1131_v4 = vadd.f32 %v1116_v55, %v1095_v10  ;;  %v1093_v6 = vmax.f32 %v952_v39, %v1029_v0  ;;  %v1031_v7 = vpop.f32.mrb[21].mxu1  ;;  %v1098_v8 = vmax.f32 %v957_v34, %v1321_v3  ;;  %v1075_v9 = vpop.f32.mrb[23].mxu0 }
 0x11a   :  { %1187 = vst [vmem:[%s1603_s4] sm:$0xff] %v1260_v62  ;;  %v1262_v11 = vpack.c.bf16 %v1139_v63, %v1138_v60  ;;  %v1125_v12 = vadd.f32 %v1106_v37, %v1089_v2  ;;  %v1094_v13 = vmax.f32 %v953_v41, %v1031_v7  ;;  %v1033_v19 = vpop.f32.mrb[22].mxu1  ;;  %v1092_v20 = vmax.f32 %v951_v36, %v1075_v9 }
 0x11b   :  { %v1143_v17 = vmax.f32 %v1131_v4, 0.0  ;;  %v1129_v21 = vadd.f32 %v1116_v55, %v1093_v6  ;;  %v1134_v22 = vadd.f32 %v1121_v16, %v1098_v8  ;;  %v1096_v23 = vmax.f32 %v955_v45, %v1033_v19  ;;  %v1035_v24 = vpop.f32.mrb[23].mxu1 }
 0x11c   :  { %1189 = vst [vmem:[%s1603_s4 + $0xc] sm:$0xff] %v1262_v11  ;;  %v1137_v25 = vmax.f32 %v1125_v12, 0.0  ;;  %v1130_v26 = vadd.f32 %v1116_v55, %v1094_v13  ;;  %v1128_v27 = vadd.f32 %v1111_v49, %v1092_v20  ;;  %v1097_v28 = vmax.f32 %v956_v35, %v1035_v24 }
 0x11d   :  { %v1265_v31 = vpack.c.bf16 %v1143_v17, %v1143_v17  ;;  %v1141_v14 = vmax.f32 %v1129_v21, 0.0  ;;  %v1146_v32 = vmax.f32 %v1134_v22, 0.0  ;;  %v1132_v1 = vadd.f32 %v1121_v16, %v1096_v23 }
 0x11e   :  { %v1261_v15 = vpack.c.bf16 %v1137_v25, %v1137_v25  ;;  %v1142_v33 = vmax.f32 %v1130_v26, 0.0  ;;  %v1140_v30 = vmax.f32 %v1128_v27, 0.0  ;;  %v1133_v34 = vadd.f32 %v1121_v16, %v1097_v28 }
 0x11f   :  { %1192 = vst [vmem:[%s1603_s4 + $0x20] sm:$0xf] %v1265_v31  ;;  %v1267_v18 = vpack.c.bf16 %v1146_v32, %v1146_v32  ;;  %v1144_v36 = vmax.f32 %v1132_v1, 0.0 }
 0x120   :  { %1188 = vst [vmem:[%s1603_s4 + $0x8] sm:$0xf] %v1261_v15  ;;  %v1264_v37 = vpack.c.bf16 %v1142_v33, %v1141_v14  ;;  %v1263_v38 = vpack.c.bf16 %v1140_v30, %v1140_v30  ;;  %v1145_v39 = vmax.f32 %v1133_v34, 0.0 }
 0x121   :  { %1194 = vst [vmem:[%s1603_s4 + $0x2c] sm:$0xf] %v1267_v18 }
 0x122   :  { %1191 = vst [vmem:[%s1603_s4 + $0x18] sm:$0xff] %v1264_v37  ;;  %1190 = vst [vmem:[%s1603_s4 + $0x14] sm:$0xf] %v1263_v38  ;;  %v1266_v40 = vpack.c.bf16 %v1145_v39, %v1144_v36 }
 0x124   :  { %1193 = vst [vmem:[%s1603_s4 + $0x24] sm:$0xff] %v1266_v40 }

// kernel: cnn_forward.7
= control target key start
LH: loop header
LB: loop body
LE: loop exit
PB: predicated region body
PF: predicated region fallthrough
CT: control target
= control target key end

     0   :  { %s6169_s0 = inlined_call_operand.vmem [shape: bf16[64,288], index: 0, kind: input, shape index: {}]   ;;  %s6170_s1 = inlined_call_operand.vmem [shape: f32[64,1], index: 1, kind: input, shape index: {}]   ;;  %s6171_s2 = inlined_call_operand.vmem [shape: bf16[4,288,50], index: 2, kind: input, shape index: {}]   ;;  %s6172_s3 = inlined_call_operand.<no memory space> [shape: bf16[], index: 3, kind: input, shape index: {}]   ;;  %s6173_s4 = inlined_call_operand.vmem [shape: bf16[64,128], index: 4, kind: output, shape index: {}]  }
   0x1   :  { %v9_v0 = vstv %s6172_s3 }
   0x2   :  { %v5146_v1 = vunpack.i.l.bf16 %v9_v0 }
   0x3   :  { %v32_v2 = vlaneseq  ;;  %v4522_v3 = vld [vmem:[%s6171_s2 + $0x40] sm:$0xff]   ;;  %v4558_v4 = vld [vmem:[%s6171_s2 + $0xd0] sm:$0xff]   ;;  %v4524_v11 = vld [vmem:[%s6171_s2 + $0x48] sm:$0xff]   ;;  %v5116_v29 = vmov 0.0   ;;  %vm3407_vm1 = vcmask 261120  }
   0x4   :  { %v29_v5 = vld [vmem:[%s6171_s2] sm:$0xff]   ;;  %v381_v6 = vunpack.c.l.bf16 %v4522_v3  ;;  %v403_v7 = vunpack.c.h.bf16 %v4522_v3  ;;  %v1173_v8 = vunpack.c.l.bf16 %v4558_v4  ;;  %v1195_v9 = vunpack.c.h.bf16 %v4558_v4  ;;  %v4542_v10 = vld [vmem:[%s6171_s2 + $0x90] sm:$0xff]   ;;  %v4560_v12 = vld [vmem:[%s6171_s2 + $0xd8] sm:$0xff]  }
   0x5   :  { %v5166_v13 = vand.u32 127, %v32_v2  ;;  %v30_v14 = vunpack.c.l.bf16 %v29_v5  ;;  %v51_v15 = vunpack.c.h.bf16 %v29_v5  ;;  %v821_v16 = vunpack.c.l.bf16 %v4542_v10  ;;  %v4508_v17 = vld [vmem:[%s6171_s2 + $0x8] sm:$0xff]   ;;  %v4544_v42 = vld [vmem:[%s6171_s2 + $0x98] sm:$0xff]   ;;  %v4526_v47 = vld [vmem:[%s6171_s2 + $0x50] sm:$0xff]  }
   0x6   :  { %v843_v18 = vunpack.c.h.bf16 %v4542_v10  ;;  %v425_v19 = vunpack.c.l.bf16 %v4524_v11  ;;  %v447_v20 = vunpack.c.h.bf16 %v4524_v11  ;;  %v1217_v21 = vunpack.c.l.bf16 %v4560_v12  ;;  %v4562_v52 = vld [vmem:[%s6171_s2 + $0xe0] sm:$0xff]   ;;  %v4510_v3 = vld [vmem:[%s6171_s2 + $0x10] sm:$0xff]   ;;  %v4564_v10 = vld [vmem:[%s6171_s2 + $0xe8] sm:$0xff]  }
   0x7   :  { %vm35_vm0 = vcmp.lt.s32.totalorder %v5166_v13, 50  ;;  %v1239_v22 = vunpack.c.h.bf16 %v4560_v12  ;;  %v73_v23 = vunpack.c.l.bf16 %v4508_v17  ;;  %v95_v24 = vunpack.c.h.bf16 %v4508_v17  ;;  %v5057_v57 = vld [vmem:[%s6169_s0 + $0x4] ss:$12 sps:$4 sm:$0xff]   ;;  %v4402_v13 = vld [vmem:[%s6170_s1 + $0x18] sm:$0xff] }
   0x8   :  { %v387_v25 = vsel %vm35_vm0, %v381_v6, %v5146_v1  ;;  %v409_v26 = vsel %vm35_vm0, %v403_v7, %v5146_v1  ;;  %v1179_v27 = vsel %vm35_vm0, %v1173_v8, %v5146_v1  ;;  %v1201_v28 = vsel %vm35_vm0, %v1195_v9, %v5146_v1  ;;  %v4546_v4 = vld [vmem:[%s6171_s2 + $0xa0] sm:$0xff]   ;;  %3452 = vmatprep.mubr.bf16.mxu0 %v5057_v57  ;;  %v4528_v9 = vld [vmem:[%s6171_s2 + $0x58] sm:$0xff]  }
   0x9   :  { %v389_v30 = vpack.c.bf16 %v5116_v29, %v387_v25  ;;  %v411_v31 = vpack.c.bf16 %v5116_v29, %v409_v26  ;;  %v1181_v32 = vpack.c.bf16 %v5116_v29, %v1179_v27  ;;  %v1203_v33 = vpack.c.bf16 %v5116_v29, %v1201_v28  ;;  %3727 = vmatprep.mubr.bf16.mxu1 %v5057_v57  ;;  %v4512_v27 = vld [vmem:[%s6171_s2 + $0x18] sm:$0xff]  }
   0xa   :  { %v36_v34 = vsel %vm35_vm0, %v30_v14, %v5146_v1  ;;  %v57_v35 = vsel %vm35_vm0, %v51_v15, %v5146_v1  ;;  %v827_v36 = vsel %vm35_vm0, %v821_v16, %v5146_v1  ;;  %v849_v37 = vsel %vm35_vm0, %v843_v18, %v5146_v1 }
   0xb   :  { %391 = vst [vmem:[#allocation7 + $0x40] sm:$0xf] %v389_v30  ;;  %413 = vst [vmem:[#allocation7 + $0x44] sm:$0xf] %v411_v31  ;;  %v37_v38 = vpack.c.bf16 %v5116_v29, %v36_v34  ;;  %v59_v39 = vpack.c.bf16 %v5116_v29, %v57_v35  ;;  %v829_v40 = vpack.c.bf16 %v5116_v29, %v827_v36  ;;  %v865_v55 = vunpack.c.l.bf16 %v4544_v42  ;;  %v4548_v34 = vld [vmem:[%s6171_s2 + $0xa8] sm:$0xff]   ;;  %v4530_v35 = vld [vmem:[%s6171_s2 + $0x60] sm:$0xff]  }
   0xc   :  { %1183 = vst [vmem:[#allocation7 + $0xd0] sm:$0xf] %v1181_v32  ;;  %1205 = vst [vmem:[#allocation7 + $0xd4] sm:$0xf] %v1203_v33  ;;  %v851_v41 = vpack.c.bf16 %v5116_v29, %v849_v37  ;;  %v431_v43 = vsel %vm35_vm0, %v425_v19, %v5146_v1  ;;  %v453_v44 = vsel %vm35_vm0, %v447_v20, %v5146_v1  ;;  %v887_v56 = vunpack.c.h.bf16 %v4544_v42 }
   0xd   :  { %v1223_v45 = vsel %vm35_vm0, %v1217_v21, %v5146_v1  ;;  %v1245_v46 = vsel %vm35_vm0, %v1239_v22, %v5146_v1  ;;  %39 = vst [vmem:[#allocation7] sm:$0xf] %v37_v38  ;;  %61 = vst [vmem:[#allocation7 + $0x4] sm:$0xf] %v59_v39  ;;  %v433_v48 = vpack.c.bf16 %v5116_v29, %v431_v43  ;;  %v469_v60 = vunpack.c.l.bf16 %v4526_v47 }
   0xe   :  { %831 = vst [vmem:[#allocation7 + $0x90] sm:$0xf] %v829_v40  ;;  %853 = vst [vmem:[#allocation7 + $0x94] sm:$0xf] %v851_v41  ;;  %v455_v49 = vpack.c.bf16 %v5116_v29, %v453_v44  ;;  %v1225_v50 = vpack.c.bf16 %v5116_v29, %v1223_v45  ;;  %v1247_v51 = vpack.c.bf16 %v5116_v29, %v1245_v46  ;;  %v491_v61 = vunpack.c.h.bf16 %v4526_v47  ;;  %v4566_v41 = vld [vmem:[%s6171_s2 + $0xf0] sm:$0xff]  }
   0xf   :  { %v79_v53 = vsel %vm35_vm0, %v73_v23, %v5146_v1  ;;  %v101_v54 = vsel %vm35_vm0, %v95_v24, %v5146_v1  ;;  %435 = vst [vmem:[#allocation7 + $0x48] sm:$0xf] %v433_v48  ;;  %v871_v62 = vsel %vm35_vm0, %v865_v55, %v5146_v1  ;;  %v893_v63 = vsel %vm35_vm0, %v887_v56, %v5146_v1 }
  0x10   :  { %457 = vst [vmem:[#allocation7 + $0x4c] sm:$0xf] %v455_v49  ;;  %1227 = vst [vmem:[#allocation7 + $0xd8] sm:$0xf] %v1225_v50  ;;  %v81_v58 = vpack.c.bf16 %v5116_v29, %v79_v53  ;;  %v103_v59 = vpack.c.bf16 %v5116_v29, %v101_v54  ;;  %v1261_v0 = vunpack.c.l.bf16 %v4562_v52  ;;  %v1283_v2 = vunpack.c.h.bf16 %v4562_v52 }
  0x11   :  { %1249 = vst [vmem:[#allocation7 + $0xdc] sm:$0xf] %v1247_v51  ;;  %v873_v5 = vpack.c.bf16 %v5116_v29, %v871_v62  ;;  %v895_v6 = vpack.c.bf16 %v5116_v29, %v893_v63  ;;  %v475_v7 = vsel %vm35_vm0, %v469_v60, %v5146_v1  ;;  %v497_v8 = vsel %vm35_vm0, %v491_v61, %v5146_v1  ;;  %v4514_v61 = vld [vmem:[%s6171_s2 + $0x20] sm:$0xff]  }
  0x12   :  { %83 = vst [vmem:[#allocation7 + $0x8] sm:$0xf] %v81_v58  ;;  %105 = vst [vmem:[#allocation7 + $0xc] sm:$0xf] %v103_v59  ;;  %v5025_v11 = vld [vmem:[#allocation7 + $0x40] sm:$0xff]   ;;  %v477_v12 = vpack.c.bf16 %v5116_v29, %v475_v7  ;;  %v499_v14 = vpack.c.bf16 %v5116_v29, %v497_v8  ;;  %v1267_v15 = vsel %vm35_vm0, %v1261_v0, %v5146_v1  ;;  %v117_v20 = vunpack.c.l.bf16 %v4510_v3 }
  0x13   :  { %v1289_v16 = vsel %vm35_vm0, %v1283_v2, %v5146_v1  ;;  %v5026_v17 = vld [vmem:[#allocation7 + $0xd0] sm:$0xff]   ;;  %875 = vst [vmem:[#allocation7 + $0x98] sm:$0xf] %v873_v5  ;;  %897 = vst [vmem:[#allocation7 + $0x9c] sm:$0xf] %v895_v6  ;;  %v1269_v18 = vpack.c.bf16 %v5116_v29, %v1267_v15  ;;  %v139_v21 = vunpack.c.h.bf16 %v4510_v3  ;;  %4789 = vmatprep.subr.bf16.mxu0 %v5025_v11  ;;  %v909_v23 = vunpack.c.l.bf16 %v4546_v4  ;;  %v4532_v15 = vld [vmem:[%s6171_s2 + $0x68] sm:$0xff]  }
  0x14   :  { %v1291_v19 = vpack.c.bf16 %v5116_v29, %v1289_v16  ;;  %v5027_v22 = vld [vmem:[#allocation7] sm:$0xff]   ;;  %479 = vst [vmem:[#allocation7 + $0x50] sm:$0xf] %v477_v12  ;;  %501 = vst [vmem:[#allocation7 + $0x54] sm:$0xf] %v499_v14  ;;  %v931_v24 = vunpack.c.h.bf16 %v4546_v4  ;;  %v513_v25 = vunpack.c.l.bf16 %v4528_v9  ;;  %v535_v26 = vunpack.c.h.bf16 %v4528_v9  ;;  %4835 = vmatprep.subr.bf16.mxu1 %v5026_v17  ;;  %v4550_v4 = vld [vmem:[%s6171_s2 + $0xb0] sm:$0xff]  }
  0x15   :  { %v5028_v28 = vld [vmem:[#allocation7 + $0x90] sm:$0xff]   ;;  %1271 = vst [vmem:[#allocation7 + $0xe0] sm:$0xf] %v1269_v18  ;;  %v123_v30 = vsel %vm35_vm0, %v117_v20, %v5146_v1  ;;  %v145_v31 = vsel %vm35_vm0, %v139_v21, %v5146_v1  ;;  %v1305_v32 = vunpack.c.l.bf16 %v4564_v10  ;;  %v1327_v33 = vunpack.c.h.bf16 %v4564_v10  ;;  %4790 = vmatpush3.bf16.msra.mxu0 %v5027_v22  ;;  %v4568_v20 = vld [vmem:[%s6171_s2 + $0xf8] sm:$0xff]  }
  0x16   :  { %1293 = vst [vmem:[#allocation7 + $0xe4] sm:$0xf] %v1291_v19  ;;  %v125_v37 = vpack.c.bf16 %v5116_v29, %v123_v30  ;;  %v147_v38 = vpack.c.bf16 %v5116_v29, %v145_v31  ;;  %v915_v39 = vsel %vm35_vm0, %v909_v23, %v5146_v1  ;;  %v937_v40 = vsel %vm35_vm0, %v931_v24, %v5146_v1 }
  0x17   :  { %v5029_v36 = vld [vmem:[#allocation7 + $0x48] sm:$0xff]   ;;  %4836 = vmatpush3.bf16.msra.mxu1 %v5028_v28  ;;  %v917_v43 = vpack.c.bf16 %v5116_v29, %v915_v39  ;;  %v939_v44 = vpack.c.bf16 %v5116_v29, %v937_v40  ;;  %v519_v45 = vsel %vm35_vm0, %v513_v25, %v5146_v1  ;;  %v541_v46 = vsel %vm35_vm0, %v535_v26, %v5146_v1 }
  0x18   :  { %v5030_v42 = vld [vmem:[#allocation7 + $0xd8] sm:$0xff]   ;;  %4791 = vmatprep.subr.bf16.mxu0 %v5029_v36  ;;  %127 = vst [vmem:[#allocation7 + $0x10] sm:$0xf] %v125_v37  ;;  %149 = vst [vmem:[#allocation7 + $0x14] sm:$0xf] %v147_v38  ;;  %v521_v48 = vpack.c.bf16 %v5116_v29, %v519_v45  ;;  %v543_v49 = vpack.c.bf16 %v5116_v29, %v541_v46  ;;  %v1311_v50 = vsel %vm35_vm0, %v1305_v32, %v5146_v1  ;;  %v4516_v32 = vld [vmem:[%s6171_s2 + $0x28] sm:$0xff]  }
  0x19   :  { %v5031_v47 = vld [vmem:[#allocation7 + $0x8] sm:$0xff]   ;;  %v1333_v51 = vsel %vm35_vm0, %v1327_v33, %v5146_v1  ;;  %4837 = vmatprep.subr.bf16.mxu1 %v5030_v42  ;;  %919 = vst [vmem:[#allocation7 + $0xa0] sm:$0xf] %v917_v43  ;;  %941 = vst [vmem:[#allocation7 + $0xa4] sm:$0xf] %v939_v44  ;;  %v1313_v52 = vpack.c.bf16 %v5116_v29, %v1311_v50  ;;  %v161_v54 = vunpack.c.l.bf16 %v4512_v27  ;;  %v183_v55 = vunpack.c.h.bf16 %v4512_v27 }
  0x1a   :  { %v1335_v53 = vpack.c.bf16 %v5116_v29, %v1333_v51  ;;  %4792 = vmatpush3.bf16.msra.mxu0 %v5031_v47  ;;  %v5032_v56 = vld [vmem:[#allocation7 + $0x98] sm:$0xff]   ;;  %523 = vst [vmem:[#allocation7 + $0x58] sm:$0xf] %v521_v48  ;;  %545 = vst [vmem:[#allocation7 + $0x5c] sm:$0xf] %v543_v49  ;;  %v953_v57 = vunpack.c.l.bf16 %v4548_v34  ;;  %v975_v58 = vunpack.c.h.bf16 %v4548_v34  ;;  %v557_v59 = vunpack.c.l.bf16 %v4530_v35  ;;  %v4534_v48 = vld [vmem:[%s6171_s2 + $0x70] sm:$0xff]  }
  0x1b   :  { %v579_v60 = vunpack.c.h.bf16 %v4530_v35  ;;  %v5033_v62 = vld [vmem:[#allocation7 + $0x50] sm:$0xff]   ;;  %1315 = vst [vmem:[#allocation7 + $0xe8] sm:$0xf] %v1313_v52  ;;  %v167_v63 = vsel %vm35_vm0, %v161_v54, %v5146_v1  ;;  %v189_v0 = vsel %vm35_vm0, %v183_v55, %v5146_v1  ;;  %v1349_v2 = vunpack.c.l.bf16 %v4566_v41  ;;  %4838 = vmatpush3.bf16.msra.mxu1 %v5032_v56  ;;  %v4552_v47 = vld [vmem:[%s6171_s2 + $0xb8] sm:$0xff]  }
  0x1c   :  { %1337 = vst [vmem:[#allocation7 + $0xec] sm:$0xf] %v1335_v53  ;;  %v1371_v3 = vunpack.c.h.bf16 %v4566_v41  ;;  %v169_v6 = vpack.c.bf16 %v5116_v29, %v167_v63  ;;  %v191_v7 = vpack.c.bf16 %v5116_v29, %v189_v0  ;;  %v959_v8 = vsel %vm35_vm0, %v953_v57, %v5146_v1  ;;  %4793 = vmatprep.subr.bf16.mxu0 %v5033_v62  ;;  %v4570_v53 = vld [vmem:[%s6171_s2 + $0x100] sm:$0xff]   ;;  %v4518_v0 = vld [vmem:[%s6171_s2 + $0x30] sm:$0xff]  }
  0x1d   :  { %v5034_v5 = vld [vmem:[#allocation7 + $0xe0] sm:$0xff]   ;;  %v981_v9 = vsel %vm35_vm0, %v975_v58, %v5146_v1  ;;  %v961_v10 = vpack.c.bf16 %v5116_v29, %v959_v8  ;;  %v563_v12 = vsel %vm35_vm0, %v557_v59, %v5146_v1  ;;  %v585_v14 = vsel %vm35_vm0, %v579_v60, %v5146_v1 }
  0x1e   :  { %v983_v11 = vpack.c.bf16 %v5116_v29, %v981_v9  ;;  %4839 = vmatprep.subr.bf16.mxu1 %v5034_v5  ;;  %171 = vst [vmem:[#allocation7 + $0x18] sm:$0xf] %v169_v6  ;;  %193 = vst [vmem:[#allocation7 + $0x1c] sm:$0xf] %v191_v7  ;;  %v565_v16 = vpack.c.bf16 %v5116_v29, %v563_v12  ;;  %v587_v17 = vpack.c.bf16 %v5116_v29, %v585_v14 }
  0x1f   :  { %v1355_v18 = vsel %vm35_vm0, %v1349_v2, %v5146_v1  ;;  %v1377_v19 = vsel %vm35_vm0, %v1371_v3, %v5146_v1  ;;  %v5035_v21 = vld [vmem:[#allocation7 + $0x10] sm:$0xff]   ;;  %963 = vst [vmem:[#allocation7 + $0xa8] sm:$0xf] %v961_v10  ;;  %v205_v24 = vunpack.c.l.bf16 %v4514_v61  ;;  %v227_v25 = vunpack.c.h.bf16 %v4514_v61 }
  0x20   :  { %985 = vst [vmem:[#allocation7 + $0xac] sm:$0xf] %v983_v11  ;;  %v1357_v22 = vpack.c.bf16 %v5116_v29, %v1355_v18  ;;  %v1379_v23 = vpack.c.bf16 %v5116_v29, %v1377_v19  ;;  %v5036_v26 = vld [vmem:[#allocation7 + $0xa0] sm:$0xff]   ;;  %567 = vst [vmem:[#allocation7 + $0x60] sm:$0xf] %v565_v16  ;;  %v997_v27 = vunpack.c.l.bf16 %v4550_v4  ;;  %v1019_v28 = vunpack.c.h.bf16 %v4550_v4  ;;  %4794 = vmatpush3.bf16.msra.mxu0 %v5035_v21  ;;  %v4536_v18 = vld [vmem:[%s6171_s2 + $0x78] sm:$0xff]  }
  0x21   :  { %589 = vst [vmem:[#allocation7 + $0x64] sm:$0xf] %v587_v17  ;;  %v601_v30 = vunpack.c.l.bf16 %v4532_v15  ;;  %v623_v31 = vunpack.c.h.bf16 %v4532_v15  ;;  %v5037_v33 = vld [vmem:[#allocation7 + $0x58] sm:$0xff]   ;;  %v211_v34 = vsel %vm35_vm0, %v205_v24, %v5146_v1  ;;  %v233_v35 = vsel %vm35_vm0, %v227_v25, %v5146_v1  ;;  %4840 = vmatpush3.bf16.msra.mxu1 %v5036_v26  ;;  %v4554_v17 = vld [vmem:[%s6171_s2 + $0xc0] sm:$0xff]  }
  0x22   :  { %1359 = vst [vmem:[#allocation7 + $0xf0] sm:$0xf] %v1357_v22  ;;  %1381 = vst [vmem:[#allocation7 + $0xf4] sm:$0xf] %v1379_v23  ;;  %v1393_v36 = vunpack.c.l.bf16 %v4568_v20  ;;  %v1415_v37 = vunpack.c.h.bf16 %v4568_v20  ;;  %v213_v39 = vpack.c.bf16 %v5116_v29, %v211_v34  ;;  %v235_v40 = vpack.c.bf16 %v5116_v29, %v233_v35  ;;  %4795 = vmatprep.subr.bf16.mxu0 %v5037_v33  ;;  %v4572_v23 = vld [vmem:[%s6171_s2 + $0x108] sm:$0xff]   ;;  %v4520_v35 = vld [vmem:[%s6171_s2 + $0x38] sm:$0xff]  }
  0x23   :  { %v5038_v38 = vld [vmem:[#allocation7 + $0xe8] sm:$0xff]   ;;  %v1003_v41 = vsel %vm35_vm0, %v997_v27, %v5146_v1  ;;  %v1025_v42 = vsel %vm35_vm0, %v1019_v28, %v5146_v1  ;;  %v607_v45 = vsel %vm35_vm0, %v601_v30, %v5146_v1  ;;  %v629_v46 = vsel %vm35_vm0, %v623_v31, %v5146_v1 }
  0x24   :  { %v1005_v43 = vpack.c.bf16 %v5116_v29, %v1003_v41  ;;  %v1027_v44 = vpack.c.bf16 %v5116_v29, %v1025_v42  ;;  %4841 = vmatprep.subr.bf16.mxu1 %v5038_v38  ;;  %215 = vst [vmem:[#allocation7 + $0x20] sm:$0xf] %v213_v39  ;;  %237 = vst [vmem:[#allocation7 + $0x24] sm:$0xf] %v235_v40  ;;  %v609_v49 = vpack.c.bf16 %v5116_v29, %v607_v45  ;;  %v4556_v41 = vld [vmem:[%s6171_s2 + $0xc8] sm:$0xff]  }
  0x25   :  { %v631_v50 = vpack.c.bf16 %v5116_v29, %v629_v46  ;;  %v1399_v51 = vsel %vm35_vm0, %v1393_v36, %v5146_v1  ;;  %v1421_v52 = vsel %vm35_vm0, %v1415_v37, %v5146_v1  ;;  %v5039_v54 = vld [vmem:[#allocation7 + $0x18] sm:$0xff]   ;;  %v249_v57 = vunpack.c.l.bf16 %v4516_v32 }
  0x26   :  { %1007 = vst [vmem:[#allocation7 + $0xb0] sm:$0xf] %v1005_v43  ;;  %1029 = vst [vmem:[#allocation7 + $0xb4] sm:$0xf] %v1027_v44  ;;  %v1401_v55 = vpack.c.bf16 %v5116_v29, %v1399_v51  ;;  %v1423_v56 = vpack.c.bf16 %v5116_v29, %v1421_v52  ;;  %v271_v58 = vunpack.c.h.bf16 %v4516_v32  ;;  %v1041_v60 = vunpack.c.l.bf16 %v4552_v47  ;;  %4796 = vmatpush3.bf16.msra.mxu0 %v5039_v54  ;;  %v4594_v51 = vld [vmem:[%s6171_s2 + $0x160] sm:$0xff]  }
  0x27   :  { %v5040_v59 = vld [vmem:[#allocation7 + $0xa8] sm:$0xff]   ;;  %611 = vst [vmem:[#allocation7 + $0x68] sm:$0xf] %v609_v49  ;;  %633 = vst [vmem:[#allocation7 + $0x6c] sm:$0xf] %v631_v50  ;;  %v1063_v61 = vunpack.c.h.bf16 %v4552_v47  ;;  %v645_v62 = vunpack.c.l.bf16 %v4534_v48  ;;  %v667_v63 = vunpack.c.h.bf16 %v4534_v48  ;;  %v255_v3 = vsel %vm35_vm0, %v249_v57, %v5146_v1 }
  0x28   :  { %v5041_v2 = vld [vmem:[#allocation7 + $0x60] sm:$0xff]   ;;  %1403 = vst [vmem:[#allocation7 + $0xf8] sm:$0xf] %v1401_v55  ;;  %1425 = vst [vmem:[#allocation7 + $0xfc] sm:$0xf] %v1423_v56  ;;  %v277_v4 = vsel %vm35_vm0, %v271_v58, %v5146_v1  ;;  %v1437_v5 = vunpack.c.l.bf16 %v4570_v53  ;;  %v1459_v6 = vunpack.c.h.bf16 %v4570_v53  ;;  %4842 = vmatpush3.bf16.msra.mxu1 %v5040_v59  ;;  %v257_v8 = vpack.c.bf16 %v5116_v29, %v255_v3 }
  0x29   :  { %v5042_v7 = vld [vmem:[#allocation7 + $0xf0] sm:$0xff]   ;;  %v279_v9 = vpack.c.bf16 %v5116_v29, %v277_v4  ;;  %v1047_v10 = vsel %vm35_vm0, %v1041_v60, %v5146_v1  ;;  %v1069_v11 = vsel %vm35_vm0, %v1063_v61, %v5146_v1  ;;  %4797 = vmatprep.subr.bf16.mxu0 %v5041_v2  ;;  %v651_v15 = vsel %vm35_vm0, %v645_v62, %v5146_v1  ;;  %v4578_v56 = vld [vmem:[%s6171_s2 + $0x120] sm:$0xff]  }
  0x2a   :  { %v1049_v12 = vpack.c.bf16 %v5116_v29, %v1047_v10  ;;  %v1071_v14 = vpack.c.bf16 %v5116_v29, %v1069_v11  ;;  %v673_v16 = vsel %vm35_vm0, %v667_v63, %v5146_v1  ;;  %4843 = vmatprep.subr.bf16.mxu1 %v5042_v7  ;;  %259 = vst [vmem:[#allocation7 + $0x28] sm:$0xf] %v257_v8  ;;  %v293_v27 = vunpack.c.l.bf16 %v4518_v0  ;;  %v4538_v4 = vld [vmem:[%s6171_s2 + $0x80] sm:$0xff]  }
  0x2b   :  { %281 = vst [vmem:[#allocation7 + $0x2c] sm:$0xf] %v279_v9  ;;  %v653_v19 = vpack.c.bf16 %v5116_v29, %v651_v15  ;;  %v675_v20 = vpack.c.bf16 %v5116_v29, %v673_v16  ;;  %v1443_v21 = vsel %vm35_vm0, %v1437_v5, %v5146_v1  ;;  %v1465_v22 = vsel %vm35_vm0, %v1459_v6, %v5146_v1  ;;  %v5043_v24 = vld [vmem:[#allocation7 + $0x20] sm:$0xff]  }
  0x2c   :  { %1051 = vst [vmem:[#allocation7 + $0xb8] sm:$0xf] %v1049_v12  ;;  %1073 = vst [vmem:[#allocation7 + $0xbc] sm:$0xf] %v1071_v14  ;;  %v1445_v25 = vpack.c.bf16 %v5116_v29, %v1443_v21  ;;  %v1467_v26 = vpack.c.bf16 %v5116_v29, %v1465_v22  ;;  %v315_v28 = vunpack.c.h.bf16 %v4518_v0  ;;  %v1085_v31 = vunpack.c.l.bf16 %v4554_v17  ;;  %4798 = vmatpush3.bf16.msra.mxu0 %v5043_v24  ;;  %v4580_v21 = vld [vmem:[%s6171_s2 + $0x128] sm:$0xff]  }
  0x2d   :  { %v5044_v30 = vld [vmem:[#allocation7 + $0xb0] sm:$0xff]   ;;  %655 = vst [vmem:[#allocation7 + $0x70] sm:$0xf] %v653_v19  ;;  %677 = vst [vmem:[#allocation7 + $0x74] sm:$0xf] %v675_v20  ;;  %v1107_v32 = vunpack.c.h.bf16 %v4554_v17  ;;  %v689_v33 = vunpack.c.l.bf16 %v4536_v18  ;;  %v711_v34 = vunpack.c.h.bf16 %v4536_v18  ;;  %v299_v37 = vsel %vm35_vm0, %v293_v27, %v5146_v1  ;;  %v4596_v20 = vld [vmem:[%s6171_s2 + $0x168] sm:$0xff]  }
  0x2e   :  { %v5045_v36 = vld [vmem:[#allocation7 + $0x68] sm:$0xff]   ;;  %1447 = vst [vmem:[#allocation7 + $0x100] sm:$0xf] %v1445_v25  ;;  %1469 = vst [vmem:[#allocation7 + $0x104] sm:$0xf] %v1467_v26  ;;  %v321_v38 = vsel %vm35_vm0, %v315_v28, %v5146_v1  ;;  %v1481_v39 = vunpack.c.l.bf16 %v4572_v23  ;;  %v1503_v40 = vunpack.c.h.bf16 %v4572_v23  ;;  %4844 = vmatpush3.bf16.msra.mxu1 %v5044_v30  ;;  %v301_v43 = vpack.c.bf16 %v5116_v29, %v299_v37  ;;  %v4598_v26 = vld [vmem:[%s6171_s2 + $0x170] sm:$0xff]  }
  0x2f   :  { %v5046_v42 = vld [vmem:[#allocation7 + $0xf8] sm:$0xff]   ;;  %v323_v44 = vpack.c.bf16 %v5116_v29, %v321_v38  ;;  %v1091_v45 = vsel %vm35_vm0, %v1085_v31, %v5146_v1  ;;  %v1113_v46 = vsel %vm35_vm0, %v1107_v32, %v5146_v1  ;;  %4799 = vmatprep.subr.bf16.mxu0 %v5045_v36  ;;  %v695_v49 = vsel %vm35_vm0, %v689_v33, %v5146_v1  ;;  %v4582_v38 = vld [vmem:[%s6171_s2 + $0x130] sm:$0xff]  }
  0x30   :  { %v1093_v47 = vpack.c.bf16 %v5116_v29, %v1091_v45  ;;  %v1115_v48 = vpack.c.bf16 %v5116_v29, %v1113_v46  ;;  %v717_v50 = vsel %vm35_vm0, %v711_v34, %v5146_v1  ;;  %4845 = vmatprep.subr.bf16.mxu1 %v5046_v42  ;;  %303 = vst [vmem:[#allocation7 + $0x30] sm:$0xf] %v301_v43  ;;  %v337_v60 = vunpack.c.l.bf16 %v4520_v35 }
  0x31   :  { %325 = vst [vmem:[#allocation7 + $0x34] sm:$0xf] %v323_v44  ;;  %v697_v52 = vpack.c.bf16 %v5116_v29, %v695_v49  ;;  %v719_v53 = vpack.c.bf16 %v5116_v29, %v717_v50  ;;  %v1487_v54 = vsel %vm35_vm0, %v1481_v39, %v5146_v1  ;;  %v1509_v55 = vsel %vm35_vm0, %v1503_v40, %v5146_v1  ;;  %v4600_v44 = vld [vmem:[%s6171_s2 + $0x178] sm:$0xff]  }
  0x32   :  { %v5047_v57 = vld [vmem:[#allocation7 + $0x28] sm:$0xff]   ;;  %1095 = vst [vmem:[#allocation7 + $0xc0] sm:$0xf] %v1093_v47  ;;  %1117 = vst [vmem:[#allocation7 + $0xc4] sm:$0xf] %v1115_v48  ;;  %v1489_v58 = vpack.c.bf16 %v5116_v29, %v1487_v54  ;;  %v1511_v59 = vpack.c.bf16 %v5116_v29, %v1509_v55  ;;  %v359_v61 = vunpack.c.h.bf16 %v4520_v35  ;;  %v1129_v63 = vunpack.c.l.bf16 %v4556_v41  ;;  %v4584_v54 = vld [vmem:[%s6171_s2 + $0x138] sm:$0xff]  }
  0x33   :  { %v5048_v62 = vld [vmem:[#allocation7 + $0xb8] sm:$0xff]   ;;  %699 = vst [vmem:[#allocation7 + $0x78] sm:$0xf] %v697_v52  ;;  %721 = vst [vmem:[#allocation7 + $0x7c] sm:$0xf] %v719_v53  ;;  %v1151_v0 = vunpack.c.h.bf16 %v4556_v41  ;;  %v1965_v2 = vunpack.c.l.bf16 %v4594_v51  ;;  %v1987_v3 = vunpack.c.h.bf16 %v4594_v51  ;;  %4800 = vmatpush3.bf16.msra.mxu0 %v5047_v57  ;;  %v343_v6 = vsel %vm35_vm0, %v337_v60, %v5146_v1  ;;  %v4602_v60 = vld [vmem:[%s6171_s2 + $0x180] sm:$0xff]  }
  0x34   :  { %v5049_v5 = vld [vmem:[#allocation7 + $0x70] sm:$0xff]   ;;  %1491 = vst [vmem:[#allocation7 + $0x108] sm:$0xf] %v1489_v58  ;;  %1513 = vst [vmem:[#allocation7 + $0x10c] sm:$0xf] %v1511_v59  ;;  %v365_v7 = vsel %vm35_vm0, %v359_v61, %v5146_v1  ;;  %v1613_v8 = vunpack.c.l.bf16 %v4578_v56  ;;  %v1635_v9 = vunpack.c.h.bf16 %v4578_v56  ;;  %4846 = vmatpush3.bf16.msra.mxu1 %v5048_v62  ;;  %v345_v11 = vpack.c.bf16 %v5116_v29, %v343_v6 }
  0x35   :  { %v5050_v10 = vld [vmem:[#allocation7 + $0x100] sm:$0xff]   ;;  %v367_v12 = vpack.c.bf16 %v5116_v29, %v365_v7  ;;  %v1135_v14 = vsel %vm35_vm0, %v1129_v63, %v5146_v1  ;;  %v1157_v15 = vsel %vm35_vm0, %v1151_v0, %v5146_v1  ;;  %4801 = vmatprep.subr.bf16.mxu0 %v5049_v5  ;;  %v1971_v18 = vsel %vm35_vm0, %v1965_v2, %v5146_v1  ;;  %v5590_v62 = vld [vmem:[%s6169_s0 + $0x1c] ss:$12 sps:$4 sm:$0xff]  }
  0x36   :  { %v1137_v16 = vpack.c.bf16 %v5116_v29, %v1135_v14  ;;  %v1159_v17 = vpack.c.bf16 %v5116_v29, %v1157_v15  ;;  %v1993_v19 = vsel %vm35_vm0, %v1987_v3, %v5146_v1  ;;  %4847 = vmatprep.subr.bf16.mxu1 %v5050_v10  ;;  %347 = vst [vmem:[#allocation7 + $0x38] sm:$0xf] %v345_v11  ;;  %v733_v31 = vunpack.c.l.bf16 %v4538_v4  ;;  %v5574_v55 = vld [vmem:[%s6169_s0] ss:$12 sps:$4 sm:$0xff]  }
  0x37   :  { %369 = vst [vmem:[#allocation7 + $0x3c] sm:$0xf] %v367_v12  ;;  %v1973_v22 = vpack.c.bf16 %v5116_v29, %v1971_v18  ;;  %v1995_v23 = vpack.c.bf16 %v5116_v29, %v1993_v19  ;;  %v1619_v24 = vsel %vm35_vm0, %v1613_v8, %v5146_v1  ;;  %v1641_v25 = vsel %vm35_vm0, %v1635_v9, %v5146_v1  ;;  %v4586_v9 = vld [vmem:[%s6171_s2 + $0x140] sm:$0xff]  }
  0x38   :  { %v5051_v27 = vld [vmem:[#allocation7 + $0x30] sm:$0xff]   ;;  %1139 = vst [vmem:[#allocation7 + $0xc8] sm:$0xf] %v1137_v16  ;;  %1161 = vst [vmem:[#allocation7 + $0xcc] sm:$0xf] %v1159_v17  ;;  %v1621_v28 = vpack.c.bf16 %v5116_v29, %v1619_v24  ;;  %v1643_v30 = vpack.c.bf16 %v5116_v29, %v1641_v25  ;;  %v755_v32 = vunpack.c.h.bf16 %v4538_v4  ;;  %v2009_v34 = vunpack.c.l.bf16 %v4596_v20  ;;  %v4540_v25 = vld [vmem:[%s6171_s2 + $0x88] sm:$0xff]  }
  0x39   :  { %v5052_v33 = vld [vmem:[#allocation7 + $0xc0] sm:$0xff]   ;;  %1975 = vst [vmem:[#allocation7 + $0x160] sm:$0xf] %v1973_v22  ;;  %1997 = vst [vmem:[#allocation7 + $0x164] sm:$0xf] %v1995_v23  ;;  %v2031_v35 = vunpack.c.h.bf16 %v4596_v20  ;;  %v1657_v36 = vunpack.c.l.bf16 %v4580_v21  ;;  %v1679_v37 = vunpack.c.h.bf16 %v4580_v21  ;;  %4802 = vmatpush3.bf16.msra.mxu0 %v5051_v27  ;;  %v739_v40 = vsel %vm35_vm0, %v733_v31, %v5146_v1 }
  0x3a   :  { %v5053_v39 = vld [vmem:[#allocation7 + $0x78] sm:$0xff]   ;;  %1623 = vst [vmem:[#allocation7 + $0x120] sm:$0xf] %v1621_v28  ;;  %1645 = vst [vmem:[#allocation7 + $0x124] sm:$0xf] %v1643_v30  ;;  %v761_v41 = vsel %vm35_vm0, %v755_v32, %v5146_v1  ;;  %v2053_v42 = vunpack.c.l.bf16 %v4598_v26  ;;  %v2075_v43 = vunpack.c.h.bf16 %v4598_v26  ;;  %4848 = vmatpush3.bf16.msra.mxu1 %v5052_v33  ;;  %v741_v46 = vpack.c.bf16 %v5116_v29, %v739_v40  ;;  %v4604_v26 = vld [vmem:[%s6171_s2 + $0x188] sm:$0xff]  }
  0x3b   :  { %v5054_v45 = vld [vmem:[#allocation7 + $0x108] sm:$0xff]   ;;  %v763_v47 = vpack.c.bf16 %v5116_v29, %v761_v41  ;;  %v2015_v48 = vsel %vm35_vm0, %v2009_v34, %v5146_v1  ;;  %v2037_v49 = vsel %vm35_vm0, %v2031_v35, %v5146_v1  ;;  %4803 = vmatprep.subr.bf16.mxu0 %v5053_v39  ;;  %v1663_v52 = vsel %vm35_vm0, %v1657_v36, %v5146_v1  ;;  %v5640_v33 = vld [vmem:[%s6171_s2 + $0x190] sm:$0xff]   ;;  %v5650_v40 = vld [vmem:[%s6169_s0 + $0x18] ss:$12 sps:$4 sm:$0xff]  }
  0x3c   :  { %v2017_v50 = vpack.c.bf16 %v5116_v29, %v2015_v48  ;;  %v2039_v51 = vpack.c.bf16 %v5116_v29, %v2037_v49  ;;  %v1685_v53 = vsel %vm35_vm0, %v1679_v37, %v5146_v1  ;;  %4849 = vmatprep.subr.bf16.mxu1 %v5054_v45  ;;  %743 = vst [vmem:[#allocation7 + $0x80] sm:$0xf] %v741_v46  ;;  %v1701_v2 = vunpack.c.l.bf16 %v4582_v38  ;;  %v4588_v32 = vld [vmem:[%s6171_s2 + $0x148] sm:$0xff]  }
  0x3d   :  { %765 = vst [vmem:[#allocation7 + $0x84] sm:$0xf] %v763_v47  ;;  %v1665_v56 = vpack.c.bf16 %v5116_v29, %v1663_v52  ;;  %v1687_v57 = vpack.c.bf16 %v5116_v29, %v1685_v53  ;;  %v2059_v58 = vsel %vm35_vm0, %v2053_v42, %v5146_v1  ;;  %v2081_v59 = vsel %vm35_vm0, %v2075_v43, %v5146_v1 }
  0x3e   :  { %v5055_v61 = vld [vmem:[#allocation7 + $0x38] sm:$0xff]   ;;  %2019 = vst [vmem:[#allocation7 + $0x168] sm:$0xf] %v2017_v50  ;;  %2041 = vst [vmem:[#allocation7 + $0x16c] sm:$0xf] %v2039_v51  ;;  %v2061_v63 = vpack.c.bf16 %v5116_v29, %v2059_v58  ;;  %v2083_v0 = vpack.c.bf16 %v5116_v29, %v2081_v59  ;;  %v1723_v3 = vunpack.c.h.bf16 %v4582_v38  ;;  %v2097_v5 = vunpack.c.l.bf16 %v4600_v44 }
  0x3f   :  { %v5056_v4 = vld [vmem:[#allocation7 + $0xc8] sm:$0xff]   ;;  %1667 = vst [vmem:[#allocation7 + $0x128] sm:$0xf] %v1665_v56  ;;  %1689 = vst [vmem:[#allocation7 + $0x12c] sm:$0xf] %v1687_v57  ;;  %v2119_v6 = vunpack.c.h.bf16 %v4600_v44  ;;  %v1745_v7 = vunpack.c.l.bf16 %v4584_v54  ;;  %v1767_v8 = vunpack.c.h.bf16 %v4584_v54  ;;  %4804 = vmatpush3.bf16.msra.mxu0 %v5055_v61  ;;  %v1707_v11 = vsel %vm35_vm0, %v1701_v2, %v5146_v1  ;;  %v4590_v61 = vld [vmem:[%s6171_s2 + $0x150] sm:$0xff]  }
  0x40   :  { %v5060_v10 = vld [vmem:[#allocation7 + $0x160] sm:$0xff]   ;;  %2063 = vst [vmem:[#allocation7 + $0x170] sm:$0xf] %v2061_v63  ;;  %2085 = vst [vmem:[#allocation7 + $0x174] sm:$0xf] %v2083_v0  ;;  %v1729_v12 = vsel %vm35_vm0, %v1723_v3, %v5146_v1  ;;  %v2141_v14 = vunpack.c.l.bf16 %v4602_v60  ;;  %v2163_v15 = vunpack.c.h.bf16 %v4602_v60  ;;  %4850 = vmatpush3.bf16.msra.mxu1 %v5056_v4  ;;  %v1709_v17 = vpack.c.bf16 %v5116_v29, %v1707_v11  ;;  %v4608_v4 = vld [vmem:[%s6171_s2 + $0x198] sm:$0xff]  }
  0x41   :  { %v5061_v16 = vld [vmem:[#allocation7 + $0x120] sm:$0xff]   ;;  %v1731_v18 = vpack.c.bf16 %v5116_v29, %v1729_v12  ;;  %v2103_v19 = vsel %vm35_vm0, %v2097_v5, %v5146_v1  ;;  %v2125_v20 = vsel %vm35_vm0, %v2119_v6, %v5146_v1  ;;  %4881 = vmatprep.subr.bf16.mxu1 %v5060_v10  ;;  %v1751_v23 = vsel %vm35_vm0, %v1745_v7, %v5146_v1  ;;  %v4592_v5 = vld [vmem:[%s6171_s2 + $0x158] sm:$0xff]  }
  0x42   :  { %v2105_v21 = vpack.c.bf16 %v5116_v29, %v2103_v19  ;;  %v2127_v22 = vpack.c.bf16 %v5116_v29, %v2125_v20  ;;  %v1773_v24 = vsel %vm35_vm0, %v1767_v8, %v5146_v1  ;;  %3453 = vmatmul.mubr.bf16.vlgmr.msra.gmra.mrb[0].mxu0 %v5574_v55  ;;  %1711 = vst [vmem:[#allocation7 + $0x130] sm:$0xf] %v1709_v17  ;;  %v1789_v37 = vunpack.c.l.bf16 %v4586_v9  ;;  %v5667_v56 = vld [vmem:[%s6169_s0 + $0x34] ss:$12 sps:$4 sm:$0xff]  }
  0x43   :  { %1733 = vst [vmem:[#allocation7 + $0x134] sm:$0xf] %v1731_v18  ;;  %v1753_v27 = vpack.c.bf16 %v5116_v29, %v1751_v23  ;;  %v1775_v28 = vpack.c.bf16 %v5116_v29, %v1773_v24  ;;  %v2147_v30 = vsel %vm35_vm0, %v2141_v14, %v5146_v1  ;;  %v2169_v31 = vsel %vm35_vm0, %v2163_v15, %v5146_v1 }
  0x44   :  { %3728 = vmatmul.mubr.bf16.vlgmr.msra.gmra.mrb[0].mxu1 %v5574_v55  ;;  %v5062_v34 = vld [vmem:[#allocation7 + $0x80] sm:$0xff]   ;;  %3460 = vmatprep.mubr.bf16.mxu0 %v5590_v62  ;;  %2107 = vst [vmem:[#allocation7 + $0x178] sm:$0xf] %v2105_v21  ;;  %2129 = vst [vmem:[#allocation7 + $0x17c] sm:$0xf] %v2127_v22  ;;  %v2149_v35 = vpack.c.bf16 %v5116_v29, %v2147_v30  ;;  %v2171_v36 = vpack.c.bf16 %v5116_v29, %v2169_v31  ;;  %v1811_v38 = vunpack.c.h.bf16 %v4586_v9  ;;  %v4630_v21 = vld [vmem:[%s6171_s2 + $0x1f0] sm:$0xff]  }
  0x45   :  { %4882 = vmatpush3.bf16.msra.mxu1 %v5061_v16  ;;  %v5063_v39 = vld [vmem:[#allocation7 + $0x168] sm:$0xff]   ;;  %3735 = vmatprep.mubr.bf16.mxu1 %v5590_v62  ;;  %1755 = vst [vmem:[#allocation7 + $0x138] sm:$0xf] %v1753_v27  ;;  %1777 = vst [vmem:[#allocation7 + $0x13c] sm:$0xf] %v1775_v28  ;;  %v777_v41 = vunpack.c.l.bf16 %v4540_v25  ;;  %v799_v42 = vunpack.c.h.bf16 %v4540_v25  ;;  %v2185_v43 = vunpack.c.l.bf16 %v4604_v26  ;;  %v2207_v44 = vunpack.c.h.bf16 %v4604_v26 }
  0x46   :  { %4973 = vmatprep.subr.bf16.mxu0 %v5062_v34  ;;  %v5064_v45 = vld [vmem:[#allocation7 + $0x128] sm:$0xff]   ;;  %2151 = vst [vmem:[#allocation7 + $0x180] sm:$0xf] %v2149_v35  ;;  %2173 = vst [vmem:[#allocation7 + $0x184] sm:$0xf] %v2171_v36  ;;  %v1795_v46 = vsel %vm35_vm0, %v1789_v37, %v5146_v1  ;;  %v1817_v47 = vsel %vm35_vm0, %v1811_v38, %v5146_v1  ;;  %v1833_v48 = vunpack.c.l.bf16 %v4588_v32  ;;  %v1855_v49 = vunpack.c.h.bf16 %v4588_v32 }
  0x47   :  { %4974 = vmatpush3.bf16.msra.mxu0 %v5062_v34  ;;  %4883 = vmatprep.subr.bf16.mxu1 %v5063_v39  ;;  %v5068_v50 = vld [vmem:[#allocation7 + $0x170] sm:$0xff]   ;;  %v1797_v51 = vpack.c.bf16 %v5116_v29, %v1795_v46  ;;  %v1819_v52 = vpack.c.bf16 %v5116_v29, %v1817_v47  ;;  %v783_v53 = vsel %vm35_vm0, %v777_v41, %v5146_v1  ;;  %v2229_v54 = vunpack.c.l.bf16 %v5640_v33  ;;  %v4632_v41 = vld [vmem:[%s6171_s2 + $0x1f8] sm:$0xff]  }
  0x48   :  { %v785_v57 = vpack.c.bf16 %v5116_v29, %v783_v53  ;;  %v805_v58 = vsel %vm35_vm0, %v799_v42, %v5146_v1  ;;  %v2191_v59 = vsel %vm35_vm0, %v2185_v43, %v5146_v1  ;;  %v2213_v60 = vsel %vm35_vm0, %v2207_v44, %v5146_v1  ;;  %v4574_v34 = vld [vmem:[%s6171_s2 + $0x110] sm:$0xff]   ;;  %v5754_v42 = vld [vmem:[%s6169_s0 + $0x4c] ss:$12 sps:$4 sm:$0xff]   ;;  %v5764_v53 = vld [vmem:[%s6171_s2 + $0x200] sm:$0xff]  }
  0x49   :  { %4884 = vmatpush3.bf16.msra.mxu1 %v5064_v45  ;;  %1799 = vst [vmem:[#allocation7 + $0x140] sm:$0xf] %v1797_v51  ;;  %1821 = vst [vmem:[#allocation7 + $0x144] sm:$0xf] %v1819_v52  ;;  %v807_v63 = vpack.c.bf16 %v5116_v29, %v805_v58  ;;  %v2193_v0 = vpack.c.bf16 %v5116_v29, %v2191_v59  ;;  %v2215_v2 = vpack.c.bf16 %v5116_v29, %v2213_v60  ;;  %v5738_v35 = vld [vmem:[%s6169_s0 + $0x30] ss:$12 sps:$4 sm:$0xff]  }
  0x4a   :  { %v1839_v3 = vsel %vm35_vm0, %v1833_v48, %v5146_v1  ;;  %4885 = vmatprep.subr.bf16.mxu1 %v5068_v50  ;;  %v5069_v6 = vld [vmem:[#allocation7 + $0x130] sm:$0xff]   ;;  %787 = vst [vmem:[#allocation7 + $0x88] sm:$0xf] %v785_v57  ;;  %v1861_v8 = vsel %vm35_vm0, %v1855_v49, %v5146_v1  ;;  %v2235_v9 = vsel %vm35_vm0, %v2229_v54, %v5146_v1  ;;  %v2251_v10 = vunpack.c.h.bf16 %v5640_v33  ;;  %v4616_v47 = vld [vmem:[%s6171_s2 + $0x1b8] sm:$0xff]  }
  0x4b   :  { %v1841_v7 = vpack.c.bf16 %v5116_v29, %v1839_v3  ;;  %3461 = vmatmul.mubr.bf16.gmra.mrb[4].mxu0 %v5650_v40  ;;  %v5070_v11 = vld [vmem:[#allocation7 + $0x178] sm:$0xff]   ;;  %809 = vst [vmem:[#allocation7 + $0x8c] sm:$0xf] %v807_v63  ;;  %2195 = vst [vmem:[#allocation7 + $0x188] sm:$0xf] %v2193_v0  ;;  %v1863_v12 = vpack.c.bf16 %v5116_v29, %v1861_v8  ;;  %v2237_v14 = vpack.c.bf16 %v5116_v29, %v2235_v9  ;;  %v4614_v33 = vld [vmem:[%s6171_s2 + $0x1b0] sm:$0xff]  }
  0x4c   :  { %2217 = vst [vmem:[#allocation7 + $0x18c] sm:$0xf] %v2215_v2  ;;  %v1877_v15 = vunpack.c.l.bf16 %v4590_v61  ;;  %v1899_v16 = vunpack.c.h.bf16 %v4590_v61  ;;  %3736 = vmatmul.mubr.bf16.gmra.mrb[4].mxu1 %v5650_v40  ;;  %3468 = vmatprep.mubr.bf16.mxu0 %v5667_v56  ;;  %v2257_v17 = vsel %vm35_vm0, %v2251_v10, %v5146_v1  ;;  %v2273_v18 = vunpack.c.l.bf16 %v4608_v4  ;;  %v5071_v22 = vld [vmem:[#allocation7 + $0x138] sm:$0xff]   ;;  %v5790_v9 = vld [vmem:[%s6169_s0 + $0x48] ss:$12 sps:$4 sm:$0xff]  }
  0x4d   :  { %1843 = vst [vmem:[#allocation7 + $0x148] sm:$0xf] %v1841_v7  ;;  %v2295_v19 = vunpack.c.h.bf16 %v4608_v4  ;;  %v1921_v20 = vunpack.c.l.bf16 %v4592_v5  ;;  %4886 = vmatpush3.bf16.msra.mxu1 %v5069_v6  ;;  %3743 = vmatprep.mubr.bf16.mxu1 %v5667_v56  ;;  %1865 = vst [vmem:[#allocation7 + $0x14c] sm:$0xf] %v1863_v12  ;;  %v2259_v23 = vpack.c.bf16 %v5116_v29, %v2257_v17  ;;  %v1943_v26 = vunpack.c.h.bf16 %v4592_v5  ;;  %v5075_v27 = vld [vmem:[#allocation7 + $0x180] sm:$0xff]  }
  0x4e   :  { %2239 = vst [vmem:[#allocation7 + $0x190] sm:$0xf] %v2237_v14  ;;  %v1883_v24 = vsel %vm35_vm0, %v1877_v15, %v5146_v1  ;;  %v1905_v25 = vsel %vm35_vm0, %v1899_v16, %v5146_v1  ;;  %4887 = vmatprep.subr.bf16.mxu1 %v5070_v11  ;;  %v2279_v31 = vsel %vm35_vm0, %v2273_v18, %v5146_v1  ;;  %v2757_v45 = vunpack.c.l.bf16 %v4630_v21  ;;  %v4618_v15 = vld [vmem:[%s6171_s2 + $0x1c0] sm:$0xff]   ;;  %v5806_v17 = vld [vmem:[%s6169_s0 + $0x8] ss:$12 sps:$4 sm:$0xff]  }
  0x4f   :  { %v1885_v28 = vpack.c.bf16 %v5116_v29, %v1883_v24  ;;  %v1907_v30 = vpack.c.bf16 %v5116_v29, %v1905_v25  ;;  %v2301_v32 = vsel %vm35_vm0, %v2295_v19, %v5146_v1  ;;  %2261 = vst [vmem:[#allocation7 + $0x194] sm:$0xf] %v2259_v23  ;;  %v2281_v36 = vpack.c.bf16 %v5116_v29, %v2279_v31 }
  0x50   :  { %v2303_v37 = vpack.c.bf16 %v5116_v29, %v2301_v32  ;;  %v1927_v38 = vsel %vm35_vm0, %v1921_v20, %v5146_v1  ;;  %v1949_v39 = vsel %vm35_vm0, %v1943_v26, %v5146_v1  ;;  %v2779_v46 = vunpack.c.h.bf16 %v4630_v21  ;;  %v5076_v48 = vld [vmem:[#allocation7 + $0x140] sm:$0xff]  }
  0x51   :  { %1887 = vst [vmem:[#allocation7 + $0x150] sm:$0xf] %v1885_v28  ;;  %1909 = vst [vmem:[#allocation7 + $0x154] sm:$0xf] %v1907_v30  ;;  %v1929_v43 = vpack.c.bf16 %v5116_v29, %v1927_v38  ;;  %v1951_v44 = vpack.c.bf16 %v5116_v29, %v1949_v39  ;;  %4888 = vmatpush3.bf16.msra.mxu1 %v5071_v22  ;;  %v2405_v49 = vunpack.c.l.bf16 %v4614_v33  ;;  %v2427_v50 = vunpack.c.h.bf16 %v4614_v33  ;;  %v4576_v22 = vld [vmem:[%s6171_s2 + $0x118] sm:$0xff]   ;;  %v4620_v33 = vld [vmem:[%s6171_s2 + $0x1c8] sm:$0xff]  }
  0x52   :  { %2283 = vst [vmem:[#allocation7 + $0x198] sm:$0xf] %v2281_v36  ;;  %2305 = vst [vmem:[#allocation7 + $0x19c] sm:$0xf] %v2303_v37  ;;  %v1525_v51 = vunpack.c.l.bf16 %v4574_v34  ;;  %v1547_v52 = vunpack.c.h.bf16 %v4574_v34  ;;  %4889 = vmatprep.subr.bf16.mxu1 %v5075_v27  ;;  %v5077_v54 = vld [vmem:[#allocation7 + $0x88] sm:$0xff]   ;;  %v2763_v57 = vsel %vm35_vm0, %v2757_v45, %v5146_v1  ;;  %v2785_v58 = vsel %vm35_vm0, %v2779_v46, %v5146_v1 }
  0x53   :  { %1931 = vst [vmem:[#allocation7 + $0x158] sm:$0xf] %v1929_v43  ;;  %1953 = vst [vmem:[#allocation7 + $0x15c] sm:$0xf] %v1951_v44  ;;  %v2801_v59 = vunpack.c.l.bf16 %v4632_v41  ;;  %v2823_v60 = vunpack.c.h.bf16 %v4632_v41  ;;  %3469 = vmatmul.mubr.bf16.gmra.mrb[8].mxu0 %v5738_v35  ;;  %v5078_v61 = vld [vmem:[#allocation7 + $0x188] sm:$0xff]   ;;  %v2765_v63 = vpack.c.bf16 %v5116_v29, %v2763_v57  ;;  %v2787_v0 = vpack.c.bf16 %v5116_v29, %v2785_v58 }
  0x54   :  { %v2411_v2 = vsel %vm35_vm0, %v2405_v49, %v5146_v1  ;;  %v2433_v3 = vsel %vm35_vm0, %v2427_v50, %v5146_v1  ;;  %3744 = vmatmul.mubr.bf16.gmra.mrb[8].mxu1 %v5738_v35  ;;  %4975 = vmatprep.subr.bf16.mxu0 %v5077_v54  ;;  %v1531_v6 = vsel %vm35_vm0, %v1525_v51, %v5146_v1  ;;  %v2449_v7 = vunpack.c.l.bf16 %v4616_v47  ;;  %v5079_v8 = vld [vmem:[#allocation7 + $0x148] sm:$0xff]   ;;  %v4638_v51 = vld [vmem:[%s6171_s2 + $0x210] sm:$0xff]  }
  0x55   :  { %v2413_v4 = vpack.c.bf16 %v5116_v29, %v2411_v2  ;;  %v2435_v5 = vpack.c.bf16 %v5116_v29, %v2433_v3  ;;  %4890 = vmatpush3.bf16.msra.mxu1 %v5076_v48  ;;  %4976 = vmatpush3.bf16.msra.mxu0 %v5077_v54  ;;  %2767 = vst [vmem:[#allocation7 + $0x1f0] sm:$0xf] %v2765_v63  ;;  %2789 = vst [vmem:[#allocation7 + $0x1f4] sm:$0xf] %v2787_v0  ;;  %v2471_v14 = vunpack.c.h.bf16 %v4616_v47  ;;  %v4636_v27 = vld [vmem:[%s6171_s2 + $0x208] sm:$0xff]  }
  0x56   :  { %v1533_v10 = vpack.c.bf16 %v5116_v29, %v1531_v6  ;;  %v1553_v11 = vsel %vm35_vm0, %v1547_v52, %v5146_v1  ;;  %v2807_v12 = vsel %vm35_vm0, %v2801_v59, %v5146_v1  ;;  %4891 = vmatprep.subr.bf16.mxu1 %v5078_v61  ;;  %3476 = vmatprep.mubr.bf16.mxu0 %v5754_v42  ;;  %v5083_v16 = vld [vmem:[#allocation7 + $0x190] sm:$0xff]   ;;  %v2845_v21 = vunpack.c.l.bf16 %v5764_v53  ;;  %v4610_v59 = vld [vmem:[%s6171_s2 + $0x1a0] sm:$0xff]  }
  0x57   :  { %2415 = vst [vmem:[#allocation7 + $0x1b0] sm:$0xf] %v2413_v4  ;;  %2437 = vst [vmem:[#allocation7 + $0x1b4] sm:$0xf] %v2435_v5  ;;  %v1555_v18 = vpack.c.bf16 %v5116_v29, %v1553_v11  ;;  %v2809_v19 = vpack.c.bf16 %v5116_v29, %v2807_v12  ;;  %v2829_v20 = vsel %vm35_vm0, %v2823_v60, %v5146_v1  ;;  %3751 = vmatprep.mubr.bf16.mxu1 %v5754_v42  ;;  %v4622_v52 = vld [vmem:[%s6171_s2 + $0x1d0] sm:$0xff]   ;;  %v5896_v11 = vld [vmem:[%s6171_s2 + $0x218] sm:$0xff]  }
  0x58   :  { %1535 = vst [vmem:[#allocation7 + $0x110] sm:$0xf] %v1533_v10  ;;  %v2831_v23 = vpack.c.bf16 %v5116_v29, %v2829_v20  ;;  %v2455_v24 = vsel %vm35_vm0, %v2449_v7, %v5146_v1  ;;  %v2477_v25 = vsel %vm35_vm0, %v2471_v14, %v5146_v1  ;;  %v2867_v26 = vunpack.c.h.bf16 %v5764_v53  ;;  %v5084_v34 = vld [vmem:[#allocation7 + $0x150] sm:$0xff]   ;;  %v5879_v63 = vld [vmem:[%s6169_s0 + $0x20] ss:$12 sps:$4 sm:$0xff]  }
  0x59   :  { %1557 = vst [vmem:[#allocation7 + $0x114] sm:$0xf] %v1555_v18  ;;  %2811 = vst [vmem:[#allocation7 + $0x1f8] sm:$0xf] %v2809_v19  ;;  %v2457_v28 = vpack.c.bf16 %v5116_v29, %v2455_v24  ;;  %v2479_v30 = vpack.c.bf16 %v5116_v29, %v2477_v25  ;;  %v2851_v31 = vsel %vm35_vm0, %v2845_v21, %v5146_v1  ;;  %v2493_v32 = vunpack.c.l.bf16 %v4618_v15  ;;  %v5085_v41 = vld [vmem:[#allocation7 + $0x198] sm:$0xff]   ;;  %v4642_v25 = vld [vmem:[%s6171_s2 + $0x220] sm:$0xff]  }
  0x5a   :  { %4892 = vmatpush3.bf16.msra.mxu1 %v5079_v8  ;;  %2833 = vst [vmem:[#allocation7 + $0x1fc] sm:$0xf] %v2831_v23  ;;  %v2853_v36 = vpack.c.bf16 %v5116_v29, %v2851_v31  ;;  %v2873_v37 = vsel %vm35_vm0, %v2867_v26, %v5146_v1  ;;  %v2515_v38 = vunpack.c.h.bf16 %v4618_v15  ;;  %v1569_v39 = vunpack.c.l.bf16 %v4576_v22  ;;  %v5086_v60 = vld [vmem:[#allocation7 + $0x158] sm:$0xff]   ;;  %v5873_v61 = vld [vmem:[%s6169_s0 + $0x4] ss:$12 sps:$4 sm:$0xff]  }
  0x5b   :  { %4893 = vmatprep.subr.bf16.mxu1 %v5083_v16  ;;  %2459 = vst [vmem:[#allocation7 + $0x1b8] sm:$0xf] %v2457_v28  ;;  %2481 = vst [vmem:[#allocation7 + $0x1bc] sm:$0xf] %v2479_v30  ;;  %v2875_v43 = vpack.c.bf16 %v5116_v29, %v2873_v37  ;;  %v2499_v44 = vsel %vm35_vm0, %v2493_v32, %v5146_v1  ;;  %v1591_v45 = vunpack.c.h.bf16 %v4576_v22  ;;  %v2889_v46 = vunpack.c.l.bf16 %v4636_v27  ;;  %v5901_v14 = vld [vmem:[%s6169_s0 + $0x38] ss:$12 sps:$4 sm:$0xff]  }
  0x5c   :  { %3477 = vmatmul.mubr.bf16.gmra.mrb[12].mxu0 %v5790_v9  ;;  %2855 = vst [vmem:[#allocation7 + $0x200] sm:$0xf] %v2853_v36  ;;  %v2501_v47 = vpack.c.bf16 %v5116_v29, %v2499_v44  ;;  %v2521_v48 = vsel %vm35_vm0, %v2515_v38, %v5146_v1  ;;  %v1575_v49 = vsel %vm35_vm0, %v1569_v39, %v5146_v1  ;;  %v2911_v50 = vunpack.c.h.bf16 %v4636_v27  ;;  %v5089_v5 = vld [vmem:[#allocation7 + $0x1f0] sm:$0xff]   ;;  %v4624_v24 = vld [vmem:[%s6171_s2 + $0x1d8] sm:$0xff]   ;;  %v4626_v38 = vld [vmem:[%s6171_s2 + $0x1e0] sm:$0xff]  }
  0x5d   :  { %3752 = vmatmul.mubr.bf16.gmra.mrb[12].mxu1 %v5790_v9  ;;  %4977 = vmatprep.mubr.msk.bf16.mxu0 %vm3407_vm1, %v5806_v17  ;;  %2877 = vst [vmem:[#allocation7 + $0x204] sm:$0xf] %v2875_v43  ;;  %v2523_v53 = vpack.c.bf16 %v5116_v29, %v2521_v48  ;;  %v1577_v54 = vpack.c.bf16 %v5116_v29, %v1575_v49  ;;  %v2537_v58 = vunpack.c.l.bf16 %v4620_v33  ;;  %v2559_v4 = vunpack.c.h.bf16 %v4620_v33  ;;  %v5949_v49 = vld [vmem:[%s6171_s2 + $0x1a8] sm:$0xff]  }
  0x5e   :  { %v1597_v57 = vsel %vm35_vm0, %v1591_v45, %v5146_v1  ;;  %4894 = vmatpush3.bf16.msra.mxu1 %v5084_v34  ;;  %4010 = vmatprep.mubr.bf16.mxu1 %v5873_v61  ;;  %2503 = vst [vmem:[#allocation7 + $0x1c0] sm:$0xf] %v2501_v47  ;;  %v2895_v2 = vsel %vm35_vm0, %v2889_v46, %v5146_v1  ;;  %v2933_v10 = vunpack.c.l.bf16 %v4638_v51  ;;  %v2955_v18 = vunpack.c.h.bf16 %v4638_v51  ;;  %v5090_v26 = vld [vmem:[#allocation7 + $0x1b0] sm:$0xff]  }
  0x5f   :  { %v1599_v0 = vpack.c.bf16 %v5116_v29, %v1597_v57  ;;  %v2917_v3 = vsel %vm35_vm0, %v2911_v50, %v5146_v1  ;;  %4895 = vmatprep.subr.bf16.mxu1 %v5085_v41  ;;  %2525 = vst [vmem:[#allocation7 + $0x1c4] sm:$0xf] %v2523_v53  ;;  %1579 = vst [vmem:[#allocation7 + $0x118] sm:$0xf] %v1577_v54  ;;  %v2897_v6 = vpack.c.bf16 %v5116_v29, %v2895_v2 }
  0x60   :  { %v2919_v7 = vpack.c.bf16 %v5116_v29, %v2917_v3  ;;  %v2543_v8 = vsel %vm35_vm0, %v2537_v58, %v5146_v1  ;;  %v5091_v12 = vld [vmem:[#allocation7 + $0x110] sm:$0xff]   ;;  %v2565_v16 = vsel %vm35_vm0, %v2559_v4, %v5146_v1  ;;  %v2581_v19 = vunpack.c.l.bf16 %v4622_v52 }
  0x61   :  { %1601 = vst [vmem:[#allocation7 + $0x11c] sm:$0xf] %v1599_v0  ;;  %v2545_v15 = vpack.c.bf16 %v5116_v29, %v2543_v8  ;;  %2899 = vst [vmem:[#allocation7 + $0x208] sm:$0xf] %v2897_v6  ;;  %v2567_v20 = vpack.c.bf16 %v5116_v29, %v2565_v16  ;;  %v2939_v21 = vsel %vm35_vm0, %v2933_v10, %v5146_v1  ;;  %v2603_v22 = vunpack.c.h.bf16 %v4622_v52  ;;  %v5092_v32 = vld [vmem:[#allocation7 + $0x1f8] sm:$0xff]   ;;  %v4644_v6 = vld [vmem:[%s6171_s2 + $0x228] sm:$0xff]  }
  0x62   :  { %2921 = vst [vmem:[#allocation7 + $0x20c] sm:$0xf] %v2919_v7  ;;  %v2317_v23 = vunpack.c.l.bf16 %v4610_v59  ;;  %4896 = vmatpush3.bf16.msra.mxu1 %v5086_v60  ;;  %4985 = vmatprep.subr.bf16.mxu0 %v5091_v12  ;;  %v2941_v27 = vpack.c.bf16 %v5116_v29, %v2939_v21  ;;  %v2961_v28 = vsel %vm35_vm0, %v2955_v18, %v5146_v1  ;;  %v2339_v31 = vunpack.c.h.bf16 %v4610_v59  ;;  %v5093_v50 = vld [vmem:[#allocation7 + $0x1b8] sm:$0xff]  }
  0x63   :  { %2547 = vst [vmem:[#allocation7 + $0x1c8] sm:$0xf] %v2545_v15  ;;  %v2587_v30 = vsel %vm35_vm0, %v2581_v19, %v5146_v1  ;;  %4927 = vmatprep.subr.bf16.mxu1 %v5089_v5  ;;  %2569 = vst [vmem:[#allocation7 + $0x1cc] sm:$0xf] %v2567_v20  ;;  %v2963_v33 = vpack.c.bf16 %v5116_v29, %v2961_v28  ;;  %v2609_v36 = vsel %vm35_vm0, %v2603_v22, %v5146_v1  ;;  %v4646_v15 = vld [vmem:[%s6171_s2 + $0x230] sm:$0xff]  }
  0x64   :  { %v2589_v34 = vpack.c.bf16 %v5116_v29, %v2587_v30  ;;  %v2323_v37 = vsel %vm35_vm0, %v2317_v23, %v5146_v1  ;;  %4978 = vmatmul.mubr.msk.bf16.vlgmr.msra.gmra.mrb[16].mxu0 %vm3407_vm1, %v5879_v63  ;;  %2943 = vst [vmem:[#allocation7 + $0x210] sm:$0xf] %v2941_v27  ;;  %v2611_v39 = vpack.c.bf16 %v5116_v29, %v2609_v36  ;;  %v2977_v44 = vunpack.c.l.bf16 %v5896_v11  ;;  %v5096_v57 = vld [vmem:[#allocation7 + $0x200] sm:$0xff]   ;;  %v4648_v27 = vld [vmem:[%s6171_s2 + $0x238] sm:$0xff]  }
  0x65   :  { %v2325_v41 = vpack.c.bf16 %v5116_v29, %v2323_v37  ;;  %v2345_v43 = vsel %vm35_vm0, %v2339_v31, %v5146_v1  ;;  %4011 = vmatmul.mubr.bf16.vlgmr.msra.gmra.mrb[16].mxu1 %v5574_v55  ;;  %4986 = vmatpush3.bf16.msra.mxu0 %v5091_v12  ;;  %2965 = vst [vmem:[#allocation7 + $0x214] sm:$0xf] %v2963_v33  ;;  %v2999_v46 = vunpack.c.h.bf16 %v5896_v11  ;;  %v2625_v47 = vunpack.c.l.bf16 %v4624_v24  ;;  %v5956_v55 = vld [vmem:[%s6169_s0 + $0x50] ss:$12 sps:$4 sm:$0xff]   ;;  %v4628_v12 = vld [vmem:[%s6171_s2 + $0x1e8] sm:$0xff]  }
  0x66   :  { %2591 = vst [vmem:[#allocation7 + $0x1d0] sm:$0xf] %v2589_v34  ;;  %v2347_v45 = vpack.c.bf16 %v5116_v29, %v2345_v43  ;;  %v2647_v48 = vunpack.c.h.bf16 %v4624_v24  ;;  %4928 = vmatpush3.bf16.msra.mxu1 %v5090_v26  ;;  %4981 = vmatprep.mubr.msk.bf16.mxu0 %vm3407_vm1, %v5901_v14  ;;  %2613 = vst [vmem:[#allocation7 + $0x1d4] sm:$0xf] %v2611_v39  ;;  %v2983_v51 = vsel %vm35_vm0, %v2977_v44, %v5146_v1  ;;  %v5097_v16 = vld [vmem:[#allocation7 + $0x1c0] sm:$0xff]  }
  0x67   :  { %2327 = vst [vmem:[#allocation7 + $0x1a0] sm:$0xf] %v2325_v41  ;;  %v3021_v52 = vunpack.c.l.bf16 %v4642_v25  ;;  %v3043_v53 = vunpack.c.h.bf16 %v4642_v25  ;;  %v2669_v54 = vunpack.c.l.bf16 %v4626_v38  ;;  %4929 = vmatprep.subr.bf16.mxu1 %v5092_v32  ;;  %4018 = vmatprep.mubr.bf16.mxu1 %v5590_v62  ;;  %v2985_v59 = vpack.c.bf16 %v5116_v29, %v2983_v51 }
  0x68   :  { %v5098_v58 = vld [vmem:[#allocation7 + $0x118] sm:$0xff]   ;;  %2349 = vst [vmem:[#allocation7 + $0x1a4] sm:$0xf] %v2347_v45  ;;  %v3005_v60 = vsel %vm35_vm0, %v2999_v46, %v5146_v1  ;;  %v2631_v0 = vsel %vm35_vm0, %v2625_v47, %v5146_v1  ;;  %v2691_v2 = vunpack.c.h.bf16 %v4626_v38  ;;  %v2653_v62 = vsel %vm35_vm0, %v2647_v48, %v5146_v1 }
  0x69   :  { %v3007_v3 = vpack.c.bf16 %v5116_v29, %v3005_v60  ;;  %v2633_v4 = vpack.c.bf16 %v5116_v29, %v2631_v0  ;;  %v3027_v5 = vsel %vm35_vm0, %v3021_v52, %v5146_v1  ;;  %4987 = vmatprep.subr.bf16.mxu0 %v5098_v58  ;;  %2987 = vst [vmem:[#allocation7 + $0x218] sm:$0xf] %v2985_v59  ;;  %v2361_v21 = vunpack.c.l.bf16 %v5949_v49  ;;  %v5099_v22 = vld [vmem:[#allocation7 + $0x208] sm:$0xff]   ;;  %v4401_v60 = vld [vmem:[%s6170_s1 + $0x10] sm:$0xff] }
  0x6a   :  { %v2655_v7 = vpack.c.bf16 %v5116_v29, %v2653_v62  ;;  %v3029_v8 = vpack.c.bf16 %v5116_v29, %v3027_v5  ;;  %v3049_v10 = vsel %vm35_vm0, %v3043_v53, %v5146_v1  ;;  %v2675_v11 = vsel %vm35_vm0, %v2669_v54, %v5146_v1  ;;  %4930 = vmatpush3.bf16.msra.mxu1 %v5093_v50  ;;  %v5100_v38 = vld [vmem:[#allocation7 + $0x1c8] sm:$0xff]  }
  0x6b   :  { %4988 = vmatpush3.bf16.msra.mxu0 %v5098_v58  ;;  %3009 = vst [vmem:[#allocation7 + $0x21c] sm:$0xf] %v3007_v3  ;;  %2635 = vst [vmem:[#allocation7 + $0x1d8] sm:$0xf] %v2633_v4  ;;  %v3051_v18 = vpack.c.bf16 %v5116_v29, %v3049_v10  ;;  %v2677_v19 = vpack.c.bf16 %v5116_v29, %v2675_v11  ;;  %v2697_v20 = vsel %vm35_vm0, %v2691_v2, %v5146_v1  ;;  %v5117_v3 = vmov 0  }
  0x6c   :  { %4931 = vmatprep.subr.bf16.mxu1 %v5096_v57  ;;  %2657 = vst [vmem:[#allocation7 + $0x1dc] sm:$0xf] %v2655_v7  ;;  %3031 = vst [vmem:[#allocation7 + $0x220] sm:$0xf] %v3029_v8  ;;  %v2699_v23 = vpack.c.bf16 %v5116_v29, %v2697_v20  ;;  %v2383_v24 = vunpack.c.h.bf16 %v5949_v49  ;;  %v3065_v25 = vunpack.c.l.bf16 %v4644_v6  ;;  %v3087_v26 = vunpack.c.h.bf16 %v4644_v6  ;;  %4982 = vmatmul.mubr.msk.bf16.gmra.mrb[20].mxu0 %vm3407_vm1, %v5956_v55  ;;  %v5101_v46 = vld [vmem:[#allocation7 + $0x210] sm:$0xff]   ;;  %v4399_v6 = vld [vmem:[%s6170_s1] sm:$0xff] }
  0x6d   :  { %3053 = vst [vmem:[#allocation7 + $0x224] sm:$0xf] %v3051_v18  ;;  %2679 = vst [vmem:[#allocation7 + $0x1e0] sm:$0xf] %v2677_v19  ;;  %v2367_v28 = vsel %vm35_vm0, %v2361_v21, %v5146_v1  ;;  %v2713_v30 = vunpack.c.l.bf16 %v4628_v12  ;;  %v2735_v31 = vunpack.c.h.bf16 %v4628_v12  ;;  %v3109_v32 = vunpack.c.l.bf16 %v4646_v15  ;;  %4019 = vmatmul.mubr.bf16.gmra.mrb[20].mxu1 %v5650_v40  ;;  %4989 = vmatprep.mubr.msk.bf16.mxu0 %vm3407_vm1, %v5806_v17  ;;  %v5102_v0 = vld [vmem:[#allocation7 + $0x1d0] sm:$0xff]   ;;  %v4400_v12 = vld [vmem:[%s6170_s1 + $0x8] sm:$0xff] }
  0x6e   :  { %2701 = vst [vmem:[#allocation7 + $0x1e4] sm:$0xf] %v2699_v23  ;;  %v2369_v33 = vpack.c.bf16 %v5116_v29, %v2367_v28  ;;  %v2389_v34 = vsel %vm35_vm0, %v2383_v24, %v5146_v1  ;;  %v3071_v36 = vsel %vm35_vm0, %v3065_v25, %v5146_v1  ;;  %v3131_v37 = vunpack.c.h.bf16 %v4646_v15  ;;  %4932 = vmatpush3.bf16.msra.mxu1 %v5097_v16  ;;  %v4404_v15 = vld [vmem:[%s6170_s1 + $0x28] sm:$0xff]  ;;  %v4403_v18 = vld [vmem:[%s6170_s1 + $0x20] sm:$0xff]  ;;  %v4406_v19 = vld [vmem:[%s6170_s1 + $0x38] sm:$0xff] }
  0x6f   :  { %4026 = vmatprep.mubr.bf16.mxu1 %v5667_v56  ;;  %v5103_v39 = vld [vmem:[#allocation7 + $0x1a0] sm:$0xff]   ;;  %v2391_v41 = vpack.c.bf16 %v5116_v29, %v2389_v34  ;;  %v3073_v43 = vpack.c.bf16 %v5116_v29, %v3071_v36  ;;  %v3093_v44 = vsel %vm35_vm0, %v3087_v26, %v5146_v1  ;;  %v3153_v45 = vunpack.c.l.bf16 %v4648_v27  ;;  %4933 = vmatprep.subr.bf16.mxu1 %v5099_v22  ;;  %v5115_v22 = vld [vmem:[%s6169_s0 + $0x1c] ss:$12 sps:$4 sm:$0xff]  }
  0x70   :  { %2371 = vst [vmem:[#allocation7 + $0x1a8] sm:$0xf] %v2369_v33  ;;  %v3095_v47 = vpack.c.bf16 %v5116_v29, %v3093_v44  ;;  %v2719_v48 = vsel %vm35_vm0, %v2713_v30, %v5146_v1  ;;  %v2741_v49 = vsel %vm35_vm0, %v2735_v31, %v5146_v1  ;;  %v3115_v50 = vsel %vm35_vm0, %v3109_v32, %v5146_v1  ;;  %v5114_v21 = vld [vmem:[%s6169_s0] ss:$12 sps:$4 sm:$0xff]  }
  0x71   :  { %4997 = vmatprep.subr.bf16.mxu0 %v5103_v39  ;;  %2393 = vst [vmem:[#allocation7 + $0x1ac] sm:$0xf] %v2391_v41  ;;  %3075 = vst [vmem:[#allocation7 + $0x228] sm:$0xf] %v3073_v43  ;;  %v2721_v51 = vpack.c.bf16 %v5116_v29, %v2719_v48  ;;  %v2743_v52 = vpack.c.bf16 %v5116_v29, %v2741_v49  ;;  %v3117_v53 = vpack.c.bf16 %v5116_v29, %v3115_v50 }
  0x72   :  { %v3137_v54 = vsel %vm35_vm0, %v3131_v37, %v5146_v1  ;;  %3097 = vst [vmem:[#allocation7 + $0x22c] sm:$0xf] %v3095_v47  ;;  %v3159_v58 = vsel %vm35_vm0, %v3153_v45, %v5146_v1  ;;  %v3175_v59 = vunpack.c.h.bf16 %v4648_v27  ;;  %4934 = vmatpush3.bf16.msra.mxu1 %v5100_v38  ;;  %5024 = vset.pattern.permute.xlu1 %v5117_v3  ;;  %v5104_v4 = vld [vmem:[#allocation7 + $0x218] sm:$0xff]  }
  0x73   :  { %v3139_v57 = vpack.c.bf16 %v5116_v29, %v3137_v54  ;;  %2723 = vst [vmem:[#allocation7 + $0x1e8] sm:$0xf] %v2721_v51  ;;  %2745 = vst [vmem:[#allocation7 + $0x1ec] sm:$0xf] %v2743_v52  ;;  %v3161_v2 = vpack.c.bf16 %v5116_v29, %v3159_v58  ;;  %4935 = vmatprep.subr.bf16.mxu1 %v5101_v46  ;;  %5023 = vset.pattern.permute.xlu0 %v5117_v3 }
  0x74   :  { %3119 = vst [vmem:[#allocation7 + $0x230] sm:$0xf] %v3117_v53  ;;  %v3181_v62 = vsel %vm35_vm0, %v3175_v59, %v5146_v1  ;;  %4990 = vmatmul.mubr.msk.bf16.vlgmr.msra.gmra.mrb[24].mxu0 %vm3407_vm1, %v5879_v63  ;;  %4419 = vperm.xlu1 %5024, %v4401_v60   ;;  %v5105_v1 = vld [vmem:[#allocation7 + $0x1d8] sm:$0xff]   ;;  %v5106_v7 = vld [vmem:[#allocation7 + $0x220] sm:$0xff]  }
  0x75   :  { %3141 = vst [vmem:[#allocation7 + $0x234] sm:$0xf] %v3139_v57  ;;  %3163 = vst [vmem:[#allocation7 + $0x238] sm:$0xf] %v3161_v2  ;;  %v3183_v5 = vpack.c.bf16 %v5116_v29, %v3181_v62  ;;  %4027 = vmatmul.mubr.bf16.gmra.mrb[24].mxu1 %v5738_v35  ;;  %4998 = vmatpush3.bf16.msra.mxu0 %v5103_v39  ;;  %v5107_v8 = vld [vmem:[#allocation7 + $0x1e0] sm:$0xff]  }
  0x76   :  { %4936 = vmatpush3.bf16.msra.mxu1 %v5102_v0  ;;  %4993 = vmatprep.mubr.msk.bf16.mxu0 %vm3407_vm1, %v5901_v14 }
  0x77   :  { %3185 = vst [vmem:[#allocation7 + $0x23c] sm:$0xf] %v3183_v5  ;;  %4937 = vmatprep.subr.bf16.mxu1 %v5104_v4  ;;  %4034 = vmatprep.mubr.bf16.mxu1 %v5754_v42 }
  0x78   :  { %v5108_v29 = vld [vmem:[#allocation7 + $0x1a8] sm:$0xff]   ;;  %4409 = vperm.xlu0 %5023, %v4399_v6   ;;  %4424 = vperm.xlu1 %5024, %v4402_v13  }
  0x79   :  { %4999 = vmatprep.subr.bf16.mxu0 %v5108_v29  ;;  %v5109_v11 = vld [vmem:[#allocation7 + $0x228] sm:$0xff]  }
  0x7a   :  { %4938 = vmatpush3.bf16.msra.mxu1 %v5105_v1  ;;  %5000 = vmatpush3.bf16.msra.mxu0 %v5108_v29  ;;  %v5110_v16 = vld [vmem:[#allocation7 + $0x1e8] sm:$0xff]  }
  0x7b   :  { %4939 = vmatprep.subr.bf16.mxu1 %v5106_v7 }
  0x7c   :  { %v5111_v10 = vld [vmem:[#allocation7 + $0x230] sm:$0xff]   ;;  %4994 = vmatmul.mubr.msk.bf16.gmra.mrb[28].mxu0 %vm3407_vm1, %v5956_v55  ;;  %4414 = vperm.xlu0 %5023, %v4400_v12  }
  0x7d   :  { %5009 = vmatprep.subr.bf16.mxu0 %v5111_v10  ;;  %4035 = vmatmul.mubr.bf16.gmra.mrb[28].mxu1 %v5790_v9 }
  0x7e   :  { %5001 = vmatprep.mubr.msk.bf16.mxu0 %vm3407_vm1, %v5806_v17  ;;  %4940 = vmatpush3.bf16.msra.mxu1 %v5107_v8  ;;  %v5112_v20 = vld [vmem:[#allocation7 + $0x238] sm:$0xff]  }
  0x7f   :  { %4293 = vmatprep.mubr.bf16.mxu1 %v5873_v61  ;;  %4941 = vmatprep.subr.bf16.mxu1 %v5109_v11  ;;  %v4405_v61 = vld [vmem:[%s6170_s1 + $0x30] sm:$0xff] }
  0x80   :  { %4434 = vperm.xlu1 %5024, %v4404_v15   ;;  %4429 = vperm.xlu0 %5023, %v4403_v18  }
  0x82   :  { %4942 = vmatpush3.bf16.msra.mxu1 %v5110_v16 }
  0x84   :  { %5002 = vmatmul.mubr.msk.bf16.vlgmr.msra.gmra.mrb[32].mxu0 %vm3407_vm1, %v5879_v63  ;;  %4444 = vperm.xlu1 %5024, %v4406_v19  }
  0x85   :  { %4294 = vmatmul.mubr.bf16.vlgmr.msra.gmra.mrb[32].mxu1 %v5114_v21  ;;  %5010 = vmatpush3.bf16.msra.mxu0 %v5111_v10 }
  0x86   :  { %5005 = vmatprep.mubr.msk.bf16.mxu0 %vm3407_vm1, %v5901_v14  ;;  %4301 = vmatprep.mubr.bf16.mxu1 %v5115_v22 }
  0x87   :  { %5011 = vmatprep.subr.bf16.mxu0 %v5112_v20  ;;  %4439 = vperm.xlu0 %5023, %v4405_v61  }
  0x89   :  { %5012 = vmatpush3.bf16.msra.mxu0 %v5112_v20 }
  0x8c   :  { %5006 = vmatmul.mubr.msk.bf16.gmra.mrb[36].mxu0 %vm3407_vm1, %v5956_v55 }
  0x8d   :  { %4302 = vmatmul.mubr.bf16.gmra.mrb[36].mxu1 %v5650_v40  ;;  %5013 = vmatprep.mubr.msk.bf16.mxu0 %vm3407_vm1, %v5806_v17 }
  0x8e   :  { %4309 = vmatprep.mubr.bf16.mxu1 %v5667_v56 }
  0x94   :  { %5014 = vmatmul.mubr.msk.bf16.vlgmr.msra.gmra.mrb[40].mxu0 %vm3407_vm1, %v5879_v63 }
  0x95   :  { %4310 = vmatmul.mubr.bf16.gmra.mrb[40].mxu1 %v5738_v35  ;;  %5017 = vmatprep.mubr.msk.bf16.mxu0 %vm3407_vm1, %v5901_v14 }
  0x96   :  { %4317 = vmatprep.mubr.bf16.mxu1 %v5754_v42 }
  0x9c   :  { %5018 = vmatmul.mubr.msk.bf16.gmra.mrb[44].mxu0 %vm3407_vm1, %v5956_v55 }
  0x9d   :  { %4318 = vmatmul.mubr.bf16.gmra.mrb[44].mxu1 %v5790_v9 }
 0x115   :  { %v4805_v40 = vpop.f32.mrb[0].mxu0 }
 0x116   :  { %v4806_v17 = vpop.f32.mrb[1].mxu0 }
 0x117   :  { %v4851_v23 = vpop.f32.mrb[0].mxu1  ;;  %v4807_v24 = vadd.f32 %v4806_v17, %v4805_v40  ;;  %v4808_v25 = vpop.f32.mrb[2].mxu0 }
 0x118   :  { %v4852_v56 = vpop.f32.mrb[1].mxu1  ;;  %v4809_v35 = vpop.f32.mrb[3].mxu0 }
 0x119   :  { %v6112_v26 = vadd.f32 %v4852_v56, %v4851_v23  ;;  %v4854_v63 = vpop.f32.mrb[2].mxu1  ;;  %v4810_v27 = vadd.f32 %v4809_v35, %v4808_v25 }
 0x11a   :  { %v4855_v28 = vpop.f32.mrb[3].mxu1 }
 0x11b   :  { %v6114_v14 = vadd.f32 %v4855_v28, %v4854_v63 }
 0x11e   :  { %v4811_v42 = vpop.f32.mrb[4].mxu0 }
 0x11f   :  { %v4857_v30 = vpop.f32.mrb[4].mxu1  ;;  %v4812_v31 = vpop.f32.mrb[5].mxu0 }
 0x120   :  { %v4813_v55 = vadd.f32 %v4812_v31, %v4811_v42  ;;  %v4858_v32 = vpop.f32.mrb[5].mxu1  ;;  %v4814_v9 = vpop.f32.mrb[6].mxu0 }
 0x121   :  { %v4859_v33 = vadd.f32 %v4858_v32, %v4857_v30  ;;  %v4860_v34 = vpop.f32.mrb[6].mxu1  ;;  %v4815_v36 = vpop.f32.mrb[7].mxu0 }
 0x122   :  { %v4816_v37 = vadd.f32 %v4815_v36, %v4814_v9  ;;  %v4861_v38 = vpop.f32.mrb[7].mxu1 }
 0x123   :  { %v4862_v39 = vadd.f32 %v4861_v38, %v4860_v34 }
 0x126   :  { %v4817_v41 = vpop.f32.mrb[8].mxu0 }
 0x127   :  { %v4863_v43 = vpop.f32.mrb[8].mxu1  ;;  %v4818_v44 = vpop.f32.mrb[9].mxu0 }
 0x128   :  { %v4819_v45 = vadd.f32 %v4818_v44, %v4817_v41  ;;  %v4864_v46 = vpop.f32.mrb[9].mxu1  ;;  %v4820_v47 = vpop.f32.mrb[10].mxu0 }
 0x129   :  { %v6116_v48 = vadd.f32 %v4864_v46, %v4863_v43  ;;  %v4866_v49 = vpop.f32.mrb[10].mxu1  ;;  %v4821_v50 = vpop.f32.mrb[11].mxu0 }
 0x12a   :  { %v4822_v51 = vadd.f32 %v4821_v50, %v4820_v47  ;;  %v4867_v52 = vpop.f32.mrb[11].mxu1 }
 0x12b   :  { %v6118_v53 = vadd.f32 %v4867_v52, %v4866_v49 }
 0x12f   :  { %v4823_v54 = vpop.f32.mrb[12].mxu0 }
 0x130   :  { %v4869_v57 = vpop.f32.mrb[12].mxu1  ;;  %v4824_v58 = vpop.f32.mrb[13].mxu0 }
 0x131   :  { %v4825_v59 = vadd.f32 %v4824_v58, %v4823_v54  ;;  %v4870_v60 = vpop.f32.mrb[13].mxu1  ;;  %v4826_v0 = vpop.f32.mrb[14].mxu0 }
 0x132   :  { %v4871_v2 = vadd.f32 %v4870_v60, %v4869_v57  ;;  %v4872_v3 = vpop.f32.mrb[14].mxu1  ;;  %v4827_v4 = vpop.f32.mrb[15].mxu0 }
 0x133   :  { %v4828_v62 = vadd.f32 %v4827_v4, %v4826_v0  ;;  %v4873_v5 = vpop.f32.mrb[15].mxu1 }
 0x134   :  { %v4874_v6 = vadd.f32 %v4873_v5, %v4872_v3 }
 0x137   :  { %v4979_v13 = vpop.f32.mrb[16].mxu0 }
 0x138   :  { %v6120_v1 = vadd.f32 %v4979_v13, %v4813_v55  ;;  %v4897_v7 = vpop.f32.mrb[16].mxu1  ;;  %v3519_v29 = vpop.f32.mrb[17].mxu0 }
 0x139   :  { %v6122_v8 = vadd.f32 %v4807_v24, %v3519_v29  ;;  %v4898_v10 = vpop.f32.mrb[17].mxu1  ;;  %v4980_v11 = vpop.f32.mrb[18].mxu0 }
 0x13a   :  { %v4899_v12 = vadd.f32 %v4898_v10, %v4897_v7  ;;  %v6124_v15 = vadd.f32 %v4980_v11, %v4816_v37  ;;  %v4900_v16 = vpop.f32.mrb[18].mxu1  ;;  %v3522_v18 = vpop.f32.mrb[19].mxu0 }
 0x13b   :  { %v6126_v19 = vadd.f32 %v4810_v27, %v3522_v18  ;;  %v4901_v20 = vpop.f32.mrb[19].mxu1 }
 0x13c   :  { %v6128_v61 = vadd.f32 %v4901_v20, %v4900_v16 }
 0x13f   :  { %v4983_v21 = vpop.f32.mrb[20].mxu0 }
 0x140   :  { %v6130_v22 = vadd.f32 %v4983_v21, %v4825_v59  ;;  %v4903_v40 = vpop.f32.mrb[20].mxu1  ;;  %v3535_v23 = vpop.f32.mrb[21].mxu0 }
 0x141   :  { %v6132_v17 = vadd.f32 %v4819_v45, %v3535_v23  ;;  %v4904_v24 = vpop.f32.mrb[21].mxu1  ;;  %v4984_v56 = vpop.f32.mrb[22].mxu0 }
 0x142   :  { %v4905_v25 = vadd.f32 %v4904_v24, %v4903_v40  ;;  %v6134_v63 = vadd.f32 %v4984_v56, %v4828_v62  ;;  %v4906_v35 = vpop.f32.mrb[22].mxu1  ;;  %v3538_v28 = vpop.f32.mrb[23].mxu0 }
 0x143   :  { %v6136_v42 = vadd.f32 %v4822_v51, %v3538_v28  ;;  %v4907_v27 = vpop.f32.mrb[23].mxu1 }
 0x144   :  { %v4908_v30 = vadd.f32 %v4907_v27, %v4906_v35 }
 0x147   :  { %v4991_v31 = vpop.f32.mrb[24].mxu0 }
 0x148   :  { %v3803_v55 = vadd.f32 %v4991_v31, %v4859_v33  ;;  %v4909_v32 = vpop.f32.mrb[24].mxu1  ;;  %v3794_v9 = vpop.f32.mrb[25].mxu0 }
 0x149   :  { %v3795_v34 = vadd.f32 %v6112_v26, %v3794_v9  ;;  %v4910_v36 = vpop.f32.mrb[25].mxu1  ;;  %v4992_v37 = vpop.f32.mrb[26].mxu0 }
 0x14a   :  { %v3827_v38 = vmax.f32 %v6120_v1, %v3803_v55  ;;  %v4911_v41 = vadd.f32 %v4910_v36, %v4909_v32  ;;  %v3806_v43 = vadd.f32 %v4992_v37, %v4862_v39  ;;  %v4912_v44 = vpop.f32.mrb[26].mxu1  ;;  %v3797_v45 = vpop.f32.mrb[27].mxu0 }
 0x14b   :  { %v3825_v46 = vmax.f32 %v6122_v8, %v3795_v34  ;;  %v3798_v47 = vadd.f32 %v6114_v14, %v3797_v45  ;;  %v4913_v49 = vpop.f32.mrb[27].mxu1 }
 0x14c   :  { %v3828_v50 = vmax.f32 %v6124_v15, %v3806_v43  ;;  %v4914_v33 = vadd.f32 %v4913_v49, %v4912_v44  ;;  %v4420_v44 = vpop.permute.xlu1 %4419 }
 0x14d   :  { %v3826_v51 = vmax.f32 %v6126_v19, %v3798_v47 }
 0x14f   :  { %v4995_v52 = vpop.f32.mrb[28].mxu0 }
 0x150   :  { %v3819_v26 = vadd.f32 %v4995_v52, %v4871_v2  ;;  %v4915_v54 = vpop.f32.mrb[28].mxu1  ;;  %v3810_v57 = vpop.f32.mrb[29].mxu0 }
 0x151   :  { %v3811_v58 = vadd.f32 %v6116_v48, %v3810_v57  ;;  %v4916_v59 = vpop.f32.mrb[29].mxu1  ;;  %v4996_v39 = vpop.f32.mrb[30].mxu0 }
 0x152   :  { %v3831_v60 = vmax.f32 %v6130_v22, %v3819_v26  ;;  %v4917_v0 = vadd.f32 %v4916_v59, %v4915_v54  ;;  %v3822_v3 = vadd.f32 %v4996_v39, %v4874_v6  ;;  %v4918_v4 = vpop.f32.mrb[30].mxu1  ;;  %v3813_v14 = vpop.f32.mrb[31].mxu0 }
 0x153   :  { %v3829_v62 = vmax.f32 %v6132_v17, %v3811_v58  ;;  %v3814_v5 = vadd.f32 %v6118_v53, %v3813_v14  ;;  %v4919_v13 = vpop.f32.mrb[31].mxu1  ;;  %v4425_v14 = vpop.permute.xlu1 %4424 }
 0x154   :  { %v3832_v1 = vmax.f32 %v6134_v63, %v3822_v3  ;;  %v4920_v2 = vadd.f32 %v4919_v13, %v4918_v4  ;;  %v4410_v63 = vpop.permute.xlu0 %4409 }
 0x155   :  { %v3830_v7 = vmax.f32 %v6136_v42, %v3814_v5 }
 0x157   :  { %v5003_v29 = vpop.f32.mrb[32].mxu0 }
 0x158   :  { %v4086_v48 = vadd.f32 %v5003_v29, %v4905_v25  ;;  %v4943_v8 = vpop.f32.mrb[32].mxu1  ;;  %v4077_v10 = vpop.f32.mrb[33].mxu0 }
 0x159   :  { %v4078_v11 = vadd.f32 %v4899_v12, %v4077_v10  ;;  %v4944_v15 = vpop.f32.mrb[33].mxu1  ;;  %v5004_v16 = vpop.f32.mrb[34].mxu0 }
 0x15a   :  { %v4110_v6 = vmax.f32 %v3827_v38, %v4086_v48  ;;  %v4945_v18 = vadd.f32 %v4944_v15, %v4943_v8  ;;  %v4089_v19 = vadd.f32 %v5004_v16, %v4908_v30  ;;  %v4946_v20 = vpop.f32.mrb[34].mxu1  ;;  %v4080_v21 = vpop.f32.mrb[35].mxu0 }
 0x15b   :  { %v4108_v22 = vmax.f32 %v3825_v46, %v4078_v11  ;;  %v4081_v53 = vadd.f32 %v6128_v61, %v4080_v21  ;;  %v4947_v40 = vpop.f32.mrb[35].mxu1  ;;  %v4415_v45 = vpop.permute.xlu0 %4414 }
 0x15c   :  { %v4111_v23 = vmax.f32 %v3828_v50, %v4089_v19  ;;  %v4948_v17 = vadd.f32 %v4947_v40, %v4946_v20 }
 0x15d   :  { %v4109_v24 = vmax.f32 %v3826_v51, %v4081_v53  ;;  %v4435_v53 = vpop.permute.xlu1 %4434 }
 0x15f   :  { %v5007_v56 = vpop.f32.mrb[36].mxu0 }
 0x160   :  { %v4102_v25 = vadd.f32 %v5007_v56, %v4917_v0  ;;  %v4949_v35 = vpop.f32.mrb[36].mxu1  ;;  %v4093_v28 = vpop.f32.mrb[37].mxu0 }
 0x161   :  { %v4094_v12 = vadd.f32 %v4911_v41, %v4093_v28  ;;  %v4950_v42 = vpop.f32.mrb[37].mxu1  ;;  %v5008_v27 = vpop.f32.mrb[38].mxu0 }
 0x162   :  { %v6151_v31 = vmax.f32 %v3831_v60, %v4102_v25  ;;  %v4951_v30 = vadd.f32 %v4950_v42, %v4949_v35  ;;  %v4105_v55 = vadd.f32 %v5008_v27, %v4920_v2  ;;  %v4952_v32 = vpop.f32.mrb[38].mxu1  ;;  %v4096_v9 = vpop.f32.mrb[39].mxu0 }
 0x163   :  { %v4112_v34 = vmax.f32 %v3829_v62, %v4094_v12  ;;  %v4097_v61 = vadd.f32 %v4914_v33, %v4096_v9  ;;  %v4953_v36 = vpop.f32.mrb[39].mxu1 }
 0x164   :  { %v6153_v37 = vmax.f32 %v3832_v1, %v4105_v55  ;;  %v4954_v38 = vadd.f32 %v4953_v36, %v4952_v32  ;;  %v4430_v1 = vpop.permute.xlu0 %4429  ;;  %v4445_v32 = vpop.permute.xlu1 %4444 }
 0x165   :  { %v4113_v43 = vmax.f32 %v3830_v7, %v4097_v61 }
 0x167   :  { %v5015_v46 = vpop.f32.mrb[40].mxu0 }
 0x168   :  { %v4955_v47 = vpop.f32.mrb[40].mxu1  ;;  %v4369_v41 = vadd.f32 %v5015_v46, %v4951_v30  ;;  %v4360_v49 = vpop.f32.mrb[41].mxu0 }
 0x169   :  { %v4956_v50 = vpop.f32.mrb[41].mxu1  ;;  %v4361_v51 = vadd.f32 %v4945_v18, %v4360_v49  ;;  %v5016_v52 = vpop.f32.mrb[42].mxu0 }
 0x16a   :  { %v4393_v26 = vmax.f32 %v4110_v6, %v4369_v41  ;;  %v4957_v54 = vadd.f32 %v4956_v50, %v4955_v47  ;;  %v4958_v57 = vpop.f32.mrb[42].mxu1  ;;  %v4372_v58 = vadd.f32 %v5016_v52, %v4954_v38  ;;  %v4363_v59 = vpop.f32.mrb[43].mxu0 }
 0x16b   :  { %v4391_v33 = vmax.f32 %v4108_v22, %v4361_v51  ;;  %v4959_v39 = vpop.f32.mrb[43].mxu1  ;;  %v4364_v60 = vadd.f32 %v4948_v17, %v4363_v59  ;;  %v4440_v42 = vpop.permute.xlu0 %4439 }
 0x16c   :  { %v4449_v0 = vadd.f32 %v4420_v44, %v4393_v26  ;;  %v4394_v3 = vmax.f32 %v4111_v23, %v4372_v58  ;;  %v4960_v4 = vadd.f32 %v4959_v39, %v4958_v57 }
 0x16d   :  { %v4447_v62 = vadd.f32 %v4410_v63, %v4391_v33  ;;  %v4392_v5 = vmax.f32 %v4109_v24, %v4364_v60 }
 0x16e   :  { %v4450_v13 = vadd.f32 %v4425_v14, %v4394_v3  ;;  %v4457_v29 = vmax.f32 %v4449_v0, 0.0 }
 0x16f   :  { %v4448_v2 = vadd.f32 %v4415_v45, %v4392_v5  ;;  %v5019_v7 = vpop.f32.mrb[44].mxu0  ;;  %v4455_v11 = vmax.f32 %v4447_v62, 0.0 }
 0x170   :  { %v4458_v48 = vmax.f32 %v4450_v13, 0.0  ;;  %v4961_v8 = vpop.f32.mrb[44].mxu1  ;;  %v4376_v10 = vpop.f32.mrb[45].mxu0 }
 0x171   :  { %v4456_v15 = vmax.f32 %v4448_v2, 0.0  ;;  %v4962_v16 = vpop.f32.mrb[45].mxu1  ;;  %v4377_v6 = vadd.f32 %v4957_v54, %v4376_v10  ;;  %v5020_v18 = vpop.f32.mrb[46].mxu0 }
 0x172   :  { %v4774_v19 = vpack.c.bf16 %v4458_v48, %v4457_v29  ;;  %v4963_v20 = vadd.f32 %v4962_v16, %v4961_v8  ;;  %v4964_v21 = vpop.f32.mrb[46].mxu1  ;;  %v4379_v22 = vpop.f32.mrb[47].mxu0 }
 0x173   :  { %v4769_v40 = vpack.c.bf16 %v4456_v15, %v4455_v11  ;;  %v4395_v23 = vmax.f32 %v4112_v34, %v4377_v6  ;;  %v4965_v17 = vpop.f32.mrb[47].mxu1  ;;  %v4380_v24 = vadd.f32 %v4960_v4, %v4379_v22 }
 0x174   :  { %4786 = vst [vmem:[%s6173_s4 + $0x8] sm:$0xff] %v4774_v19   ;;  %v4385_v56 = vadd.f32 %v5019_v7, %v4963_v20  ;;  %v4966_v63 = vadd.f32 %v4965_v17, %v4964_v21 }
 0x175   :  { %4770 = vst [vmem:[%s6173_s4] sm:$0xff] %v4769_v40   ;;  %v4451_v25 = vadd.f32 %v4430_v1, %v4395_v23  ;;  %v4396_v35 = vmax.f32 %v4113_v43, %v4380_v24 }
 0x176   :  { %v4397_v28 = vmax.f32 %v6151_v31, %v4385_v56  ;;  %v4388_v12 = vadd.f32 %v5020_v18, %v4966_v63 }
 0x177   :  { %v4452_v27 = vadd.f32 %v4435_v53, %v4396_v35  ;;  %v4459_v9 = vmax.f32 %v4451_v25, 0.0 }
 0x178   :  { %v4453_v30 = vadd.f32 %v4440_v42, %v4397_v28  ;;  %v4398_v55 = vmax.f32 %v6153_v37, %v4388_v12 }
 0x179   :  { %v4460_v34 = vmax.f32 %v4452_v27, 0.0 }
 0x17a   :  { %v4454_v61 = vadd.f32 %v4445_v32, %v4398_v55  ;;  %v4461_v38 = vmax.f32 %v4453_v30, 0.0 }
 0x17b   :  { %v4779_v36 = vpack.c.bf16 %v4460_v34, %v4459_v9 }
 0x17c   :  { %v4462_v44 = vmax.f32 %v4454_v61, 0.0 }
 0x17d   :  { %4787 = vst [vmem:[%s6173_s4 + $0x10] sm:$0xff] %v4779_v36  }
 0x17e   :  { %v4784_v43 = vpack.c.bf16 %v4462_v44, %v4461_v38 }
 0x180   :  { %4788 = vst [vmem:[%s6173_s4 + $0x18] sm:$0xff] %v4784_v43  }

// kernel: cnn_forward.6
= control target key start
LH: loop header
LB: loop body
LE: loop exit
PB: predicated region body
PF: predicated region fallthrough
CT: control target
= control target key end

     0   :  { %s5019_s0 = inlined_call_operand.vmem [shape: bf16[2,1600], index: 0, kind: input, shape index: {}]   ;;  %s5020_s1 = inlined_call_operand.vmem [shape: f32[128,10], index: 1, kind: input, shape index: {}]   ;;  %s5021_s2 = inlined_call_operand.vmem [shape: f32[1600,128], index: 2, kind: input, shape index: {}]   ;;  %s5022_s3 = inlined_call_operand.vmem [shape: f32[10], index: 3, kind: input, shape index: {}]   ;;  %s5023_s4 = inlined_call_operand.vmem [shape: f32[128], index: 4, kind: input, shape index: {}]   ;;  %s5024_s5 = inlined_call_operand.hbm [shape: f32[2,10], index: 5, kind: output, shape index: {}]  }
   0x1   :  { %v3146_v0 = vld [vmem:[%s5021_s2 + $0x80] sm:$0xff]  ;;  %v3147_v1 = vld [vmem:[%s5021_s2 + $0x88] sm:$0xff]  ;;  %v3148_v11 = vld [vmem:[%s5021_s2 + $0x90] sm:$0xff] }
   0x2   :  { %v21_v2 = vld [vmem:[%s5021_s2] sm:$0xff]  ;;  %v3476_v3 = vpack.c.bf16 %v3147_v1, %v3146_v0  ;;  %v3131_v4 = vld [vmem:[%s5021_s2 + $0x8] sm:$0xff]  ;;  %v3149_v13 = vld [vmem:[%s5021_s2 + $0x98] sm:$0xff] }
   0x3   :  { %v3178_v5 = vld [vmem:[%s5021_s2 + $0x180] sm:$0xff]  ;;  %v3179_v6 = vld [vmem:[%s5021_s2 + $0x188] sm:$0xff]  ;;  %v3436_v7 = vpack.c.bf16 %v3131_v4, %v21_v2  ;;  %v3132_v14 = vld [vmem:[%s5021_s2 + $0x10] sm:$0xff]  ;;  %v3481_v16 = vpack.c.bf16 %v3149_v13, %v3148_v11 }
   0x4   :  { %v3556_v8 = vpack.c.bf16 %v3179_v6, %v3178_v5  ;;  %v3162_v9 = vld [vmem:[%s5021_s2 + $0x100] sm:$0xff]  ;;  %v3163_v10 = vld [vmem:[%s5021_s2 + $0x108] sm:$0xff]  ;;  %3477 = vst [vmem:[#allocation4 + $0x40] sm:$0xff] %v3476_v3   ;;  %v3133_v15 = vld [vmem:[%s5021_s2 + $0x18] sm:$0xff] }
   0x5   :  { %v3516_v12 = vpack.c.bf16 %v3163_v10, %v3162_v9  ;;  %3437 = vst [vmem:[#allocation4] sm:$0xff] %v3436_v7   ;;  %v3441_v17 = vpack.c.bf16 %v3133_v15, %v3132_v14  ;;  %v3180_v18 = vld [vmem:[%s5021_s2 + $0x190] sm:$0xff]  ;;  %v3181_v19 = vld [vmem:[%s5021_s2 + $0x198] sm:$0xff]  ;;  %v3150_v23 = vld [vmem:[%s5021_s2 + $0xa0] sm:$0xff] }
   0x6   :  { %3557 = vst [vmem:[#allocation4 + $0xc0] sm:$0xff] %v3556_v8   ;;  %v3164_v20 = vld [vmem:[%s5021_s2 + $0x110] sm:$0xff]  ;;  %v3561_v21 = vpack.c.bf16 %v3181_v19, %v3180_v18  ;;  %v3165_v22 = vld [vmem:[%s5021_s2 + $0x118] sm:$0xff]  ;;  %v3151_v24 = vld [vmem:[%s5021_s2 + $0xa8] sm:$0xff] }
   0x7   :  { %3517 = vst [vmem:[#allocation4 + $0x80] sm:$0xff] %v3516_v12   ;;  %3482 = vst [vmem:[#allocation4 + $0x48] sm:$0xff] %v3481_v16   ;;  %v3521_v25 = vpack.c.bf16 %v3165_v22, %v3164_v20  ;;  %v3486_v26 = vpack.c.bf16 %v3151_v24, %v3150_v23  ;;  %v3134_v27 = vld [vmem:[%s5021_s2 + $0x20] sm:$0xff]  ;;  %v3135_v28 = vld [vmem:[%s5021_s2 + $0x28] sm:$0xff] }
   0x8   :  { %3442 = vst [vmem:[#allocation4 + $0x8] sm:$0xff] %v3441_v17   ;;  %v3182_v29 = vld [vmem:[%s5021_s2 + $0x1a0] sm:$0xff]  ;;  %3562 = vst [vmem:[#allocation4 + $0xc8] sm:$0xff] %v3561_v21   ;;  %v3446_v30 = vpack.c.bf16 %v3135_v28, %v3134_v27  ;;  %v3183_v31 = vld [vmem:[%s5021_s2 + $0x1a8] sm:$0xff] }
   0x9   :  { %v3166_v32 = vld [vmem:[%s5021_s2 + $0x120] sm:$0xff]  ;;  %v3167_v33 = vld [vmem:[%s5021_s2 + $0x128] sm:$0xff]  ;;  %3522 = vst [vmem:[#allocation4 + $0x88] sm:$0xff] %v3521_v25   ;;  %3487 = vst [vmem:[#allocation4 + $0x50] sm:$0xff] %v3486_v26   ;;  %v3566_v34 = vpack.c.bf16 %v3183_v31, %v3182_v29 }
   0xa   :  { %v3526_v35 = vpack.c.bf16 %v3167_v33, %v3166_v32  ;;  %v3152_v36 = vld [vmem:[%s5021_s2 + $0xb0] sm:$0xff]  ;;  %v3153_v37 = vld [vmem:[%s5021_s2 + $0xb8] sm:$0xff]  ;;  %3447 = vst [vmem:[#allocation4 + $0x10] sm:$0xff] %v3446_v30   ;;  %v3154_v62 = vld [vmem:[%s5021_s2 + $0xc0] sm:$0xff] }
   0xb   :  { %v3136_v38 = vld [vmem:[%s5021_s2 + $0x30] sm:$0xff]  ;;  %v3491_v39 = vpack.c.bf16 %v3153_v37, %v3152_v36  ;;  %v3137_v40 = vld [vmem:[%s5021_s2 + $0x38] sm:$0xff]  ;;  %v4163_v43 = vld [vmem:[#allocation4 + $0x40] sm:$0xff]   ;;  %3567 = vst [vmem:[#allocation4 + $0xd0] sm:$0xff] %v3566_v34  }
   0xc   :  { %v3184_v41 = vld [vmem:[%s5021_s2 + $0x1b0] sm:$0xff]  ;;  %v3185_v42 = vld [vmem:[%s5021_s2 + $0x1b8] sm:$0xff]  ;;  %3527 = vst [vmem:[#allocation4 + $0x90] sm:$0xff] %v3526_v35   ;;  %v3451_v44 = vpack.c.bf16 %v3137_v40, %v3136_v38  ;;  %v4164_v46 = vld [vmem:[#allocation4] sm:$0xff]   ;;  %3933 = vmatprep.subr.bf16.mxu0 %v4163_v43 }
   0xd   :  { %v3571_v45 = vpack.c.bf16 %v3185_v42, %v3184_v41  ;;  %3492 = vst [vmem:[#allocation4 + $0x58] sm:$0xff] %v3491_v39   ;;  %v4165_v47 = vld [vmem:[#allocation4 + $0xc0] sm:$0xff]   ;;  %3934 = vmatpush3.bf16.msra.mxu0 %v4164_v46  ;;  %v3168_v60 = vld [vmem:[%s5021_s2 + $0x130] sm:$0xff]  ;;  %v3169_v61 = vld [vmem:[%s5021_s2 + $0x138] sm:$0xff]  ;;  %v4289_v46 = vmov 1966171168  }
   0xe   :  { %3452 = vst [vmem:[#allocation4 + $0x18] sm:$0xff] %v3451_v44   ;;  %v4166_v48 = vld [vmem:[#allocation4 + $0x80] sm:$0xff]   ;;  %3955 = vmatprep.subr.bf16.mxu1 %v4165_v47  ;;  %v4167_v49 = vld [vmem:[#allocation4 + $0x48] sm:$0xff]   ;;  %v3531_v63 = vpack.c.bf16 %v3169_v61, %v3168_v60  ;;  %v3157_v11 = vld [vmem:[%s5021_s2 + $0xd8] sm:$0xff]  ;;  %v2039_v47 = vunpack.c.l.s4 %v4289_v46 }
   0xf   :  { %3572 = vst [vmem:[#allocation4 + $0xd8] sm:$0xff] %v3571_v45   ;;  %3956 = vmatpush3.bf16.msra.mxu1 %v4166_v48  ;;  %v4168_v50 = vld [vmem:[#allocation4 + $0x8] sm:$0xff]   ;;  %3935 = vmatprep.subr.bf16.mxu0 %v4167_v49  ;;  %v3138_v1 = vld [vmem:[%s5021_s2 + $0x40] sm:$0xff]  ;;  %v3141_v15 = vld [vmem:[%s5021_s2 + $0x58] sm:$0xff]  ;;  %v2041_v48 = vlaneseq }
  0x10   :  { %v4169_v51 = vld [vmem:[#allocation4 + $0xc8] sm:$0xff]   ;;  %v4171_v53 = vld [vmem:[#allocation4 + $0x50] sm:$0xff]   ;;  %v3186_v5 = vld [vmem:[%s5021_s2 + $0x1c0] sm:$0xff]  ;;  %3532 = vst [vmem:[#allocation4 + $0x98] sm:$0xff] %v3531_v63  }
  0x11   :  { %3936 = vmatpush3.bf16.msra.mxu0 %v4168_v50  ;;  %v4170_v52 = vld [vmem:[#allocation4 + $0x88] sm:$0xff]   ;;  %3957 = vmatprep.subr.bf16.mxu1 %v4169_v51  ;;  %v4172_v54 = vld [vmem:[#allocation4 + $0x10] sm:$0xff]   ;;  %v3170_v7 = vld [vmem:[%s5021_s2 + $0x140] sm:$0xff] }
  0x12   :  { %3937 = vmatprep.subr.bf16.mxu0 %v4171_v53  ;;  %v4173_v55 = vld [vmem:[#allocation4 + $0xd0] sm:$0xff]   ;;  %v3155_v0 = vld [vmem:[%s5021_s2 + $0xc8] sm:$0xff]  ;;  %v3158_v23 = vld [vmem:[%s5021_s2 + $0xe0] sm:$0xff]  ;;  %v2040_v53 = vunpack.c.0.s8 %v2039_v47 }
  0x13   :  { %3958 = vmatpush3.bf16.msra.mxu1 %v4170_v52  ;;  %v4174_v56 = vld [vmem:[#allocation4 + $0x90] sm:$0xff]   ;;  %v3139_v2 = vld [vmem:[%s5021_s2 + $0x48] sm:$0xff]  ;;  %v3496_v3 = vpack.c.bf16 %v3155_v0, %v3154_v62  ;;  %v3142_v25 = vld [vmem:[%s5021_s2 + $0x60] sm:$0xff] }
  0x14   :  { %3959 = vmatprep.subr.bf16.mxu1 %v4173_v55  ;;  %v4175_v57 = vld [vmem:[#allocation4 + $0x58] sm:$0xff]   ;;  %v3456_v4 = vpack.c.bf16 %v3139_v2, %v3138_v1  ;;  %v3187_v6 = vld [vmem:[%s5021_s2 + $0x1c8] sm:$0xff]  ;;  %v3156_v10 = vld [vmem:[%s5021_s2 + $0xd0] sm:$0xff] }
  0x15   :  { %3938 = vmatpush3.bf16.msra.mxu0 %v4172_v54  ;;  %v4176_v58 = vld [vmem:[#allocation4 + $0x18] sm:$0xff]   ;;  %v3576_v8 = vpack.c.bf16 %v3187_v6, %v3186_v5  ;;  %v3171_v9 = vld [vmem:[%s5021_s2 + $0x148] sm:$0xff]  ;;  %3497 = vst [vmem:[#allocation4 + $0x60] sm:$0xff] %v3496_v3   ;;  %v3501_v13 = vpack.c.bf16 %v3157_v11, %v3156_v10  ;;  %v3140_v14 = vld [vmem:[%s5021_s2 + $0x50] sm:$0xff]  ;;  %v2042_v54 = vshrl.u32 %v2041_v48, 7 }
  0x16   :  { %3939 = vmatprep.subr.bf16.mxu0 %v4175_v57  ;;  %v4177_v59 = vld [vmem:[#allocation4 + $0xd8] sm:$0xff]   ;;  %3457 = vst [vmem:[#allocation4 + $0x20] sm:$0xff] %v3456_v4   ;;  %v3536_v12 = vpack.c.bf16 %v3171_v9, %v3170_v7  ;;  %v3188_v16 = vld [vmem:[%s5021_s2 + $0x1d0] sm:$0xff]  ;;  %v3461_v17 = vpack.c.bf16 %v3141_v15, %v3140_v14  ;;  %v3159_v24 = vld [vmem:[%s5021_s2 + $0xe8] sm:$0xff] }
  0x17   :  { %3960 = vmatpush3.bf16.msra.mxu1 %v4174_v56  ;;  %3577 = vst [vmem:[#allocation4 + $0xe0] sm:$0xff] %v3576_v8   ;;  %v3189_v18 = vld [vmem:[%s5021_s2 + $0x1d8] sm:$0xff]  ;;  %v3172_v19 = vld [vmem:[%s5021_s2 + $0x150] sm:$0xff]  ;;  %3502 = vst [vmem:[#allocation4 + $0x68] sm:$0xff] %v3501_v13   ;;  %v3506_v26 = vpack.c.bf16 %v3159_v24, %v3158_v23 }
  0x18   :  { %3961 = vmatprep.subr.bf16.mxu1 %v4177_v59  ;;  %v3173_v20 = vld [vmem:[%s5021_s2 + $0x158] sm:$0xff]  ;;  %3537 = vst [vmem:[#allocation4 + $0xa0] sm:$0xff] %v3536_v12   ;;  %v3581_v21 = vpack.c.bf16 %v3189_v18, %v3188_v16  ;;  %3462 = vst [vmem:[#allocation4 + $0x28] sm:$0xff] %v3461_v17   ;;  %v3143_v27 = vld [vmem:[%s5021_s2 + $0x68] sm:$0xff]  ;;  %v4504_v59 = vsub.s32 %v2040_v53, %v2042_v54 }
  0x19   :  { %3940 = vmatpush3.bf16.msra.mxu0 %v4176_v58  ;;  %v3541_v22 = vpack.c.bf16 %v3173_v20, %v3172_v19  ;;  %v3190_v28 = vld [vmem:[%s5021_s2 + $0x1e0] sm:$0xff]  ;;  %v3191_v29 = vld [vmem:[%s5021_s2 + $0x1e8] sm:$0xff]  ;;  %v3466_v30 = vpack.c.bf16 %v3143_v27, %v3142_v25  ;;  %v3160_v34 = vld [vmem:[%s5021_s2 + $0xf0] sm:$0xff]  ;;  %3507 = vst [vmem:[#allocation4 + $0x70] sm:$0xff] %v3506_v26  }
  0x1a   :  { %3582 = vst [vmem:[#allocation4 + $0xe8] sm:$0xff] %v3581_v21   ;;  %v3586_v31 = vpack.c.bf16 %v3191_v29, %v3190_v28  ;;  %v3174_v32 = vld [vmem:[%s5021_s2 + $0x160] sm:$0xff]  ;;  %v3175_v33 = vld [vmem:[%s5021_s2 + $0x168] sm:$0xff]  ;;  %v3161_v36 = vld [vmem:[%s5021_s2 + $0xf8] sm:$0xff] }
  0x1b   :  { %3542 = vst [vmem:[#allocation4 + $0xa8] sm:$0xff] %v3541_v22   ;;  %v3546_v35 = vpack.c.bf16 %v3175_v33, %v3174_v32  ;;  %v3144_v37 = vld [vmem:[%s5021_s2 + $0x70] sm:$0xff]  ;;  %v3145_v38 = vld [vmem:[%s5021_s2 + $0x78] sm:$0xff]  ;;  %3467 = vst [vmem:[#allocation4 + $0x30] sm:$0xff] %v3466_v30   ;;  %v3511_v40 = vpack.c.bf16 %v3161_v36, %v3160_v34 }
  0x1c   :  { %v4178_v39 = vld [vmem:[#allocation4 + $0x98] sm:$0xff]   ;;  %3587 = vst [vmem:[#allocation4 + $0xf0] sm:$0xff] %v3586_v31   ;;  %v3471_v41 = vpack.c.bf16 %v3145_v38, %v3144_v37  ;;  %v4179_v42 = vld [vmem:[#allocation4 + $0x60] sm:$0xff]   ;;  %v3192_v62 = vld [vmem:[%s5021_s2 + $0x1f0] sm:$0xff] }
  0x1d   :  { %3547 = vst [vmem:[#allocation4 + $0xb0] sm:$0xff] %v3546_v35   ;;  %3962 = vmatpush3.bf16.msra.mxu1 %v4178_v39  ;;  %v4180_v43 = vld [vmem:[#allocation4 + $0x20] sm:$0xff]   ;;  %3512 = vst [vmem:[#allocation4 + $0x78] sm:$0xff] %v3511_v40   ;;  %3941 = vmatprep.subr.bf16.mxu0 %v4179_v42  ;;  %v3193_v63 = vld [vmem:[%s5021_s2 + $0x1f8] sm:$0xff] }
  0x1e   :  { %3472 = vst [vmem:[#allocation4 + $0x38] sm:$0xff] %v3471_v41   ;;  %v4181_v44 = vld [vmem:[#allocation4 + $0xe0] sm:$0xff]   ;;  %3942 = vmatpush3.bf16.msra.mxu0 %v4180_v43  ;;  %v4183_v49 = vld [vmem:[#allocation4 + $0x68] sm:$0xff]   ;;  %v3591_v1 = vpack.c.bf16 %v3193_v63, %v3192_v62  ;;  %v3177_v5 = vld [vmem:[%s5021_s2 + $0x178] sm:$0xff] }
  0x1f   :  { %v4182_v45 = vld [vmem:[#allocation4 + $0xa0] sm:$0xff]   ;;  %3963 = vmatprep.subr.bf16.mxu1 %v4181_v44  ;;  %v4184_v50 = vld [vmem:[#allocation4 + $0x28] sm:$0xff]   ;;  %3943 = vmatprep.subr.bf16.mxu0 %v4183_v49  ;;  %v3213_v21 = vld [vmem:[%s5021_s2 + $0x298] sm:$0xff] }
  0x20   :  { %v4187_v55 = vld [vmem:[#allocation4 + $0x70] sm:$0xff]   ;;  %v1826_v0 = vld [vmem:[%s5019_s0] sm:$0xff]  ;;  %v3211_v8 = vld [vmem:[%s5021_s2 + $0x288] sm:$0xff]  ;;  %3592 = vst [vmem:[#allocation4 + $0xf8] sm:$0xff] %v3591_v1  }
  0x21   :  { %3964 = vmatpush3.bf16.msra.mxu1 %v4182_v45  ;;  %v4185_v51 = vld [vmem:[#allocation4 + $0xe8] sm:$0xff]   ;;  %v2037_v2 = vcombine.high %v1826_v0, %v1826_v0  ;;  %v2044_v3 = vrot.slane %v1826_v0, %v4504_v59  ;;  %v3210_v6 = vld [vmem:[%s5021_s2 + $0x280] sm:$0xff]  ;;  %v3197_v27 = vld [vmem:[%s5021_s2 + $0x218] sm:$0xff] }
  0x22   :  { %3944 = vmatpush3.bf16.msra.mxu0 %v4184_v50  ;;  %v4186_v52 = vld [vmem:[#allocation4 + $0xa8] sm:$0xff]   ;;  %3965 = vmatprep.subr.bf16.mxu1 %v4185_v51  ;;  %v4188_v56 = vld [vmem:[#allocation4 + $0x30] sm:$0xff]   ;;  %v3194_v9 = vld [vmem:[%s5021_s2 + $0x200] sm:$0xff]  ;;  %v3636_v12 = vpack.c.bf16 %v3211_v8, %v3210_v6 }
  0x23   :  { %3945 = vmatprep.subr.bf16.mxu0 %v4187_v55  ;;  %v4189_v57 = vld [vmem:[#allocation4 + $0xf0] sm:$0xff]   ;;  %v3195_v10 = vld [vmem:[%s5021_s2 + $0x208] sm:$0xff]  ;;  %v2052_v11 = vcombine.high %v2044_v3, %v2044_v3  ;;  %v3242_v14 = vld [vmem:[%s5021_s2 + $0x380] sm:$0xff]  ;;  %v2060_v17 = vrot.slane %v2044_v3, %v4504_v59  ;;  %v4554_v22 = vrot.slane %v2037_v2, %v4504_v59 }
  0x24   :  { %v4190_v58 = vld [vmem:[#allocation4 + $0xb0] sm:$0xff]   ;;  %v4191_v60 = vld [vmem:[#allocation4 + $0x78] sm:$0xff]   ;;  %v3596_v13 = vpack.c.bf16 %v3195_v10, %v3194_v9  ;;  %v3243_v15 = vld [vmem:[%s5021_s2 + $0x388] sm:$0xff]  ;;  %3637 = vst [vmem:[#allocation4 + $0x140] sm:$0xff] %v3636_v12  }
  0x25   :  { %3966 = vmatpush3.bf16.msra.mxu1 %v4186_v52  ;;  %v4192_v61 = vld [vmem:[#allocation4 + $0x38] sm:$0xff]   ;;  %v3176_v4 = vld [vmem:[%s5021_s2 + $0x170] sm:$0xff]  ;;  %v3716_v18 = vpack.c.bf16 %v3243_v15, %v3242_v14  ;;  %v3227_v19 = vld [vmem:[%s5021_s2 + $0x308] sm:$0xff]  ;;  %v2074_v23 = vrot.slane %v2052_v11, %v4504_v59  ;;  %v2053_v33 = vcombine.high %v4554_v22, %v4554_v22  ;;  %v2082_v53 = vcombine.high %v2060_v17, %v2060_v17 }
  0x26   :  { %3946 = vmatpush3.bf16.msra.mxu0 %v4188_v56  ;;  %3967 = vmatprep.subr.bf16.mxu1 %v4189_v57  ;;  %v3551_v7 = vpack.c.bf16 %v3177_v5, %v3176_v4  ;;  %v3226_v16 = vld [vmem:[%s5021_s2 + $0x300] sm:$0xff]  ;;  %v3212_v20 = vld [vmem:[%s5021_s2 + $0x290] sm:$0xff]  ;;  %3597 = vst [vmem:[#allocation4 + $0x100] sm:$0xff] %v3596_v13   ;;  %v3245_v30 = vld [vmem:[%s5021_s2 + $0x398] sm:$0xff] }
  0x27   :  { %3947 = vmatprep.subr.bf16.mxu0 %v4191_v60  ;;  %v3676_v24 = vpack.c.bf16 %v3227_v19, %v3226_v16  ;;  %v3641_v25 = vpack.c.bf16 %v3213_v21, %v3212_v20  ;;  %v3196_v26 = vld [vmem:[%s5021_s2 + $0x210] sm:$0xff]  ;;  %3717 = vst [vmem:[#allocation4 + $0x1c0] sm:$0xff] %v3716_v18   ;;  %v3229_v32 = vld [vmem:[%s5021_s2 + $0x318] sm:$0xff]  ;;  %2773 = vmatprep.mubr.bf16.mxu0 %v2074_v23  ;;  %v3214_v37 = vld [vmem:[%s5021_s2 + $0x2a0] sm:$0xff] }
  0x28   :  { %3552 = vst [vmem:[#allocation4 + $0xb8] sm:$0xff] %v3551_v7   ;;  %v3244_v28 = vld [vmem:[%s5021_s2 + $0x390] sm:$0xff]  ;;  %v3601_v29 = vpack.c.bf16 %v3197_v27, %v3196_v26  ;;  %v2084_v34 = vcombine.high %v2074_v23, %v2074_v23  ;;  %v3215_v38 = vld [vmem:[%s5021_s2 + $0x2a8] sm:$0xff]  ;;  %v3198_v39 = vld [vmem:[%s5021_s2 + $0x220] sm:$0xff]  ;;  %v2081_v44 = vrot.slane %v2053_v33, %v4504_v59 }
  0x29   :  { %3968 = vmatpush3.bf16.msra.mxu1 %v4190_v58  ;;  %v3228_v31 = vld [vmem:[%s5021_s2 + $0x310] sm:$0xff]  ;;  %3677 = vst [vmem:[#allocation4 + $0x180] sm:$0xff] %v3676_v24   ;;  %3642 = vst [vmem:[#allocation4 + $0x148] sm:$0xff] %v3641_v25   ;;  %v3721_v35 = vpack.c.bf16 %v3245_v30, %v3244_v28  ;;  %v3646_v40 = vpack.c.bf16 %v3215_v38, %v3214_v37  ;;  %v3199_v41 = vld [vmem:[%s5021_s2 + $0x228] sm:$0xff] }
  0x2a   :  { %3948 = vmatpush3.bf16.msra.mxu0 %v4192_v61  ;;  %v3681_v36 = vpack.c.bf16 %v3229_v32, %v3228_v31  ;;  %3602 = vst [vmem:[#allocation4 + $0x108] sm:$0xff] %v3601_v29   ;;  %v3246_v42 = vld [vmem:[%s5021_s2 + $0x3a0] sm:$0xff]  ;;  %v3247_v43 = vld [vmem:[%s5021_s2 + $0x3a8] sm:$0xff]  ;;  %2813 = vmatprep.mubr.bf16.mxu1 %v2084_v34  ;;  %v3606_v45 = vpack.c.bf16 %v3199_v41, %v3198_v39  ;;  %v3216_v0 = vld [vmem:[%s5021_s2 + $0x2b0] sm:$0xff] }
  0x2b   :  { %3722 = vst [vmem:[#allocation4 + $0x1c8] sm:$0xff] %v3721_v35   ;;  %v3726_v46 = vpack.c.bf16 %v3247_v43, %v3246_v42  ;;  %v3230_v47 = vld [vmem:[%s5021_s2 + $0x320] sm:$0xff]  ;;  %v3231_v48 = vld [vmem:[%s5021_s2 + $0x328] sm:$0xff]  ;;  %3647 = vst [vmem:[#allocation4 + $0x150] sm:$0xff] %v3646_v40   ;;  %v2085_v55 = vcombine.high %v2081_v44, %v2081_v44 }
  0x2c   :  { %3682 = vst [vmem:[#allocation4 + $0x188] sm:$0xff] %v3681_v36   ;;  %v4193_v49 = vld [vmem:[#allocation4 + $0xf8] sm:$0xff]   ;;  %v3686_v50 = vpack.c.bf16 %v3231_v48, %v3230_v47  ;;  %3607 = vst [vmem:[#allocation4 + $0x110] sm:$0xff] %v3606_v45   ;;  %v4196_v52 = vld [vmem:[#allocation4 + $0x140] sm:$0xff]  }
  0x2d   :  { %2774 = vmatmul.mubr.bf16.vlgmr.msra.gmra.mrb[0].mxu0 %v2060_v17  ;;  %3727 = vst [vmem:[#allocation4 + $0x1d0] sm:$0xff] %v3726_v46   ;;  %3969 = vmatprep.subr.bf16.mxu1 %v4193_v49  ;;  %v4197_v54 = vld [vmem:[#allocation4 + $0x100] sm:$0xff]   ;;  %v3217_v4 = vld [vmem:[%s5021_s2 + $0x2b8] sm:$0xff]  ;;  %v3200_v5 = vld [vmem:[%s5021_s2 + $0x230] sm:$0xff] }
  0x2e   :  { %2853 = vmatprep.mubr.bf16.mxu0 %v2081_v44  ;;  %3687 = vst [vmem:[#allocation4 + $0x190] sm:$0xff] %v3686_v50   ;;  %3977 = vmatprep.subr.bf16.mxu0 %v4196_v52  ;;  %v4198_v56 = vld [vmem:[#allocation4 + $0x1c0] sm:$0xff]   ;;  %v3201_v6 = vld [vmem:[%s5021_s2 + $0x238] sm:$0xff]  ;;  %v3651_v7 = vpack.c.bf16 %v3217_v4, %v3216_v0  ;;  %v3248_v9 = vld [vmem:[%s5021_s2 + $0x3b0] sm:$0xff] }
  0x2f   :  { %v4195_v51 = vld [vmem:[#allocation4 + $0xb8] sm:$0xff]   ;;  %3978 = vmatpush3.bf16.msra.mxu0 %v4197_v54  ;;  %v3611_v8 = vpack.c.bf16 %v3201_v6, %v3200_v5  ;;  %v3232_v11 = vld [vmem:[%s5021_s2 + $0x330] sm:$0xff]  ;;  %v3219_v15 = vld [vmem:[%s5021_s2 + $0x2c8] sm:$0xff] }
  0x30   :  { %3970 = vmatpush3.bf16.msra.mxu1 %v4195_v51  ;;  %v4199_v57 = vld [vmem:[#allocation4 + $0x180] sm:$0xff]   ;;  %v4200_v58 = vld [vmem:[#allocation4 + $0x148] sm:$0xff]   ;;  %v3249_v10 = vld [vmem:[%s5021_s2 + $0x3b8] sm:$0xff]  ;;  %3652 = vst [vmem:[#allocation4 + $0x158] sm:$0xff] %v3651_v7  }
  0x31   :  { %3999 = vmatprep.subr.bf16.mxu1 %v4198_v56  ;;  %v4201_v60 = vld [vmem:[#allocation4 + $0x108] sm:$0xff]   ;;  %3979 = vmatprep.subr.bf16.mxu0 %v4200_v58  ;;  %v3731_v12 = vpack.c.bf16 %v3249_v10, %v3248_v9  ;;  %v3233_v13 = vld [vmem:[%s5021_s2 + $0x338] sm:$0xff]  ;;  %v3218_v14 = vld [vmem:[%s5021_s2 + $0x2c0] sm:$0xff]  ;;  %3612 = vst [vmem:[#allocation4 + $0x118] sm:$0xff] %v3611_v8  }
  0x32   :  { %v4202_v61 = vld [vmem:[#allocation4 + $0x1c8] sm:$0xff]   ;;  %v4204_v63 = vld [vmem:[#allocation4 + $0x150] sm:$0xff]   ;;  %v3691_v16 = vpack.c.bf16 %v3233_v13, %v3232_v11  ;;  %v3656_v17 = vpack.c.bf16 %v3219_v15, %v3218_v14  ;;  %v3202_v18 = vld [vmem:[%s5021_s2 + $0x240] sm:$0xff] }
  0x33   :  { %2814 = vmatmul.mubr.bf16.vlgmr.msra.gmra.mrb[0].mxu1 %v2082_v53  ;;  %3980 = vmatpush3.bf16.msra.mxu0 %v4201_v60  ;;  %v4203_v62 = vld [vmem:[#allocation4 + $0x188] sm:$0xff]   ;;  %v4205_v1 = vld [vmem:[#allocation4 + $0x110] sm:$0xff]   ;;  %v3250_v20 = vld [vmem:[%s5021_s2 + $0x3c0] sm:$0xff]  ;;  %3732 = vst [vmem:[#allocation4 + $0x1d8] sm:$0xff] %v3731_v12  }
  0x34   :  { %4000 = vmatpush3.bf16.msra.mxu1 %v4199_v57  ;;  %2893 = vmatprep.mubr.bf16.mxu1 %v2085_v55  ;;  %v4206_v2 = vld [vmem:[#allocation4 + $0x1d0] sm:$0xff]   ;;  %v3203_v19 = vld [vmem:[%s5021_s2 + $0x248] sm:$0xff]  ;;  %v3234_v24 = vld [vmem:[%s5021_s2 + $0x340] sm:$0xff]  ;;  %3692 = vst [vmem:[#allocation4 + $0x198] sm:$0xff] %v3691_v16  }
  0x35   :  { %4001 = vmatprep.subr.bf16.mxu1 %v4202_v61  ;;  %3981 = vmatprep.subr.bf16.mxu0 %v4204_v63  ;;  %v4207_v3 = vld [vmem:[#allocation4 + $0x190] sm:$0xff]   ;;  %v3616_v21 = vpack.c.bf16 %v3203_v19, %v3202_v18  ;;  %v3251_v23 = vld [vmem:[%s5021_s2 + $0x3c8] sm:$0xff]  ;;  %3657 = vst [vmem:[#allocation4 + $0x160] sm:$0xff] %v3656_v17   ;;  %v3222_v39 = vld [vmem:[%s5021_s2 + $0x2e0] sm:$0xff] }
  0x36   :  { %v3235_v25 = vld [vmem:[%s5021_s2 + $0x348] sm:$0xff]  ;;  %v3736_v26 = vpack.c.bf16 %v3251_v23, %v3250_v20  ;;  %v3220_v28 = vld [vmem:[%s5021_s2 + $0x2d0] sm:$0xff]  ;;  %v3221_v29 = vld [vmem:[%s5021_s2 + $0x2d8] sm:$0xff] }
  0x37   :  { %3982 = vmatpush3.bf16.msra.mxu0 %v4205_v1  ;;  %v3696_v27 = vpack.c.bf16 %v3235_v25, %v3234_v24  ;;  %v3204_v30 = vld [vmem:[%s5021_s2 + $0x250] sm:$0xff]  ;;  %3617 = vst [vmem:[#allocation4 + $0x120] sm:$0xff] %v3616_v21   ;;  %v3661_v31 = vpack.c.bf16 %v3221_v29, %v3220_v28  ;;  %v3205_v32 = vld [vmem:[%s5021_s2 + $0x258] sm:$0xff]  ;;  %v3223_v41 = vld [vmem:[%s5021_s2 + $0x2e8] sm:$0xff] }
  0x38   :  { %4002 = vmatpush3.bf16.msra.mxu1 %v4203_v62  ;;  %v3252_v33 = vld [vmem:[%s5021_s2 + $0x3d0] sm:$0xff]  ;;  %v3253_v34 = vld [vmem:[%s5021_s2 + $0x3d8] sm:$0xff]  ;;  %3737 = vst [vmem:[#allocation4 + $0x1e0] sm:$0xff] %v3736_v26   ;;  %v3621_v35 = vpack.c.bf16 %v3205_v32, %v3204_v30  ;;  %v3206_v42 = vld [vmem:[%s5021_s2 + $0x260] sm:$0xff]  ;;  %v3666_v44 = vpack.c.bf16 %v3223_v41, %v3222_v39 }
  0x39   :  { %4003 = vmatprep.subr.bf16.mxu1 %v4206_v2  ;;  %3697 = vst [vmem:[#allocation4 + $0x1a0] sm:$0xff] %v3696_v27   ;;  %v3741_v36 = vpack.c.bf16 %v3253_v34, %v3252_v33  ;;  %v3236_v37 = vld [vmem:[%s5021_s2 + $0x350] sm:$0xff]  ;;  %v3237_v38 = vld [vmem:[%s5021_s2 + $0x358] sm:$0xff]  ;;  %3662 = vst [vmem:[#allocation4 + $0x168] sm:$0xff] %v3661_v31  }
  0x3a   :  { %v3701_v40 = vpack.c.bf16 %v3237_v38, %v3236_v37  ;;  %v3207_v43 = vld [vmem:[%s5021_s2 + $0x268] sm:$0xff]  ;;  %3622 = vst [vmem:[#allocation4 + $0x128] sm:$0xff] %v3621_v35   ;;  %v3254_v46 = vld [vmem:[%s5021_s2 + $0x3e0] sm:$0xff]  ;;  %3667 = vst [vmem:[#allocation4 + $0x170] sm:$0xff] %v3666_v44  }
  0x3b   :  { %3742 = vst [vmem:[#allocation4 + $0x1e8] sm:$0xff] %v3741_v36   ;;  %v3626_v45 = vpack.c.bf16 %v3207_v43, %v3206_v42  ;;  %v3255_v47 = vld [vmem:[%s5021_s2 + $0x3e8] sm:$0xff]  ;;  %v4208_v48 = vld [vmem:[#allocation4 + $0x158] sm:$0xff]   ;;  %v3208_v7 = vld [vmem:[%s5021_s2 + $0x270] sm:$0xff] }
  0x3c   :  { %4004 = vmatpush3.bf16.msra.mxu1 %v4207_v3  ;;  %3702 = vst [vmem:[#allocation4 + $0x1a8] sm:$0xff] %v3701_v40   ;;  %v3746_v49 = vpack.c.bf16 %v3255_v47, %v3254_v46  ;;  %v4209_v50 = vld [vmem:[#allocation4 + $0x118] sm:$0xff]   ;;  %3983 = vmatprep.subr.bf16.mxu0 %v4208_v48  ;;  %v4212_v53 = vld [vmem:[#allocation4 + $0x160] sm:$0xff]   ;;  %v3224_v3 = vld [vmem:[%s5021_s2 + $0x2f0] sm:$0xff] }
  0x3d   :  { %3627 = vst [vmem:[#allocation4 + $0x130] sm:$0xff] %v3626_v45   ;;  %v4210_v51 = vld [vmem:[#allocation4 + $0x1d8] sm:$0xff]   ;;  %3984 = vmatpush3.bf16.msra.mxu0 %v4209_v50  ;;  %v3239_v2 = vld [vmem:[%s5021_s2 + $0x368] sm:$0xff]  ;;  %v3256_v9 = vld [vmem:[%s5021_s2 + $0x3f0] sm:$0xff] }
  0x3e   :  { %3747 = vst [vmem:[#allocation4 + $0x1f0] sm:$0xff] %v3746_v49   ;;  %v4211_v52 = vld [vmem:[#allocation4 + $0x198] sm:$0xff]   ;;  %4005 = vmatprep.subr.bf16.mxu1 %v4210_v51  ;;  %v4213_v54 = vld [vmem:[#allocation4 + $0x120] sm:$0xff]   ;;  %3985 = vmatprep.subr.bf16.mxu0 %v4212_v53  ;;  %v3240_v12 = vld [vmem:[%s5021_s2 + $0x370] sm:$0xff]  ;;  %v2067_v49 = vrot.slane %v4554_v22, %v4504_v59 }
  0x3f   :  { %v4214_v55 = vld [vmem:[#allocation4 + $0x1e0] sm:$0xff]   ;;  %v3225_v4 = vld [vmem:[%s5021_s2 + $0x2f8] sm:$0xff]  ;;  %v3276_v28 = vld [vmem:[%s5021_s2 + $0x490] sm:$0xff] }
  0x40   :  { %4006 = vmatpush3.bf16.msra.mxu1 %v4211_v52  ;;  %v4215_v56 = vld [vmem:[#allocation4 + $0x1a0] sm:$0xff]   ;;  %v4216_v57 = vld [vmem:[#allocation4 + $0x168] sm:$0xff]   ;;  %v3671_v6 = vpack.c.bf16 %v3225_v4, %v3224_v3  ;;  %v3209_v8 = vld [vmem:[%s5021_s2 + $0x278] sm:$0xff] }
  0x41   :  { %3986 = vmatpush3.bf16.msra.mxu0 %v4213_v54  ;;  %4007 = vmatprep.subr.bf16.mxu1 %v4214_v55  ;;  %v4217_v58 = vld [vmem:[#allocation4 + $0x128] sm:$0xff]   ;;  %v3238_v62 = vld [vmem:[%s5021_s2 + $0x360] sm:$0xff]  ;;  %v4220_v63 = vld [vmem:[#allocation4 + $0x170] sm:$0xff]   ;;  %v3631_v10 = vpack.c.bf16 %v3209_v8, %v3208_v7  ;;  %v2083_v54 = vcombine.high %v2067_v49, %v2067_v49 }
  0x42   :  { %3987 = vmatprep.subr.bf16.mxu0 %v4216_v57  ;;  %v4218_v60 = vld [vmem:[#allocation4 + $0x1e8] sm:$0xff]   ;;  %v3706_v5 = vpack.c.bf16 %v3239_v2, %v3238_v62  ;;  %v3257_v11 = vld [vmem:[%s5021_s2 + $0x3f8] sm:$0xff]  ;;  %3672 = vst [vmem:[#allocation4 + $0x178] sm:$0xff] %v3671_v6   ;;  %v3274_v16 = vld [vmem:[%s5021_s2 + $0x480] sm:$0xff] }
  0x43   :  { %v4219_v61 = vld [vmem:[#allocation4 + $0x1a8] sm:$0xff]   ;;  %v3241_v13 = vld [vmem:[%s5021_s2 + $0x378] sm:$0xff]  ;;  %v3751_v14 = vpack.c.bf16 %v3257_v11, %v3256_v9  ;;  %v3258_v18 = vld [vmem:[%s5021_s2 + $0x400] sm:$0xff]  ;;  %3632 = vst [vmem:[#allocation4 + $0x138] sm:$0xff] %v3631_v10  }
  0x44   :  { %4008 = vmatpush3.bf16.msra.mxu1 %v4215_v56  ;;  %v4221_v0 = vld [vmem:[#allocation4 + $0x130] sm:$0xff]   ;;  %3707 = vst [vmem:[#allocation4 + $0x1b0] sm:$0xff] %v3706_v5   ;;  %v3711_v15 = vpack.c.bf16 %v3241_v13, %v3240_v12  ;;  %v3275_v17 = vld [vmem:[%s5021_s2 + $0x488] sm:$0xff]  ;;  %v3306_v21 = vld [vmem:[%s5021_s2 + $0x580] sm:$0xff] }
  0x45   :  { %3988 = vmatpush3.bf16.msra.mxu0 %v4217_v58  ;;  %4009 = vmatprep.subr.bf16.mxu1 %v4218_v60  ;;  %v4222_v1 = vld [vmem:[#allocation4 + $0x1f0] sm:$0xff]   ;;  %v3796_v19 = vpack.c.bf16 %v3275_v17, %v3274_v16  ;;  %v3259_v20 = vld [vmem:[%s5021_s2 + $0x408] sm:$0xff]  ;;  %3752 = vst [vmem:[#allocation4 + $0x1f8] sm:$0xff] %v3751_v14   ;;  %v3290_v26 = vld [vmem:[%s5021_s2 + $0x500] sm:$0xff] }
  0x46   :  { %3989 = vmatprep.subr.bf16.mxu0 %v4220_v63  ;;  %v3307_v23 = vld [vmem:[%s5021_s2 + $0x588] sm:$0xff]  ;;  %3712 = vst [vmem:[#allocation4 + $0x1b8] sm:$0xff] %v3711_v15   ;;  %v3756_v24 = vpack.c.bf16 %v3259_v20, %v3258_v18  ;;  %v3277_v30 = vld [vmem:[%s5021_s2 + $0x498] sm:$0xff]  ;;  %v3260_v31 = vld [vmem:[%s5021_s2 + $0x410] sm:$0xff] }
  0x47   :  { %v3876_v25 = vpack.c.bf16 %v3307_v23, %v3306_v21  ;;  %v3291_v27 = vld [vmem:[%s5021_s2 + $0x508] sm:$0xff]  ;;  %3797 = vst [vmem:[#allocation4 + $0x240] sm:$0xff] %v3796_v19   ;;  %v3261_v32 = vld [vmem:[%s5021_s2 + $0x418] sm:$0xff]  ;;  %v3801_v33 = vpack.c.bf16 %v3277_v30, %v3276_v28  ;;  %v3308_v35 = vld [vmem:[%s5021_s2 + $0x590] sm:$0xff] }
  0x48   :  { %4010 = vmatpush3.bf16.msra.mxu1 %v4219_v61  ;;  %v3836_v29 = vpack.c.bf16 %v3291_v27, %v3290_v26  ;;  %3757 = vst [vmem:[#allocation4 + $0x200] sm:$0xff] %v3756_v24   ;;  %v3761_v34 = vpack.c.bf16 %v3261_v32, %v3260_v31  ;;  %v3309_v36 = vld [vmem:[%s5021_s2 + $0x598] sm:$0xff]  ;;  %v3292_v37 = vld [vmem:[%s5021_s2 + $0x510] sm:$0xff]  ;;  %v3278_v40 = vld [vmem:[%s5021_s2 + $0x4a0] sm:$0xff] }
  0x49   :  { %3990 = vmatpush3.bf16.msra.mxu0 %v4221_v0  ;;  %4011 = vmatprep.subr.bf16.mxu1 %v4222_v1  ;;  %3877 = vst [vmem:[#allocation4 + $0x2c0] sm:$0xff] %v3876_v25   ;;  %v3881_v38 = vpack.c.bf16 %v3309_v36, %v3308_v35  ;;  %v3293_v39 = vld [vmem:[%s5021_s2 + $0x518] sm:$0xff]  ;;  %v3279_v41 = vld [vmem:[%s5021_s2 + $0x4a8] sm:$0xff]  ;;  %3802 = vst [vmem:[#allocation4 + $0x248] sm:$0xff] %v3801_v33  }
  0x4a   :  { %3837 = vst [vmem:[#allocation4 + $0x280] sm:$0xff] %v3836_v29   ;;  %3762 = vst [vmem:[#allocation4 + $0x208] sm:$0xff] %v3761_v34   ;;  %v3841_v42 = vpack.c.bf16 %v3293_v39, %v3292_v37  ;;  %v3806_v43 = vpack.c.bf16 %v3279_v41, %v3278_v40  ;;  %v3262_v44 = vld [vmem:[%s5021_s2 + $0x420] sm:$0xff]  ;;  %v3263_v45 = vld [vmem:[%s5021_s2 + $0x428] sm:$0xff] }
  0x4b   :  { %v4223_v46 = vld [vmem:[#allocation4 + $0x1b0] sm:$0xff]   ;;  %3882 = vst [vmem:[#allocation4 + $0x2c8] sm:$0xff] %v3881_v38   ;;  %v3766_v47 = vpack.c.bf16 %v3263_v45, %v3262_v44  ;;  %v4224_v48 = vld [vmem:[#allocation4 + $0x178] sm:$0xff]   ;;  %v3311_v1 = vld [vmem:[%s5021_s2 + $0x5a8] sm:$0xff] }
  0x4c   :  { %3842 = vst [vmem:[#allocation4 + $0x288] sm:$0xff] %v3841_v42   ;;  %3807 = vst [vmem:[#allocation4 + $0x250] sm:$0xff] %v3806_v43   ;;  %4012 = vmatpush3.bf16.msra.mxu1 %v4223_v46  ;;  %v4225_v50 = vld [vmem:[#allocation4 + $0x138] sm:$0xff]   ;;  %3991 = vmatprep.subr.bf16.mxu0 %v4224_v48  ;;  %v3295_v3 = vld [vmem:[%s5021_s2 + $0x528] sm:$0xff] }
  0x4d   :  { %3767 = vst [vmem:[#allocation4 + $0x210] sm:$0xff] %v3766_v47   ;;  %v4226_v51 = vld [vmem:[#allocation4 + $0x1f8] sm:$0xff]   ;;  %3992 = vmatpush3.bf16.msra.mxu0 %v4225_v50  ;;  %v3280_v6 = vld [vmem:[%s5021_s2 + $0x4b0] sm:$0xff]  ;;  %v3283_v19 = vld [vmem:[%s5021_s2 + $0x4c8] sm:$0xff] }
  0x4e   :  { %v4227_v52 = vld [vmem:[#allocation4 + $0x1b8] sm:$0xff]   ;;  %4013 = vmatprep.subr.bf16.mxu1 %v4226_v51  ;;  %v4228_v53 = vld [vmem:[#allocation4 + $0x240] sm:$0xff]   ;;  %v3264_v8 = vld [vmem:[%s5021_s2 + $0x430] sm:$0xff] }
  0x4f   :  { %v4229_v55 = vld [vmem:[#allocation4 + $0x200] sm:$0xff]   ;;  %4021 = vmatprep.subr.bf16.mxu0 %v4228_v53  ;;  %v3281_v7 = vld [vmem:[%s5021_s2 + $0x4b8] sm:$0xff]  ;;  %v3312_v11 = vld [vmem:[%s5021_s2 + $0x5b0] sm:$0xff] }
  0x50   :  { %4014 = vmatpush3.bf16.msra.mxu1 %v4227_v52  ;;  %2854 = vmatmul.mubr.bf16.vlgmr.msra.gmra.mrb[4].mxu0 %v2067_v49  ;;  %v4230_v56 = vld [vmem:[#allocation4 + $0x2c0] sm:$0xff]   ;;  %v4232_v22 = vld [vmem:[#allocation4 + $0x248] sm:$0xff]   ;;  %v3811_v9 = vpack.c.bf16 %v3281_v7, %v3280_v6  ;;  %v3265_v10 = vld [vmem:[%s5021_s2 + $0x438] sm:$0xff] }
  0x51   :  { %4022 = vmatpush3.bf16.msra.mxu0 %v4229_v55  ;;  %v4231_v57 = vld [vmem:[#allocation4 + $0x280] sm:$0xff]   ;;  %4043 = vmatprep.subr.bf16.mxu1 %v4230_v56  ;;  %v4233_v58 = vld [vmem:[#allocation4 + $0x208] sm:$0xff]   ;;  %v3313_v12 = vld [vmem:[%s5021_s2 + $0x5b8] sm:$0xff]  ;;  %v3771_v13 = vpack.c.bf16 %v3265_v10, %v3264_v8 }
  0x52   :  { %4023 = vmatprep.subr.bf16.mxu0 %v4232_v22  ;;  %v4234_v60 = vld [vmem:[#allocation4 + $0x2c8] sm:$0xff]   ;;  %v3310_v61 = vld [vmem:[%s5021_s2 + $0x5a0] sm:$0xff]  ;;  %v3891_v14 = vpack.c.bf16 %v3313_v12, %v3312_v11  ;;  %v3297_v16 = vld [vmem:[%s5021_s2 + $0x538] sm:$0xff]  ;;  %3812 = vst [vmem:[#allocation4 + $0x258] sm:$0xff] %v3811_v9  }
  0x53   :  { %2894 = vmatmul.mubr.bf16.vlgmr.msra.gmra.mrb[4].mxu1 %v2083_v54  ;;  %v4235_v62 = vld [vmem:[#allocation4 + $0x288] sm:$0xff]   ;;  %v4236_v63 = vld [vmem:[#allocation4 + $0x250] sm:$0xff]   ;;  %v3294_v2 = vld [vmem:[%s5021_s2 + $0x520] sm:$0xff]  ;;  %v3886_v4 = vpack.c.bf16 %v3311_v1, %v3310_v61  ;;  %3772 = vst [vmem:[#allocation4 + $0x218] sm:$0xff] %v3771_v13  }
  0x54   :  { %4044 = vmatpush3.bf16.msra.mxu1 %v4231_v57  ;;  %v4237_v0 = vld [vmem:[#allocation4 + $0x210] sm:$0xff]   ;;  %v3846_v5 = vpack.c.bf16 %v3295_v3, %v3294_v2  ;;  %v3282_v17 = vld [vmem:[%s5021_s2 + $0x4c0] sm:$0xff]  ;;  %v3267_v21 = vld [vmem:[%s5021_s2 + $0x448] sm:$0xff]  ;;  %3892 = vst [vmem:[#allocation4 + $0x2d8] sm:$0xff] %v3891_v14  }
  0x55   :  { %4024 = vmatpush3.bf16.msra.mxu0 %v4233_v58  ;;  %4045 = vmatprep.subr.bf16.mxu1 %v4234_v60  ;;  %3887 = vst [vmem:[#allocation4 + $0x2d0] sm:$0xff] %v3886_v4   ;;  %v3296_v15 = vld [vmem:[%s5021_s2 + $0x530] sm:$0xff]  ;;  %v3266_v20 = vld [vmem:[%s5021_s2 + $0x440] sm:$0xff]  ;;  %v3816_v23 = vpack.c.bf16 %v3283_v19, %v3282_v17  ;;  %v3315_v26 = vld [vmem:[%s5021_s2 + $0x5c8] sm:$0xff] }
  0x56   :  { %4025 = vmatprep.subr.bf16.mxu0 %v4236_v63  ;;  %3847 = vst [vmem:[#allocation4 + $0x290] sm:$0xff] %v3846_v5   ;;  %v3851_v18 = vpack.c.bf16 %v3297_v16, %v3296_v15  ;;  %v3776_v24 = vpack.c.bf16 %v3267_v21, %v3266_v20  ;;  %v3314_v25 = vld [vmem:[%s5021_s2 + $0x5c0] sm:$0xff]  ;;  %v3299_v29 = vld [vmem:[%s5021_s2 + $0x548] sm:$0xff]  ;;  %v3284_v30 = vld [vmem:[%s5021_s2 + $0x4d0] sm:$0xff] }
  0x57   :  { %v3298_v27 = vld [vmem:[%s5021_s2 + $0x540] sm:$0xff]  ;;  %v3896_v28 = vpack.c.bf16 %v3315_v26, %v3314_v25  ;;  %v3285_v31 = vld [vmem:[%s5021_s2 + $0x4d8] sm:$0xff]  ;;  %3817 = vst [vmem:[#allocation4 + $0x260] sm:$0xff] %v3816_v23   ;;  %v3268_v34 = vld [vmem:[%s5021_s2 + $0x450] sm:$0xff] }
  0x58   :  { %4046 = vmatpush3.bf16.msra.mxu1 %v4235_v62  ;;  %3852 = vst [vmem:[#allocation4 + $0x298] sm:$0xff] %v3851_v18   ;;  %3777 = vst [vmem:[#allocation4 + $0x220] sm:$0xff] %v3776_v24   ;;  %v3856_v32 = vpack.c.bf16 %v3299_v29, %v3298_v27  ;;  %v3821_v33 = vpack.c.bf16 %v3285_v31, %v3284_v30  ;;  %v3269_v35 = vld [vmem:[%s5021_s2 + $0x458] sm:$0xff]  ;;  %v3316_v36 = vld [vmem:[%s5021_s2 + $0x5d0] sm:$0xff] }
  0x59   :  { %4026 = vmatpush3.bf16.msra.mxu0 %v4237_v0  ;;  %3897 = vst [vmem:[#allocation4 + $0x2e0] sm:$0xff] %v3896_v28   ;;  %v3781_v37 = vpack.c.bf16 %v3269_v35, %v3268_v34  ;;  %v3317_v38 = vld [vmem:[%s5021_s2 + $0x5d8] sm:$0xff]  ;;  %v3300_v39 = vld [vmem:[%s5021_s2 + $0x550] sm:$0xff]  ;;  %v3286_v43 = vld [vmem:[%s5021_s2 + $0x4e0] sm:$0xff] }
  0x5a   :  { %v3301_v40 = vld [vmem:[%s5021_s2 + $0x558] sm:$0xff]  ;;  %3857 = vst [vmem:[#allocation4 + $0x2a0] sm:$0xff] %v3856_v32   ;;  %3822 = vst [vmem:[#allocation4 + $0x268] sm:$0xff] %v3821_v33   ;;  %v3901_v41 = vpack.c.bf16 %v3317_v38, %v3316_v36  ;;  %v3287_v44 = vld [vmem:[%s5021_s2 + $0x4e8] sm:$0xff] }
  0x5b   :  { %v3861_v42 = vpack.c.bf16 %v3301_v40, %v3300_v39  ;;  %3782 = vst [vmem:[#allocation4 + $0x228] sm:$0xff] %v3781_v37   ;;  %v3826_v46 = vpack.c.bf16 %v3287_v44, %v3286_v43  ;;  %v4240_v48 = vld [vmem:[#allocation4 + $0x258] sm:$0xff]   ;;  %v3271_v62 = vld [vmem:[%s5021_s2 + $0x468] sm:$0xff]  ;;  %v3288_v5 = vld [vmem:[%s5021_s2 + $0x4f0] sm:$0xff] }
  0x5c   :  { %v4238_v45 = vld [vmem:[#allocation4 + $0x2d0] sm:$0xff]   ;;  %3902 = vst [vmem:[#allocation4 + $0x2e8] sm:$0xff] %v3901_v41   ;;  %v4241_v49 = vld [vmem:[#allocation4 + $0x218] sm:$0xff]   ;;  %4027 = vmatprep.subr.bf16.mxu0 %v4240_v48  ;;  %v3319_v0 = vld [vmem:[%s5021_s2 + $0x5e8] sm:$0xff] }
  0x5d   :  { %v4239_v47 = vld [vmem:[#allocation4 + $0x290] sm:$0xff]   ;;  %3862 = vst [vmem:[#allocation4 + $0x2a8] sm:$0xff] %v3861_v42   ;;  %4047 = vmatprep.subr.bf16.mxu1 %v4238_v45  ;;  %3827 = vst [vmem:[#allocation4 + $0x270] sm:$0xff] %v3826_v46   ;;  %v4242_v50 = vld [vmem:[#allocation4 + $0x2d8] sm:$0xff]   ;;  %4028 = vmatpush3.bf16.msra.mxu0 %v4241_v49 }
  0x5e   :  { %4048 = vmatpush3.bf16.msra.mxu1 %v4239_v47  ;;  %v4244_v52 = vld [vmem:[#allocation4 + $0x260] sm:$0xff]   ;;  %v3289_v7 = vld [vmem:[%s5021_s2 + $0x4f8] sm:$0xff]  ;;  %v3272_v8 = vld [vmem:[%s5021_s2 + $0x470] sm:$0xff] }
  0x5f   :  { %v4243_v51 = vld [vmem:[#allocation4 + $0x298] sm:$0xff]   ;;  %4049 = vmatprep.subr.bf16.mxu1 %v4242_v50  ;;  %v4245_v53 = vld [vmem:[#allocation4 + $0x220] sm:$0xff]   ;;  %4029 = vmatprep.subr.bf16.mxu0 %v4244_v52  ;;  %v3831_v10 = vpack.c.bf16 %v3289_v7, %v3288_v5  ;;  %v3320_v12 = vld [vmem:[%s5021_s2 + $0x5f0] sm:$0xff] }
  0x60   :  { %v4246_v54 = vld [vmem:[#allocation4 + $0x2e0] sm:$0xff]   ;;  %v3273_v9 = vld [vmem:[%s5021_s2 + $0x478] sm:$0xff]  ;;  %v3304_v17 = vld [vmem:[%s5021_s2 + $0x570] sm:$0xff] }
  0x61   :  { %4030 = vmatpush3.bf16.msra.mxu0 %v4245_v53  ;;  %v4247_v55 = vld [vmem:[#allocation4 + $0x2a0] sm:$0xff]   ;;  %v4248_v56 = vld [vmem:[#allocation4 + $0x268] sm:$0xff]   ;;  %v3791_v11 = vpack.c.bf16 %v3273_v9, %v3272_v8  ;;  %v3321_v13 = vld [vmem:[%s5021_s2 + $0x5f8] sm:$0xff]  ;;  %3832 = vst [vmem:[#allocation4 + $0x278] sm:$0xff] %v3831_v10  }
  0x62   :  { %4050 = vmatpush3.bf16.msra.mxu1 %v4243_v51  ;;  %v4249_v57 = vld [vmem:[#allocation4 + $0x228] sm:$0xff]   ;;  %v3270_v22 = vld [vmem:[%s5021_s2 + $0x460] sm:$0xff]  ;;  %4031 = vmatprep.subr.bf16.mxu0 %v4248_v56  ;;  %v3911_v15 = vpack.c.bf16 %v3321_v13, %v3320_v12  ;;  %v3305_v18 = vld [vmem:[%s5021_s2 + $0x578] sm:$0xff] }
  0x63   :  { %4051 = vmatprep.subr.bf16.mxu1 %v4246_v54  ;;  %v4250_v58 = vld [vmem:[#allocation4 + $0x2e8] sm:$0xff]   ;;  %v3318_v63 = vld [vmem:[%s5021_s2 + $0x5e0] sm:$0xff]  ;;  %v3786_v1 = vpack.c.bf16 %v3271_v62, %v3270_v22  ;;  %3792 = vst [vmem:[#allocation4 + $0x238] sm:$0xff] %v3791_v11   ;;  %v3871_v20 = vpack.c.bf16 %v3305_v18, %v3304_v17  ;;  %v3325_v24 = vld [vmem:[%s5021_s2 + $0x618] sm:$0xff] }
  0x64   :  { %v4251_v60 = vld [vmem:[#allocation4 + $0x2a8] sm:$0xff]   ;;  %v4252_v61 = vld [vmem:[#allocation4 + $0x270] sm:$0xff]   ;;  %v3906_v2 = vpack.c.bf16 %v3319_v0, %v3318_v63  ;;  %v3302_v3 = vld [vmem:[%s5021_s2 + $0x560] sm:$0xff]  ;;  %3912 = vst [vmem:[#allocation4 + $0x2f8] sm:$0xff] %v3911_v15  }
  0x65   :  { %4032 = vmatpush3.bf16.msra.mxu0 %v4249_v57  ;;  %v3303_v4 = vld [vmem:[%s5021_s2 + $0x568] sm:$0xff]  ;;  %3787 = vst [vmem:[#allocation4 + $0x230] sm:$0xff] %v3786_v1   ;;  %v3322_v19 = vld [vmem:[%s5021_s2 + $0x600] sm:$0xff]  ;;  %v3324_v23 = vld [vmem:[%s5021_s2 + $0x610] sm:$0xff] }
  0x66   :  { %4052 = vmatpush3.bf16.msra.mxu1 %v4247_v55  ;;  %4033 = vmatprep.subr.bf16.mxu0 %v4252_v61  ;;  %v3866_v6 = vpack.c.bf16 %v3303_v4, %v3302_v3  ;;  %3907 = vst [vmem:[#allocation4 + $0x2f0] sm:$0xff] %v3906_v2   ;;  %v4913_v14 = vld [vmem:[%s5019_s0 + $0x8] sm:$0x1f]  ;;  %v3326_v27 = vld [vmem:[%s5021_s2 + $0x620] sm:$0xff]  ;;  %v3328_v29 = vld [vmem:[%s5021_s2 + $0x630] sm:$0xff]  ;;  %v3921_v30 = vpack.c.bf16 %v3325_v24, %v3324_v23 }
  0x67   :  { %4053 = vmatprep.subr.bf16.mxu1 %v4250_v58  ;;  %v2093_v16 = vrot.slane %v4913_v14, %v4504_v59  ;;  %v3323_v21 = vld [vmem:[%s5021_s2 + $0x608] sm:$0xff]  ;;  %3872 = vst [vmem:[#allocation4 + $0x2b8] sm:$0xff] %v3871_v20   ;;  %v3329_v32 = vld [vmem:[%s5021_s2 + $0x638] sm:$0xff]  ;;  %v1819_v33 = vld [vmem:[%s5023_s4] sm:$0x1] }
  0x68   :  { %3867 = vst [vmem:[#allocation4 + $0x2b0] sm:$0xff] %v3866_v6   ;;  %v3916_v26 = vpack.c.bf16 %v3323_v21, %v3322_v19  ;;  %v3327_v28 = vld [vmem:[%s5021_s2 + $0x628] sm:$0xff] }
  0x69   :  { %v2101_v25 = vcombine.high %v2093_v16, %v2093_v16  ;;  %v3926_v31 = vpack.c.bf16 %v3327_v28, %v3326_v27 }
  0x6a   :  { %4054 = vmatpush3.bf16.msra.mxu1 %v4251_v60 }
  0x6b   :  { %10 = vsyncpa [#allocation3], 0  ;;  %v2122_v34 = vrot.slane %v2101_v25, %v4504_v59  ;;  %3917 = vst [vmem:[#allocation4 + $0x300] sm:$0xff] %v3916_v26   ;;  %v3931_v35 = vpack.c.bf16 %v3329_v32, %v3328_v29  ;;  %v4256_v40 = vld [vmem:[#allocation4 + $0x278] sm:$0xff]   ;;  %v2108_v41 = vrot.slane %v2093_v16, %v4504_v59  ;;  %v4290_v45 = vmov 0.0   ;;  %v3023_v55 = vld [vmem:[%s5020_s1 + $0x8] sm:$0xff] }
  0x6c   :  { %1821 = vst [vmem:[#allocation5] sm:$0x1] %v1819_v33  ;;  %3922 = vst [vmem:[#allocation4 + $0x308] sm:$0xff] %v3921_v30   ;;  %v4253_v36 = vld [vmem:[#allocation4 + $0x230] sm:$0xff]   ;;  %v4257_v42 = vld [vmem:[#allocation4 + $0x238] sm:$0xff]   ;;  %vm4291_vm0 = vmmov 0   ;;  %v2086_v49 = vcombine.high %v4913_v14, %v4913_v14 }
  0x6d   :  { %3927 = vst [vmem:[#allocation4 + $0x310] sm:$0xff] %v3926_v31   ;;  %2933 = vmatprep.mubr.bf16.mxu0 %v2122_v34  ;;  %v2124_v37 = vcombine.high %v2122_v34, %v2122_v34  ;;  %3932 = vst [vmem:[#allocation4 + $0x318] sm:$0xff] %v3931_v35   ;;  %v4254_v38 = vld [vmem:[#allocation4 + $0x2f0] sm:$0xff]   ;;  %4034 = vmatpush3.bf16.msra.mxu0 %v4253_v36  ;;  %v4258_v43 = vld [vmem:[#allocation4 + $0x2f8] sm:$0xff]   ;;  %v2123_v47 = vcombine.high %v2108_v41, %v2108_v41  ;;  %vm2737_vm1 = vcmask 523264   ;;  %v4292_v57 = vmov 0.0|0.0  }
  0x6e   :  { %4055 = vmatprep.subr.bf16.mxu1 %v4254_v38  ;;  %4035 = vmatprep.subr.bf16.mxu0 %v4256_v40  ;;  %v4260_v44 = vld [vmem:[#allocation4 + $0x2b8] sm:$0xff]   ;;  %v2100_v51 = vrot.slane %v2086_v49, %v4504_v59  ;;  %v3024_v56 = vld [vmem:[%s5020_s1 + $0x10] sm:$0xff]  ;;  %v3027_v61 = vld [vmem:[%s5020_s1 + $0x28] sm:$0xff]  ;;  %vm3115_vm2 = vcmask 74752  }
  0x6f   :  { %v4255_v39 = vld [vmem:[#allocation4 + $0x2b0] sm:$0xff]   ;;  %2973 = vmatprep.mubr.bf16.mxu1 %v2124_v37  ;;  %v3022_v54 = vld [vmem:[%s5020_s1] sm:$0xff]  ;;  %v3031_v3 = vld [vmem:[%s5020_s1 + $0x48] sm:$0xff] }
  0x70   :  { %4056 = vmatpush3.bf16.msra.mxu1 %v4255_v39  ;;  %v2115_v53 = vrot.slane %v2100_v51, %v4504_v59  ;;  %v4135_v22 = vpack.c.bf16 %v3023_v55, %v3022_v54  ;;  %v3025_v59 = vld [vmem:[%s5020_s1 + $0x18] sm:$0xff]  ;;  %v3026_v60 = vld [vmem:[%s5020_s1 + $0x20] sm:$0xff]  ;;  %v3028_v63 = vld [vmem:[%s5020_s1 + $0x30] sm:$0xff] }
  0x71   :  { %4036 = vmatpush3.bf16.msra.mxu0 %v4257_v42  ;;  %4057 = vmatprep.subr.bf16.mxu1 %v4258_v43  ;;  %v4138_v58 = vpack.c.bf16 %v3025_v59, %v3024_v56  ;;  %v4141_v62 = vpack.c.bf16 %v3027_v61, %v3026_v60  ;;  %v3029_v0 = vld [vmem:[%s5020_s1 + $0x38] sm:$0xff]  ;;  %v3030_v2 = vld [vmem:[%s5020_s1 + $0x40] sm:$0xff]  ;;  %v3032_v5 = vld [vmem:[%s5020_s1 + $0x50] sm:$0xff] }
  0x72   :  { %4087 = vmatprep.subr.bf16.mxu0 %v4290_v45  ;;  %v4261_v46 = vld [vmem:[#allocation4 + $0x300] sm:$0xff]   ;;  %v4144_v1 = vpack.c.bf16 %v3029_v0, %v3028_v63  ;;  %v4147_v4 = vpack.c.bf16 %v3031_v3, %v3030_v2  ;;  %v3033_v6 = vld [vmem:[%s5020_s1 + $0x58] sm:$0xff]  ;;  %v3036_v11 = vld [vmem:[%s5020_s1 + $0x70] sm:$0xff] }
  0x73   :  { %v4262_v48 = vld [vmem:[#allocation4 + $0x308] sm:$0xff]   ;;  %v4150_v7 = vpack.c.bf16 %v3033_v6, %v3032_v5  ;;  %v3034_v8 = vld [vmem:[%s5020_s1 + $0x60] sm:$0xff]  ;;  %v3037_v12 = vld [vmem:[%s5020_s1 + $0x78] sm:$0xff] }
  0x74   :  { %4058 = vmatpush3.bf16.msra.mxu1 %v4260_v44  ;;  %2934 = vmatmul.mubr.bf16.vlgmr.msra.gmra.mrb[8].mxu0 %v2108_v41  ;;  %v4263_v50 = vld [vmem:[#allocation4 + $0x310] sm:$0xff]   ;;  %v4264_v52 = vld [vmem:[#allocation4 + $0x318] sm:$0xff]   ;;  %v3035_v9 = vld [vmem:[%s5020_s1 + $0x68] sm:$0xff]  ;;  %v4156_v13 = vpack.c.bf16 %v3037_v12, %v3036_v11  ;;  %s4293_s1 = smov [#allocation2]  }
  0x75   :  { %4088 = vmatpush3.bf16.msra.mxu0 %v4261_v46  ;;  %4095 = vmatprep.mubr.msk.bf16.mxu0 %vm4291_vm0, %v4290_v45  ;;  %v4153_v10 = vpack.c.bf16 %v3035_v9, %v3034_v8  ;;  %v1822_v19 = vld [vmem:[%s5022_s3] sm:$0x1]  ;;  %v3330_v20 = vld [vmem:[#allocation5] ss:$0 sm:$0xff]  ;;  %s3123_s3 = sshll.u32 %s4293_s1, 4  ;;  %s3124_s3 = int_to_ptr.vmem [resolvable:$true] %s3123_s3 }
  0x76   :  { %4089 = vmatprep.subr.bf16.mxu0 %v4290_v45  ;;  %4134 = vmatprep.subr.bf16.mxu1 %v4292_v57  ;;  %1824 = vst [vmem:[#allocation6] sm:$0x1] %v1822_v19  ;;  %s4265_s27 = scalar_lea.vmem %s3124_s3, 32  ;;  %p4270_p1 = scmp.lt.s32.totalorder %s3124_s3, %s3124_s3 }
  0x77   :  { %2974 = vmatmul.mubr.bf16.vlgmr.msra.gmra.mrb[8].mxu1 %v2123_v47  ;;  %p4266_p0 = scmp.ne.s32.totalorder %s3124_s3, %s4265_s27  ;;  %p4271_p2 = scmp.lt.s32.totalorder %s4265_s27, %s4265_s27 }
  0x78   :  { %4131 = vmatprep.mubr.msk.f32.mxu1 %vm4291_vm0, %v4290_v45  ;;  %4136 = vmatpush3.bf16.msra.mxu1 %v4135_v22 }
  0x79   :  { %4090 = vmatpush3.bf16.msra.mxu0 %v4262_v48  ;;  %4137 = vmatprep.subr.bf16.mxu1 %v4292_v57  ;;  %p4272_p3 = por %p4271_p2, %p4270_p1 }
  0x7a   :  { %4091 = vmatprep.subr.bf16.mxu0 %v4290_v45 }
  0x7b   :  { %p4273_p4 = pnand %p4272_p3, %p4266_p0 }
  0x7c   :  { %4139 = vmatpush3.bf16.msra.mxu1 %v4138_v58 }
  0x7d   :  { %4092 = vmatpush3.bf16.msra.mxu0 %v4263_v50  ;;  %4140 = vmatprep.subr.bf16.mxu1 %v4292_v57  ;;  %v3432_v59 = vld [vmem:[#allocation6] ss:$0 sm:$0xff] }
  0x7e   :  { %4093 = vmatprep.subr.bf16.mxu0 %v4290_v45 }
  0x80   :  { %4142 = vmatpush3.bf16.msra.mxu1 %v4141_v62 }
  0x81   :  { %4094 = vmatpush3.bf16.msra.mxu0 %v4264_v52  ;;  %4143 = vmatprep.subr.bf16.mxu1 %v4292_v57 }
  0x84   :  { %4096 = vmatmul.mubr.msk.bf16.vlgmr.msra.gmra.mrb[12].mxu0 %vm2737_vm1, %v2115_v53  ;;  %4145 = vmatpush3.bf16.msra.mxu1 %v4144_v1 }
  0x85   :  { %4146 = vmatprep.subr.bf16.mxu1 %v4292_v57 }
  0x88   :  { %4148 = vmatpush3.bf16.msra.mxu1 %v4147_v4 }
  0x89   :  { %4149 = vmatprep.subr.bf16.mxu1 %v4292_v57 }
  0x8c   :  { %4151 = vmatpush3.bf16.msra.mxu1 %v4150_v7 }
  0x8d   :  { %4152 = vmatprep.subr.bf16.mxu1 %v4292_v57 }
  0x90   :  { %4154 = vmatpush3.bf16.msra.mxu1 %v4153_v10 }
  0x91   :  { %4155 = vmatprep.subr.bf16.mxu1 %v4292_v57 }
  0x94   :  { %4157 = vmatpush3.bf16.msra.mxu1 %v4156_v13 }
 0x100   :  { %v3949_v14 = vpop.f32.mrb[0].mxu0 }
 0x101   :  { %v3950_v15 = vpop.f32.mrb[1].mxu0 }
 0x102   :  { %v3951_v16 = vadd.f32 %v3950_v15, %v3949_v14  ;;  %v3952_v17 = vpop.f32.mrb[2].mxu0 }
 0x103   :  { %v3953_v18 = vpop.f32.mrb[3].mxu0 }
 0x104   :  { %v2776_v21 = vadd.f32 %v3951_v16, %v3330_v20 }
 0x106   :  { %v3971_v23 = vpop.f32.mrb[0].mxu1 }
 0x107   :  { %v3972_v24 = vpop.f32.mrb[1].mxu1 }
 0x108   :  { %v3973_v25 = vadd.f32 %v3972_v24, %v3971_v23  ;;  %v3974_v26 = vpop.f32.mrb[2].mxu1 }
 0x109   :  { %v3975_v27 = vpop.f32.mrb[3].mxu1 }
 0x10a   :  { %v2816_v28 = vadd.f32 %v3973_v25, %v2776_v21 }
 0x123   :  { %v3993_v29 = vpop.f32.mrb[4].mxu0 }
 0x124   :  { %v3994_v30 = vpop.f32.mrb[5].mxu0 }
 0x125   :  { %v3995_v31 = vadd.f32 %v3994_v30, %v3993_v29  ;;  %v3996_v32 = vpop.f32.mrb[6].mxu0 }
 0x126   :  { %v4015_v33 = vpop.f32.mrb[4].mxu1  ;;  %v3997_v34 = vpop.f32.mrb[7].mxu0 }
 0x127   :  { %v4016_v35 = vpop.f32.mrb[5].mxu1  ;;  %v2856_v36 = vadd.f32 %v3995_v31, %v2816_v28 }
 0x128   :  { %v4017_v37 = vadd.f32 %v4016_v35, %v4015_v33  ;;  %v4018_v38 = vpop.f32.mrb[6].mxu1 }
 0x129   :  { %v4019_v39 = vpop.f32.mrb[7].mxu1 }
 0x12a   :  { %v2896_v40 = vadd.f32 %v4017_v37, %v2856_v36 }
 0x147   :  { %v4037_v41 = vpop.f32.mrb[8].mxu0 }
 0x148   :  { %v4038_v42 = vpop.f32.mrb[9].mxu0 }
 0x149   :  { %v4039_v43 = vadd.f32 %v4038_v42, %v4037_v41  ;;  %v4040_v44 = vpop.f32.mrb[10].mxu0 }
 0x14a   :  { %v4059_v45 = vpop.f32.mrb[8].mxu1  ;;  %v4041_v46 = vpop.f32.mrb[11].mxu0 }
 0x14b   :  { %v4060_v47 = vpop.f32.mrb[9].mxu1  ;;  %v2936_v48 = vadd.f32 %v4039_v43, %v2896_v40 }
 0x14c   :  { %v4061_v49 = vadd.f32 %v4060_v47, %v4059_v45  ;;  %v4062_v50 = vpop.f32.mrb[10].mxu1 }
 0x14d   :  { %v4063_v51 = vpop.f32.mrb[11].mxu1 }
 0x14e   :  { %v2976_v52 = vadd.f32 %v4061_v49, %v2936_v48 }
 0x157   :  { %v3015_v53 = vpop.f32.mrb[12].mxu0 }
 0x158   :  { %v3016_v54 = vadd.f32 %v3015_v53, %v2976_v52  ;;  %v4097_v55 = vpop.f32.mrb[13].mxu0 }
 0x159   :  { %v3018_v56 = vpop.f32.mrb[14].mxu0 }
 0x15a   :  { %v3021_v57 = vmax.f32 %v3016_v54, 0.0  ;;  %v4098_v22 = vpop.f32.mrb[15].mxu0 }
 0x15c   :  { %4132 = vmatmul.mubr.f32.vlgmr.msra.gmra.mrb[12].mxu1 %v3021_v57 }
 0x22f   :  { %v3111_v58 = vpop.f32.mrb[12].mxu1 }
 0x230   :  { %v3112_v60 = vadd.f32 %v3432_v59, %v3111_v58  ;;  %v4133_v61 = vpop.f32.mrb[13].mxu1 }
 0x232   :  { %3116 = vst.msk [vmem:[#allocation2] sm:$0x3] %vm3115_vm2, %v3112_v60 }
 0x233   :  { %4276 = shalt.err (!%p4273_p4)
}
 0x234   :  { %s4277_s30 = scalar_lea.hbm %s5024_s5, 32 }
 0x235   :  { %p4278_p5 = scmp.ne.s32.totalorder %s5024_s5, %s4277_s30  ;;  %p4281_p6 = scmp.lt.u32.totalorder %s4277_s30, %s5024_s5 }
 0x237   :  { %p4283_p7 = pnand %p4281_p6, %p4278_p5 }
 0x239   :  { %4286 = shalt.err (!%p4283_p7)
}
 0x23a   :  { %3126 = dma.vmem_to_hbm [thread:$0]  %s3124_s3, 32, %s5024_s5, [#allocation3]  }
 0x23b   :  { %4287 = dma.done.wait [#allocation3], 32  }
 0x23c   :  { %4288 = vsyncadd [#allocation3], 4294967264 }
 0x23d   :  { %3130 = vsyncpa [#allocation3], 1 }

</bundles_post_ra>
